<compile_context>
chip_gen: v5e
topology: v5e:2x2
jax: 0.10.0
libtpu: 0.0.40
codegen_flags: <defaults>
</compile_context>

<pallas_src>
import functools

import numpy as np

import jax
import jax.numpy as jnp
from jax import lax
from jax.experimental import pallas as pl
from jax.experimental.pallas import tpu as pltpu


LRN_SIZE, LRN_ALPHA, LRN_BETA, LRN_K = 25, 1e-4, 0.75, 1.0


# ----------------------------------------------------------------------------
# Fused Pallas kernel: whole network, one invocation, VMEM-resident.
# Activation slab layout: (rows, channels) with rows ordered (w, h, b) so that
# rb = batch*num_channel rows (a multiple of 8 here) form one w-position block.
# ----------------------------------------------------------------------------
def _alexnet_fused_kernel(
    p1_ref, w1_ref, b1_ref, band1_ref,
    w2_ref, b2_ref, band2_ref,
    w3_ref, b3_ref,
    w4_ref, b4_ref,
    w5_ref, b5_ref,
    fw1_ref, fb1_ref,
    fw2_ref, fb2_ref,
    fw3_ref, fb3_ref,
    out_ref,
    flat_ref,
    *, rb, nb, nch, w1_width, taps2, taps3):
  f32 = jnp.float32

  def dot(a, w):
    # Weights are streamed as bf16 (half the HBM bytes); math stays in f32.
    return jnp.dot(a, w.astype(f32), preferred_element_type=f32)

  def relu(a):
    return jnp.maximum(a, 0.0)

  def lrn(a, band_ref):
    # PyTorch LocalResponseNorm: x / (k + alpha/size * windowed_sum(x^2))**0.75
    # band is the (C, C) symmetric 0/1 channel-window matrix.
    s = dot(a * a, band_ref[...])
    base = LRN_K + (LRN_ALPHA / LRN_SIZE) * s
    t = lax.rsqrt(base)             # base >= k = 1 > 0
    return a * (t * jnp.sqrt(t))    # base ** -0.75  (beta fixed at 0.75)

  def shift_w(a, d, wcur):
    # Shift along w by d taps: whole rb-row (tile-aligned) blocks move, out-of-
    # range blocks become zeros.  Pure slice + concat — no MXU, no masks.
    c = a.shape[1]
    if d == 0:
      return a
    z = jnp.zeros((abs(d) * rb, c), f32)
    if d > 0:
      return jnp.concatenate([a[d * rb:, :], z], axis=0)
    return jnp.concatenate([z, a[:(wcur + d) * rb, :]], axis=0)

  def conv(a, w_ref, b_ref, wcur, taps):
    # Fused 1xK conv: lane-concat the shifted copies into one im2col slab and
    # run a single (wcur*rb, ntaps*Cin) @ (ntaps*Cin, Cout) MXU matmul.
    cols = jnp.concatenate([shift_w(a, d, wcur) for d in taps], axis=1)
    return relu(dot(cols, w_ref[...]) + b_ref[...])

  def maxpool_w(a, wcur, pool):
    # Floor-mode max pool along w: elementwise max of whole row blocks, then
    # compaction by tile-aligned static slices + concat (VPU only, no MXU).
    wo = wcur // pool
    blocks = []
    for o in range(wo):
      blk = a[o * pool * rb:(o * pool + 1) * rb, :]
      for p in range(1, pool):
        blk = jnp.maximum(blk, a[(o * pool + p) * rb:(o * pool + p + 1) * rb, :])
      blocks.append(blk)
    return blocks[0] if wo == 1 else jnp.concatenate(blocks, axis=0)

  # --- stage 1: conv1 (wrapper-built im2col patches) + ReLU, LRN, MaxPool(1,4)
  a = relu(dot(p1_ref[...], w1_ref[...]) + b1_ref[...])        # (W1*rb, 64)
  a = lrn(a, band1_ref)
  a = maxpool_w(a, w1_width, 4)
  wc = w1_width // 4
  # --- stage 2: conv2 + ReLU, LRN, MaxPool(1,4) ------------------------------
  a = conv(a, w2_ref, b2_ref, wc, taps2)                       # (., 128)
  a = lrn(a, band2_ref)
  a = maxpool_w(a, wc, 4)
  wc = wc // 4
  # --- stage 3: conv3/4/5 + ReLU, MaxPool(1,2) -------------------------------
  a = conv(a, w3_ref, b3_ref, wc, taps3)                       # (., 256)
  a = conv(a, w4_ref, b4_ref, wc, taps3)                       # (., 128)
  a = conv(a, w5_ref, b5_ref, wc, taps3)                       # (., 64)
  a = maxpool_w(a, wc, 2)
  wc = wc // 2
  # --- flatten (NCHW order folded into fw1) + FC stack -----------------------
  flat_ref[...] = a                                            # (npos*nb, 64)
  npos = nch * wc
  f = jnp.concatenate(
      [flat_ref[pos * nb:(pos + 1) * nb, :] for pos in range(npos)], axis=1)
  h = relu(dot(f, fw1_ref[...]) + fb1_ref[...])                # (nb, hid)
  # TODO(synk): nn.Dropout treated as identity (eval-mode semantics).
  h = relu(dot(h, fw2_ref[...]) + fb2_ref[...])
  out_ref[...] = dot(h, fw3_ref[...]) + fb3_ref[...]           # (nb, classes)


# ----------------------------------------------------------------------------
# Init-time constant builders (nothing here runs per forward step).
# ----------------------------------------------------------------------------
def _lrn_band(C, size):
  """PyTorch LocalResponseNorm window: channels [c - size//2, c + (size-1)//2]."""
  lo, hi = size // 2, (size - 1) // 2
  ch = np.arange(C)
  return ((ch[None, :] >= ch[:, None] - lo) &
          (ch[None, :] <= ch[:, None] + hi)).astype(np.float32)


def prepare_kernel_params(params, batch, num_channel, T):
  """Re-lay weights once; returns (device params dict, static config dict)."""
  H, B = int(num_channel), int(batch)
  RB = B * H
  W1 = (T - 51) // 4 + 1
  Wp1 = W1 // 4
  Wp2 = Wp1 // 4
  Wp3 = Wp2 // 2
  assert W1 >= 4 and Wp1 >= 4 and Wp2 >= 2 and Wp3 >= 1, (W1, Wp1, Wp2, Wp3)

  # Taps that can touch a valid output column (the rest only read zero padding).
  taps2 = tuple(d for d in range(-7, 8) if abs(d) <= Wp1 - 1)
  taps3 = tuple(d for d in range(-7, 8) if abs(d) <= Wp2 - 1)

  def npf(a):
    return np.asarray(a, np.float32)

  kp = {}
  # conv1: (64,1,1,51) -> (51,64) transposed for the (rows, taps) @ (taps, 64)
  # matmul; contraction zero-padded 51 -> 64 for lane friendliness.
  w1 = npf(params['conv1_w']).reshape(64, 51).T               # (51, 64)
  w1p = np.zeros((64, 64), np.float32)
  w1p[:51, :] = w1
  kp['w1'] = w1p
  kp['b1'] = npf(params['conv1_b']).reshape(1, -1)
  kp['band1'] = _lrn_band(64, LRN_SIZE)
  kp['band2'] = _lrn_band(128, LRN_SIZE)

  def pack_conv(wkey, taps):
    w = npf(params[wkey])                                      # (Cout, Cin, 1, 15)
    cout, cin, _, kw = w.shape
    w = w.reshape(cout, cin, kw)
    pad = (kw - 1) // 2
    # Wpack[ti*Cin + ci, co] = w[co, ci, taps[ti] + pad]
    return np.concatenate([w[:, :, d + pad].T for d in taps], axis=0)

  kp['w2'] = pack_conv('conv2_w', taps2)
  kp['b2'] = npf(params['conv2_b']).reshape(1, -1)
  kp['w3'] = pack_conv('conv3_w', taps3)
  kp['b3'] = npf(params['conv3_b']).reshape(1, -1)
  kp['w4'] = pack_conv('conv4_w', taps3)
  kp['b4'] = npf(params['conv4_b']).reshape(1, -1)
  kp['w5'] = pack_conv('conv5_w', taps3)
  kp['b5'] = npf(params['conv5_b']).reshape(1, -1)

  # FC1: fold the NCHW flatten permutation into the weight.  The kernel
  # lane-concatenates positions in row order pos_row = w*H + h; PyTorch's
  # flatten index is c*(H*Wp3) + h*Wp3 + w.
  c_last = int(params['conv5_w'].shape[0])
  hwp = H * Wp3
  hid, in_feature = params['fc1_w'].shape
  assert in_feature == c_last * hwp, (in_feature, c_last, hwp)
  fw1 = npf(params['fc1_w'])
  fw1map = np.zeros((hwp * c_last, hid), np.float32)
  for hh in range(H):
    for ww in range(Wp3):
      pos_row = ww * H + hh
      pos_pt = hh * Wp3 + ww
      fw1map[pos_row * c_last:(pos_row + 1) * c_last, :] = fw1[:, pos_pt::hwp].T
  kp['fw1'] = fw1map
  kp['fb1'] = npf(params['fc1_b']).reshape(1, -1)
  kp['fw2'] = npf(params['fc2_w']).T
  kp['fb2'] = npf(params['fc2_b']).reshape(1, -1)
  kp['fw3'] = npf(params['fc3_w']).T
  kp['fb3'] = npf(params['fc3_b']).reshape(1, -1)

  num_classes = int(params['fc3_w'].shape[0])

  # Rough cost estimate (scheduling hint only).
  def mm(m, k, n):
    return 2 * m * k * n
  r1, r2, r3 = W1 * RB, Wp1 * RB, Wp2 * RB
  flops = (mm(r1, 64, 64) + mm(r1, 64, 64) +
           mm(r2, len(taps2) * 64, 128) + mm(r2, 128, 128) +
           mm(r3, len(taps3) * 128, 256) + mm(r3, len(taps3) * 256, 128) +
           mm(r3, len(taps3) * 128, 64) +
           mm(B, c_last * hwp, hid) + mm(B, hid, hid) + mm(B, hid, num_classes))
  transcendentals = 2 * (r1 * 64 + r2 * 128)

  bf16_keys = {'w1', 'w2', 'w3', 'w4', 'w5', 'fw1', 'fw2', 'fw3'}
  bytes_accessed = r1 * 64 * 4 + B * num_classes * 4
  for k, v in kp.items():
    bytes_accessed += int(np.prod(v.shape)) * (2 if k in bf16_keys else 4)

  cfg = dict(
      batch=B, num_channel=H, rb=RB, w1=W1, wp1=Wp1, wp2=Wp2, wp3=Wp3,
      taps2=taps2, taps3=taps3, num_classes=num_classes, c_last=c_last,
      flat_rows=Wp3 * RB, flops=int(flops),
      transcendentals=int(transcendentals), bytes=int(bytes_accessed))

  kparams = {
      k: jnp.asarray(v, jnp.bfloat16 if k in bf16_keys else jnp.float32)
      for k, v in kp.items()
  }
  return kparams, cfg


# ----------------------------------------------------------------------------
# Forward pass
# ----------------------------------------------------------------------------
def _conv1_patches(x, kw, stride, k_pad):
  """im2col for conv1 (the only wrapper-side data movement).

  Rows are ordered (w, h, b) to match the kernel's slab layout.  The
  per-output-position strided window gather has no clean vectorized in-kernel
  form, so it stays in XLA (a single tiny gather + transpose).
  """
  B, H, T = x.shape
  Wo = (T - kw) // stride + 1
  idx = jnp.arange(Wo)[:, None] * stride + jnp.arange(kw)[None, :]
  p = x[:, :, idx]                                             # (B, H, Wo, kw)
  p = jnp.transpose(p, (2, 1, 0, 3)).reshape(Wo * H * B, kw)   # rows (w, h, b)
  if k_pad > kw:
    p = jnp.pad(p, ((0, 0), (0, k_pad - kw)))
  return p                                                     # (Wo*H*B, k_pad)


def make_forward(cfg):
  """enc_model == 'raw': builds forward(kparams, x) -> ((B, num_classes), 0)."""
  kernel = functools.partial(
      _alexnet_fused_kernel,
      rb=cfg['rb'], nb=cfg['batch'], nch=cfg['num_channel'],
      w1_width=cfg['w1'], taps2=cfg['taps2'], taps3=cfg['taps3'])

  batch = cfg['batch']
  num_classes = cfg['num_classes']
  flat_rows = cfg['flat_rows']
  c_last = cfg['c_last']
  cost = pl.CostEstimate(flops=cfg['flops'],
                         transcendentals=cfg['transcendentals'],
                         bytes_accessed=cfg['bytes'])

  def forward(kparams, x):
    x = x.astype(jnp.float32)
    p1 = _conv1_patches(x, kw=51, stride=4, k_pad=kparams['w1'].shape[0])
    out = pl.pallas_call(
        kernel,
        out_shape=jax.ShapeDtypeStruct((batch, num_classes), jnp.float32),
        scratch_shapes=[pltpu.VMEM((flat_rows, c_last), jnp.float32)],
        compiler_params=pltpu.CompilerParams(
            vmem_limit_bytes=16 * 1024 * 1024),
        cost_estimate=cost,
    )(p1,
      kparams['w1'], kparams['b1'], kparams['band1'],
      kparams['w2'], kparams['b2'], kparams['band2'],
      kparams['w3'], kparams['b3'],
      kparams['w4'], kparams['b4'],
      kparams['w5'], kparams['b5'],
      kparams['fw1'], kparams['fb1'],
      kparams['fw2'], kparams['fb2'],
      kparams['fw3'], kparams['fb3'])
    return out, 0

  return forward


# ----------------------------------------------------------------------------
# Parameters (deterministic, synthetic) and a plain-JAX reference for checking
# ----------------------------------------------------------------------------
def init_params(key, num_channel, num_classes, T):
  W1 = (T - 51) // 4 + 1
  W4 = ((W1 // 4) // 4) // 2
  in_feature = 64 * num_channel * W4
  hid = in_feature // 2
  keys = jax.random.split(key, 8)

  def nrm(k, shape, std=0.1):
    return std * jax.random.normal(k, shape, dtype=jnp.float32)

  return {
      'conv1_w': nrm(keys[0], (64, 1, 1, 51)),
      'conv1_b': jnp.zeros((64,), jnp.float32),
      'conv2_w': nrm(keys[1], (128, 64, 1, 15)),
      'conv2_b': jnp.ones((128,), jnp.float32),   # net[3].bias = 1
      'conv3_w': nrm(keys[2], (256, 128, 1, 15)),
      'conv3_b': jnp.zeros((256,), jnp.float32),
      'conv4_w': nrm(keys[3], (128, 256, 1, 15)),
      'conv4_b': jnp.ones((128,), jnp.float32),   # net[9].bias = 1
      'conv5_w': nrm(keys[4], (64, 128, 1, 15)),
      'conv5_b': jnp.ones((64,), jnp.float32),    # net[11].bias = 1
      'fc1_w': nrm(keys[5], (hid, in_feature)),
      'fc1_b': jnp.zeros((hid,), jnp.float32),
      'fc2_w': nrm(keys[6], (hid, hid)),
      'fc2_b': jnp.zeros((hid,), jnp.float32),
      'fc3_w': nrm(keys[7], (num_classes, hid)),
      'fc3_b': jnp.zeros((num_classes,), jnp.float32),
  }


def _reference_forward(params, x):
  """Plain-JAX (XLA, no Pallas) implementation of the same forward."""
  x = x.astype(jnp.float32)[:, None, :, :]                  # (B, 1, H, T)

  def conv1xk(z, w, b, stride, pad, relu):
    B, C, H, W = z.shape
    cout, cin, _, kw = w.shape
    zp = jnp.pad(z, ((0, 0), (0, 0), (0, 0), (pad, pad)))
    Wo = (W + 2 * pad - kw) // stride + 1
    idx = jnp.arange(Wo)[:, None] * stride + jnp.arange(kw)[None, :]
    pt = zp[:, :, :, idx]                                   # (B, C, H, Wo, kw)
    pt = pt.transpose(0, 2, 3, 1, 4).reshape(B * H * Wo, C * kw)
    out = pt @ w.reshape(cout, cin * kw).T + b[None, :]
    if relu:
      out = jnp.maximum(out, 0.0)
    return out.reshape(B, H, Wo, cout).transpose(0, 3, 1, 2)

  def lrn(z, size=LRN_SIZE, alpha=LRN_ALPHA, beta=LRN_BETA, k=LRN_K):
    C = z.shape[1]
    sq = z * z
    lo, hi = size // 2, (size - 1) // 2
    s = jnp.stack(
        [jnp.sum(sq[:, max(0, c - lo):min(C, c + hi + 1)], axis=1)
         for c in range(C)], axis=1)
    return z / (k + (alpha / size) * s) ** beta

  def maxpool_w(z, pool):
    B, C, H, W = z.shape
    Wo = W // pool
    return jnp.max(z[..., :Wo * pool].reshape(B, C, H, Wo, pool), axis=-1)

  z = conv1xk(x, params['conv1_w'], params['conv1_b'], 4, 0, True)
  z = maxpool_w(lrn(z), 4)
  z = conv1xk(z, params['conv2_w'], params['conv2_b'], 1, 7, True)
  z = maxpool_w(lrn(z), 4)
  z = conv1xk(z, params['conv3_w'], params['conv3_b'], 1, 7, True)
  z = conv1xk(z, params['conv4_w'], params['conv4_b'], 1, 7, True)
  z = conv1xk(z, params['conv5_w'], params['conv5_b'], 1, 7, True)
  z = maxpool_w(z, 2)
  f = z.reshape(z.shape[0], -1)
  h = jnp.maximum(f @ params['fc1_w'].T + params['fc1_b'], 0.0)
  h = jnp.maximum(h @ params['fc2_w'].T + params['fc2_b'], 0.0)
  return h @ params['fc3_w'].T + params['fc3_b']


if __name__ == "__main__":
  # args equivalent: {'output_dim': 3, 'num_channel': 4, 'enc_model': 'raw'}
  B, C, T = 2, 4, 175          # W path: 175 -> 32 -> 8 -> 8 -> 2 -> 2 -> 1
  num_classes = 3
  key = jax.random.PRNGKey(0)
  kx, kp = jax.random.split(key)
  x = jax.random.normal(kx, (B, C, T), dtype=jnp.float32)

  params = init_params(kp, num_channel=C, num_classes=num_classes, T=T)
  kparams, cfg = prepare_kernel_params(params, batch=B, num_channel=C, T=T)

  fwd = jax.jit(make_forward(cfg))
  out, aux = fwd(kparams, x)
  out = jax.block_until_ready(out)
  assert out.shape == (B, num_classes), out.shape

  # Cross-check against a plain-JAX reference that uses the same bf16-rounded
  # matmul weights the kernel streams from HBM (isolates kernel-structure
  # errors from the deliberate weight quantization).
  params_q = dict(params)
  for k in ('conv1_w', 'conv2_w', 'conv3_w', 'conv4_w', 'conv5_w',
            'fc1_w', 'fc2_w', 'fc3_w'):
    params_q[k] = params[k].astype(jnp.bfloat16).astype(jnp.float32)
  ref = jax.block_until_ready(jax.jit(_reference_forward)(params_q, x))
  rel = float(jnp.max(jnp.abs(out - ref)) / (jnp.max(jnp.abs(ref)) + 1e-6))
  assert rel < 0.05, f"kernel/reference mismatch: rel_err={rel}"

  print("KERNEL_OK")
</pallas_src>

<mosaic_0001>
module attributes {stable_mosaic.version = 11 : i64} {
  func.func @_alexnet_fused_kernel(%arg0: memref<256x64xf32, #tpu.memory_space<vmem>>, %arg1: memref<64x64xbf16, #tpu.memory_space<vmem>>, %arg2: memref<1x64xf32, #tpu.memory_space<vmem>>, %arg3: memref<64x64xf32, #tpu.memory_space<vmem>>, %arg4: memref<960x128xbf16, #tpu.memory_space<vmem>>, %arg5: memref<1x128xf32, #tpu.memory_space<vmem>>, %arg6: memref<128x128xf32, #tpu.memory_space<vmem>>, %arg7: memref<384x256xbf16, #tpu.memory_space<vmem>>, %arg8: memref<1x256xf32, #tpu.memory_space<vmem>>, %arg9: memref<768x128xbf16, #tpu.memory_space<vmem>>, %arg10: memref<1x128xf32, #tpu.memory_space<vmem>>, %arg11: memref<384x64xbf16, #tpu.memory_space<vmem>>, %arg12: memref<1x64xf32, #tpu.memory_space<vmem>>, %arg13: memref<256x128xbf16, #tpu.memory_space<vmem>>, %arg14: memref<1x128xf32, #tpu.memory_space<vmem>>, %arg15: memref<128x128xbf16, #tpu.memory_space<vmem>>, %arg16: memref<1x128xf32, #tpu.memory_space<vmem>>, %arg17: memref<128x3xbf16, #tpu.memory_space<vmem>>, %arg18: memref<1x3xf32, #tpu.memory_space<vmem>>, %arg19: memref<2x3xf32, #tpu.memory_space<vmem>>, %arg20: memref<8x64xf32, #tpu.memory_space<vmem>>) attributes {dimension_semantics = [], scalar_prefetch = 0 : i64, scratch_operands = 1 : i64, tpu.core_type = #tpu.core_type<tc>} {
    %c0 = arith.constant 0 : index
    %c0_0 = arith.constant 0 : index
    %0 = vector.load %arg0[%c0, %c0_0] : memref<256x64xf32, #tpu.memory_space<vmem>>, vector<256x64xf32>
    %c0_1 = arith.constant 0 : index
    %c0_2 = arith.constant 0 : index
    %1 = vector.load %arg1[%c0_1, %c0_2] : memref<64x64xbf16, #tpu.memory_space<vmem>>, vector<64x64xbf16>
    %2 = arith.extf %1 : vector<64x64xbf16> to vector<64x64xf32>
    %cst = arith.constant dense<0.000000e+00> : vector<256x64xf32>
    %3 = tpu.matmul %0, %2, %cst {dimension_numbers = #tpu.dot_dimension_numbers<[1], [0], [0], [1], [0, 0, 1, 1], [], []>} : vector<256x64xf32>, vector<64x64xf32>, vector<256x64xf32> -> vector<256x64xf32>
    %c0_3 = arith.constant 0 : index
    %c0_4 = arith.constant 0 : index
    %4 = vector.load %arg2[%c0_3, %c0_4] : memref<1x64xf32, #tpu.memory_space<vmem>>, vector<1x64xf32>
    %5 = vector.broadcast %4 : vector<1x64xf32> to vector<256x64xf32>
    %6 = arith.addf %3, %5 : vector<256x64xf32>
    %cst_5 = arith.constant 0.000000e+00 : f32
    %7 = vector.broadcast %cst_5 : f32 to vector<256x64xf32>
    %8 = arith.maximumf %6, %7 : vector<256x64xf32>
    %9 = arith.mulf %8, %8 : vector<256x64xf32>
    %c0_6 = arith.constant 0 : index
    %c0_7 = arith.constant 0 : index
    %10 = vector.load %arg3[%c0_6, %c0_7] : memref<64x64xf32, #tpu.memory_space<vmem>>, vector<64x64xf32>
    %cst_8 = arith.constant dense<0.000000e+00> : vector<256x64xf32>
    %11 = tpu.matmul %9, %10, %cst_8 {dimension_numbers = #tpu.dot_dimension_numbers<[1], [0], [0], [1], [0, 0, 1, 1], [], []>} : vector<256x64xf32>, vector<64x64xf32>, vector<256x64xf32> -> vector<256x64xf32>
    %cst_9 = arith.constant 4.000000e-06 : f32
    %12 = vector.broadcast %cst_9 : f32 to vector<256x64xf32>
    %13 = arith.mulf %12, %11 : vector<256x64xf32>
    %cst_10 = arith.constant 1.000000e+00 : f32
    %14 = vector.broadcast %cst_10 : f32 to vector<256x64xf32>
    %15 = arith.addf %14, %13 : vector<256x64xf32>
    %16 = math.rsqrt %15 : vector<256x64xf32>
    %17 = math.sqrt %16 : vector<256x64xf32>
    %18 = arith.mulf %16, %17 : vector<256x64xf32>
    %19 = arith.mulf %8, %18 : vector<256x64xf32>
    %20 = vector.extract_strided_slice %19 {offsets = [0, 0], sizes = [8, 64], strides = [1, 1]} : vector<256x64xf32> to vector<8x64xf32>
    %21 = vector.extract_strided_slice %19 {offsets = [8, 0], sizes = [8, 64], strides = [1, 1]} : vector<256x64xf32> to vector<8x64xf32>
    %22 = arith.maximumf %20, %21 : vector<8x64xf32>
    %23 = vector.extract_strided_slice %19 {offsets = [16, 0], sizes = [8, 64], strides = [1, 1]} : vector<256x64xf32> to vector<8x64xf32>
    %24 = arith.maximumf %22, %23 : vector<8x64xf32>
    %25 = vector.extract_strided_slice %19 {offsets = [24, 0], sizes = [8, 64], strides = [1, 1]} : vector<256x64xf32> to vector<8x64xf32>
    %26 = arith.maximumf %24, %25 : vector<8x64xf32>
    %27 = vector.extract_strided_slice %19 {offsets = [32, 0], sizes = [8, 64], strides = [1, 1]} : vector<256x64xf32> to vector<8x64xf32>
    %28 = vector.extract_strided_slice %19 {offsets = [40, 0], sizes = [8, 64], strides = [1, 1]} : vector<256x64xf32> to vector<8x64xf32>
    %29 = arith.maximumf %27, %28 : vector<8x64xf32>
    %30 = vector.extract_strided_slice %19 {offsets = [48, 0], sizes = [8, 64], strides = [1, 1]} : vector<256x64xf32> to vector<8x64xf32>
    %31 = arith.maximumf %29, %30 : vector<8x64xf32>
    %32 = vector.extract_strided_slice %19 {offsets = [56, 0], sizes = [8, 64], strides = [1, 1]} : vector<256x64xf32> to vector<8x64xf32>
    %33 = arith.maximumf %31, %32 : vector<8x64xf32>
    %34 = vector.extract_strided_slice %19 {offsets = [64, 0], sizes = [8, 64], strides = [1, 1]} : vector<256x64xf32> to vector<8x64xf32>
    %35 = vector.extract_strided_slice %19 {offsets = [72, 0], sizes = [8, 64], strides = [1, 1]} : vector<256x64xf32> to vector<8x64xf32>
    %36 = arith.maximumf %34, %35 : vector<8x64xf32>
    %37 = vector.extract_strided_slice %19 {offsets = [80, 0], sizes = [8, 64], strides = [1, 1]} : vector<256x64xf32> to vector<8x64xf32>
    %38 = arith.maximumf %36, %37 : vector<8x64xf32>
    %39 = vector.extract_strided_slice %19 {offsets = [88, 0], sizes = [8, 64], strides = [1, 1]} : vector<256x64xf32> to vector<8x64xf32>
    %40 = arith.maximumf %38, %39 : vector<8x64xf32>
    %41 = vector.extract_strided_slice %19 {offsets = [96, 0], sizes = [8, 64], strides = [1, 1]} : vector<256x64xf32> to vector<8x64xf32>
    %42 = vector.extract_strided_slice %19 {offsets = [104, 0], sizes = [8, 64], strides = [1, 1]} : vector<256x64xf32> to vector<8x64xf32>
    %43 = arith.maximumf %41, %42 : vector<8x64xf32>
    %44 = vector.extract_strided_slice %19 {offsets = [112, 0], sizes = [8, 64], strides = [1, 1]} : vector<256x64xf32> to vector<8x64xf32>
    %45 = arith.maximumf %43, %44 : vector<8x64xf32>
    %46 = vector.extract_strided_slice %19 {offsets = [120, 0], sizes = [8, 64], strides = [1, 1]} : vector<256x64xf32> to vector<8x64xf32>
    %47 = arith.maximumf %45, %46 : vector<8x64xf32>
    %48 = vector.extract_strided_slice %19 {offsets = [128, 0], sizes = [8, 64], strides = [1, 1]} : vector<256x64xf32> to vector<8x64xf32>
    %49 = vector.extract_strided_slice %19 {offsets = [136, 0], sizes = [8, 64], strides = [1, 1]} : vector<256x64xf32> to vector<8x64xf32>
    %50 = arith.maximumf %48, %49 : vector<8x64xf32>
    %51 = vector.extract_strided_slice %19 {offsets = [144, 0], sizes = [8, 64], strides = [1, 1]} : vector<256x64xf32> to vector<8x64xf32>
    %52 = arith.maximumf %50, %51 : vector<8x64xf32>
    %53 = vector.extract_strided_slice %19 {offsets = [152, 0], sizes = [8, 64], strides = [1, 1]} : vector<256x64xf32> to vector<8x64xf32>
    %54 = arith.maximumf %52, %53 : vector<8x64xf32>
    %55 = vector.extract_strided_slice %19 {offsets = [160, 0], sizes = [8, 64], strides = [1, 1]} : vector<256x64xf32> to vector<8x64xf32>
    %56 = vector.extract_strided_slice %19 {offsets = [168, 0], sizes = [8, 64], strides = [1, 1]} : vector<256x64xf32> to vector<8x64xf32>
    %57 = arith.maximumf %55, %56 : vector<8x64xf32>
    %58 = vector.extract_strided_slice %19 {offsets = [176, 0], sizes = [8, 64], strides = [1, 1]} : vector<256x64xf32> to vector<8x64xf32>
    %59 = arith.maximumf %57, %58 : vector<8x64xf32>
    %60 = vector.extract_strided_slice %19 {offsets = [184, 0], sizes = [8, 64], strides = [1, 1]} : vector<256x64xf32> to vector<8x64xf32>
    %61 = arith.maximumf %59, %60 : vector<8x64xf32>
    %62 = vector.extract_strided_slice %19 {offsets = [192, 0], sizes = [8, 64], strides = [1, 1]} : vector<256x64xf32> to vector<8x64xf32>
    %63 = vector.extract_strided_slice %19 {offsets = [200, 0], sizes = [8, 64], strides = [1, 1]} : vector<256x64xf32> to vector<8x64xf32>
    %64 = arith.maximumf %62, %63 : vector<8x64xf32>
    %65 = vector.extract_strided_slice %19 {offsets = [208, 0], sizes = [8, 64], strides = [1, 1]} : vector<256x64xf32> to vector<8x64xf32>
    %66 = arith.maximumf %64, %65 : vector<8x64xf32>
    %67 = vector.extract_strided_slice %19 {offsets = [216, 0], sizes = [8, 64], strides = [1, 1]} : vector<256x64xf32> to vector<8x64xf32>
    %68 = arith.maximumf %66, %67 : vector<8x64xf32>
    %69 = vector.extract_strided_slice %19 {offsets = [224, 0], sizes = [8, 64], strides = [1, 1]} : vector<256x64xf32> to vector<8x64xf32>
    %70 = vector.extract_strided_slice %19 {offsets = [232, 0], sizes = [8, 64], strides = [1, 1]} : vector<256x64xf32> to vector<8x64xf32>
    %71 = arith.maximumf %69, %70 : vector<8x64xf32>
    %72 = vector.extract_strided_slice %19 {offsets = [240, 0], sizes = [8, 64], strides = [1, 1]} : vector<256x64xf32> to vector<8x64xf32>
    %73 = arith.maximumf %71, %72 : vector<8x64xf32>
    %74 = vector.extract_strided_slice %19 {offsets = [248, 0], sizes = [8, 64], strides = [1, 1]} : vector<256x64xf32> to vector<8x64xf32>
    %75 = arith.maximumf %73, %74 : vector<8x64xf32>
    %76 = tpu.concatenate %26, %33, %40, %47, %54, %61, %68, %75 in 0 : vector<8x64xf32>, vector<8x64xf32>, vector<8x64xf32>, vector<8x64xf32>, vector<8x64xf32>, vector<8x64xf32>, vector<8x64xf32>, vector<8x64xf32> -> vector<64x64xf32>
    %cst_11 = arith.constant 0.000000e+00 : f32
    %77 = vector.broadcast %cst_11 : f32 to vector<56x64xf32>
    %78 = vector.extract_strided_slice %76 {offsets = [0, 0], sizes = [8, 64], strides = [1, 1]} : vector<64x64xf32> to vector<8x64xf32>
    %79 = tpu.concatenate %77, %78 in 0 : vector<56x64xf32>, vector<8x64xf32> -> vector<64x64xf32>
    %cst_12 = arith.constant 0.000000e+00 : f32
    %80 = vector.broadcast %cst_12 : f32 to vector<48x64xf32>
    %81 = vector.extract_strided_slice %76 {offsets = [0, 0], sizes = [16, 64], strides = [1, 1]} : vector<64x64xf32> to vector<16x64xf32>
    %82 = tpu.concatenate %80, %81 in 0 : vector<48x64xf32>, vector<16x64xf32> -> vector<64x64xf32>
    %cst_13 = arith.constant 0.000000e+00 : f32
    %83 = vector.broadcast %cst_13 : f32 to vector<40x64xf32>
    %84 = vector.extract_strided_slice %76 {offsets = [0, 0], sizes = [24, 64], strides = [1, 1]} : vector<64x64xf32> to vector<24x64xf32>
    %85 = tpu.concatenate %83, %84 in 0 : vector<40x64xf32>, vector<24x64xf32> -> vector<64x64xf32>
    %cst_14 = arith.constant 0.000000e+00 : f32
    %86 = vector.broadcast %cst_14 : f32 to vector<32x64xf32>
    %87 = vector.extract_strided_slice %76 {offsets = [0, 0], sizes = [32, 64], strides = [1, 1]} : vector<64x64xf32> to vector<32x64xf32>
    %88 = tpu.concatenate %86, %87 in 0 : vector<32x64xf32>, vector<32x64xf32> -> vector<64x64xf32>
    %cst_15 = arith.constant 0.000000e+00 : f32
    %89 = vector.broadcast %cst_15 : f32 to vector<24x64xf32>
    %90 = vector.extract_strided_slice %76 {offsets = [0, 0], sizes = [40, 64], strides = [1, 1]} : vector<64x64xf32> to vector<40x64xf32>
    %91 = tpu.concatenate %89, %90 in 0 : vector<24x64xf32>, vector<40x64xf32> -> vector<64x64xf32>
    %cst_16 = arith.constant 0.000000e+00 : f32
    %92 = vector.broadcast %cst_16 : f32 to vector<16x64xf32>
    %93 = vector.extract_strided_slice %76 {offsets = [0, 0], sizes = [48, 64], strides = [1, 1]} : vector<64x64xf32> to vector<48x64xf32>
    %94 = tpu.concatenate %92, %93 in 0 : vector<16x64xf32>, vector<48x64xf32> -> vector<64x64xf32>
    %cst_17 = arith.constant 0.000000e+00 : f32
    %95 = vector.broadcast %cst_17 : f32 to vector<8x64xf32>
    %96 = vector.extract_strided_slice %76 {offsets = [0, 0], sizes = [56, 64], strides = [1, 1]} : vector<64x64xf32> to vector<56x64xf32>
    %97 = tpu.concatenate %95, %96 in 0 : vector<8x64xf32>, vector<56x64xf32> -> vector<64x64xf32>
    %cst_18 = arith.constant 0.000000e+00 : f32
    %98 = vector.broadcast %cst_18 : f32 to vector<8x64xf32>
    %99 = vector.extract_strided_slice %76 {offsets = [8, 0], sizes = [56, 64], strides = [1, 1]} : vector<64x64xf32> to vector<56x64xf32>
    %100 = tpu.concatenate %99, %98 in 0 : vector<56x64xf32>, vector<8x64xf32> -> vector<64x64xf32>
    %cst_19 = arith.constant 0.000000e+00 : f32
    %101 = vector.broadcast %cst_19 : f32 to vector<16x64xf32>
    %102 = vector.extract_strided_slice %76 {offsets = [16, 0], sizes = [48, 64], strides = [1, 1]} : vector<64x64xf32> to vector<48x64xf32>
    %103 = tpu.concatenate %102, %101 in 0 : vector<48x64xf32>, vector<16x64xf32> -> vector<64x64xf32>
    %cst_20 = arith.constant 0.000000e+00 : f32
    %104 = vector.broadcast %cst_20 : f32 to vector<24x64xf32>
    %105 = vector.extract_strided_slice %76 {offsets = [24, 0], sizes = [40, 64], strides = [1, 1]} : vector<64x64xf32> to vector<40x64xf32>
    %106 = tpu.concatenate %105, %104 in 0 : vector<40x64xf32>, vector<24x64xf32> -> vector<64x64xf32>
    %cst_21 = arith.constant 0.000000e+00 : f32
    %107 = vector.broadcast %cst_21 : f32 to vector<32x64xf32>
    %108 = vector.extract_strided_slice %76 {offsets = [32, 0], sizes = [32, 64], strides = [1, 1]} : vector<64x64xf32> to vector<32x64xf32>
    %109 = tpu.concatenate %108, %107 in 0 : vector<32x64xf32>, vector<32x64xf32> -> vector<64x64xf32>
    %cst_22 = arith.constant 0.000000e+00 : f32
    %110 = vector.broadcast %cst_22 : f32 to vector<40x64xf32>
    %111 = vector.extract_strided_slice %76 {offsets = [40, 0], sizes = [24, 64], strides = [1, 1]} : vector<64x64xf32> to vector<24x64xf32>
    %112 = tpu.concatenate %111, %110 in 0 : vector<24x64xf32>, vector<40x64xf32> -> vector<64x64xf32>
    %cst_23 = arith.constant 0.000000e+00 : f32
    %113 = vector.broadcast %cst_23 : f32 to vector<48x64xf32>
    %114 = vector.extract_strided_slice %76 {offsets = [48, 0], sizes = [16, 64], strides = [1, 1]} : vector<64x64xf32> to vector<16x64xf32>
    %115 = tpu.concatenate %114, %113 in 0 : vector<16x64xf32>, vector<48x64xf32> -> vector<64x64xf32>
    %cst_24 = arith.constant 0.000000e+00 : f32
    %116 = vector.broadcast %cst_24 : f32 to vector<56x64xf32>
    %117 = vector.extract_strided_slice %76 {offsets = [56, 0], sizes = [8, 64], strides = [1, 1]} : vector<64x64xf32> to vector<8x64xf32>
    %118 = tpu.concatenate %117, %116 in 0 : vector<8x64xf32>, vector<56x64xf32> -> vector<64x64xf32>
    %119 = tpu.concatenate %79, %82, %85, %88, %91, %94, %97, %76, %100, %103, %106, %109, %112, %115, %118 in 1 : vector<64x64xf32>, vector<64x64xf32>, vector<64x64xf32>, vector<64x64xf32>, vector<64x64xf32>, vector<64x64xf32>, vector<64x64xf32>, vector<64x64xf32>, vector<64x64xf32>, vector<64x64xf32>, vector<64x64xf32>, vector<64x64xf32>, vector<64x64xf32>, vector<64x64xf32>, vector<64x64xf32> -> vector<64x960xf32>
    %c0_25 = arith.constant 0 : index
    %c0_26 = arith.constant 0 : index
    %120 = vector.load %arg4[%c0_25, %c0_26] : memref<960x128xbf16, #tpu.memory_space<vmem>>, vector<960x128xbf16>
    %121 = arith.extf %120 : vector<960x128xbf16> to vector<960x128xf32>
    %cst_27 = arith.constant dense<0.000000e+00> : vector<64x128xf32>
    %122 = tpu.matmul %119, %121, %cst_27 {dimension_numbers = #tpu.dot_dimension_numbers<[1], [0], [0], [1], [0, 0, 1, 1], [], []>} : vector<64x960xf32>, vector<960x128xf32>, vector<64x128xf32> -> vector<64x128xf32>
    %c0_28 = arith.constant 0 : index
    %c0_29 = arith.constant 0 : index
    %123 = vector.load %arg5[%c0_28, %c0_29] : memref<1x128xf32, #tpu.memory_space<vmem>>, vector<1x128xf32>
    %124 = vector.broadcast %123 : vector<1x128xf32> to vector<64x128xf32>
    %125 = arith.addf %122, %124 : vector<64x128xf32>
    %cst_30 = arith.constant 0.000000e+00 : f32
    %126 = vector.broadcast %cst_30 : f32 to vector<64x128xf32>
    %127 = arith.maximumf %125, %126 : vector<64x128xf32>
    %128 = arith.mulf %127, %127 : vector<64x128xf32>
    %c0_31 = arith.constant 0 : index
    %c0_32 = arith.constant 0 : index
    %129 = vector.load %arg6[%c0_31, %c0_32] : memref<128x128xf32, #tpu.memory_space<vmem>>, vector<128x128xf32>
    %cst_33 = arith.constant dense<0.000000e+00> : vector<64x128xf32>
    %130 = tpu.matmul %128, %129, %cst_33 {dimension_numbers = #tpu.dot_dimension_numbers<[1], [0], [0], [1], [0, 0, 1, 1], [], []>} : vector<64x128xf32>, vector<128x128xf32>, vector<64x128xf32> -> vector<64x128xf32>
    %cst_34 = arith.constant 4.000000e-06 : f32
    %131 = vector.broadcast %cst_34 : f32 to vector<64x128xf32>
    %132 = arith.mulf %131, %130 : vector<64x128xf32>
    %cst_35 = arith.constant 1.000000e+00 : f32
    %133 = vector.broadcast %cst_35 : f32 to vector<64x128xf32>
    %134 = arith.addf %133, %132 : vector<64x128xf32>
    %135 = math.rsqrt %134 : vector<64x128xf32>
    %136 = math.sqrt %135 : vector<64x128xf32>
    %137 = arith.mulf %135, %136 : vector<64x128xf32>
    %138 = arith.mulf %127, %137 : vector<64x128xf32>
    %139 = vector.extract_strided_slice %138 {offsets = [0, 0], sizes = [8, 128], strides = [1, 1]} : vector<64x128xf32> to vector<8x128xf32>
    %140 = vector.extract_strided_slice %138 {offsets = [8, 0], sizes = [8, 128], strides = [1, 1]} : vector<64x128xf32> to vector<8x128xf32>
    %141 = arith.maximumf %139, %140 : vector<8x128xf32>
    %142 = vector.extract_strided_slice %138 {offsets = [16, 0], sizes = [8, 128], strides = [1, 1]} : vector<64x128xf32> to vector<8x128xf32>
    %143 = arith.maximumf %141, %142 : vector<8x128xf32>
    %144 = vector.extract_strided_slice %138 {offsets = [24, 0], sizes = [8, 128], strides = [1, 1]} : vector<64x128xf32> to vector<8x128xf32>
    %145 = arith.maximumf %143, %144 : vector<8x128xf32>
    %146 = vector.extract_strided_slice %138 {offsets = [32, 0], sizes = [8, 128], strides = [1, 1]} : vector<64x128xf32> to vector<8x128xf32>
    %147 = vector.extract_strided_slice %138 {offsets = [40, 0], sizes = [8, 128], strides = [1, 1]} : vector<64x128xf32> to vector<8x128xf32>
    %148 = arith.maximumf %146, %147 : vector<8x128xf32>
    %149 = vector.extract_strided_slice %138 {offsets = [48, 0], sizes = [8, 128], strides = [1, 1]} : vector<64x128xf32> to vector<8x128xf32>
    %150 = arith.maximumf %148, %149 : vector<8x128xf32>
    %151 = vector.extract_strided_slice %138 {offsets = [56, 0], sizes = [8, 128], strides = [1, 1]} : vector<64x128xf32> to vector<8x128xf32>
    %152 = arith.maximumf %150, %151 : vector<8x128xf32>
    %153 = tpu.concatenate %145, %152 in 0 : vector<8x128xf32>, vector<8x128xf32> -> vector<16x128xf32>
    %cst_36 = arith.constant 0.000000e+00 : f32
    %154 = vector.broadcast %cst_36 : f32 to vector<8x128xf32>
    %155 = vector.extract_strided_slice %153 {offsets = [0, 0], sizes = [8, 128], strides = [1, 1]} : vector<16x128xf32> to vector<8x128xf32>
    %156 = tpu.concatenate %154, %155 in 0 : vector<8x128xf32>, vector<8x128xf32> -> vector<16x128xf32>
    %cst_37 = arith.constant 0.000000e+00 : f32
    %157 = vector.broadcast %cst_37 : f32 to vector<8x128xf32>
    %158 = vector.extract_strided_slice %153 {offsets = [8, 0], sizes = [8, 128], strides = [1, 1]} : vector<16x128xf32> to vector<8x128xf32>
    %159 = tpu.concatenate %158, %157 in 0 : vector<8x128xf32>, vector<8x128xf32> -> vector<16x128xf32>
    %160 = tpu.concatenate %156, %153, %159 in 1 : vector<16x128xf32>, vector<16x128xf32>, vector<16x128xf32> -> vector<16x384xf32>
    %c0_38 = arith.constant 0 : index
    %c0_39 = arith.constant 0 : index
    %161 = vector.load %arg7[%c0_38, %c0_39] : memref<384x256xbf16, #tpu.memory_space<vmem>>, vector<384x256xbf16>
    %162 = arith.extf %161 : vector<384x256xbf16> to vector<384x256xf32>
    %cst_40 = arith.constant dense<0.000000e+00> : vector<16x256xf32>
    %163 = tpu.matmul %160, %162, %cst_40 {dimension_numbers = #tpu.dot_dimension_numbers<[1], [0], [0], [1], [0, 0, 1, 1], [], []>} : vector<16x384xf32>, vector<384x256xf32>, vector<16x256xf32> -> vector<16x256xf32>
    %c0_41 = arith.constant 0 : index
    %c0_42 = arith.constant 0 : index
    %164 = vector.load %arg8[%c0_41, %c0_42] : memref<1x256xf32, #tpu.memory_space<vmem>>, vector<1x256xf32>
    %165 = vector.broadcast %164 : vector<1x256xf32> to vector<16x256xf32>
    %166 = arith.addf %163, %165 : vector<16x256xf32>
    %cst_43 = arith.constant 0.000000e+00 : f32
    %167 = vector.broadcast %cst_43 : f32 to vector<16x256xf32>
    %168 = arith.maximumf %166, %167 : vector<16x256xf32>
    %cst_44 = arith.constant 0.000000e+00 : f32
    %169 = vector.broadcast %cst_44 : f32 to vector<8x256xf32>
    %170 = vector.extract_strided_slice %168 {offsets = [0, 0], sizes = [8, 256], strides = [1, 1]} : vector<16x256xf32> to vector<8x256xf32>
    %171 = tpu.concatenate %169, %170 in 0 : vector<8x256xf32>, vector<8x256xf32> -> vector<16x256xf32>
    %cst_45 = arith.constant 0.000000e+00 : f32
    %172 = vector.broadcast %cst_45 : f32 to vector<8x256xf32>
    %173 = vector.extract_strided_slice %168 {offsets = [8, 0], sizes = [8, 256], strides = [1, 1]} : vector<16x256xf32> to vector<8x256xf32>
    %174 = tpu.concatenate %173, %172 in 0 : vector<8x256xf32>, vector<8x256xf32> -> vector<16x256xf32>
    %175 = tpu.concatenate %171, %168, %174 in 1 : vector<16x256xf32>, vector<16x256xf32>, vector<16x256xf32> -> vector<16x768xf32>
    %c0_46 = arith.constant 0 : index
    %c0_47 = arith.constant 0 : index
    %176 = vector.load %arg9[%c0_46, %c0_47] : memref<768x128xbf16, #tpu.memory_space<vmem>>, vector<768x128xbf16>
    %177 = arith.extf %176 : vector<768x128xbf16> to vector<768x128xf32>
    %cst_48 = arith.constant dense<0.000000e+00> : vector<16x128xf32>
    %178 = tpu.matmul %175, %177, %cst_48 {dimension_numbers = #tpu.dot_dimension_numbers<[1], [0], [0], [1], [0, 0, 1, 1], [], []>} : vector<16x768xf32>, vector<768x128xf32>, vector<16x128xf32> -> vector<16x128xf32>
    %c0_49 = arith.constant 0 : index
    %c0_50 = arith.constant 0 : index
    %179 = vector.load %arg10[%c0_49, %c0_50] : memref<1x128xf32, #tpu.memory_space<vmem>>, vector<1x128xf32>
    %180 = vector.broadcast %179 : vector<1x128xf32> to vector<16x128xf32>
    %181 = arith.addf %178, %180 : vector<16x128xf32>
    %cst_51 = arith.constant 0.000000e+00 : f32
    %182 = vector.broadcast %cst_51 : f32 to vector<16x128xf32>
    %183 = arith.maximumf %181, %182 : vector<16x128xf32>
    %cst_52 = arith.constant 0.000000e+00 : f32
    %184 = vector.broadcast %cst_52 : f32 to vector<8x128xf32>
    %185 = vector.extract_strided_slice %183 {offsets = [0, 0], sizes = [8, 128], strides = [1, 1]} : vector<16x128xf32> to vector<8x128xf32>
    %186 = tpu.concatenate %184, %185 in 0 : vector<8x128xf32>, vector<8x128xf32> -> vector<16x128xf32>
    %cst_53 = arith.constant 0.000000e+00 : f32
    %187 = vector.broadcast %cst_53 : f32 to vector<8x128xf32>
    %188 = vector.extract_strided_slice %183 {offsets = [8, 0], sizes = [8, 128], strides = [1, 1]} : vector<16x128xf32> to vector<8x128xf32>
    %189 = tpu.concatenate %188, %187 in 0 : vector<8x128xf32>, vector<8x128xf32> -> vector<16x128xf32>
    %190 = tpu.concatenate %186, %183, %189 in 1 : vector<16x128xf32>, vector<16x128xf32>, vector<16x128xf32> -> vector<16x384xf32>
    %c0_54 = arith.constant 0 : index
    %c0_55 = arith.constant 0 : index
    %191 = vector.load %arg11[%c0_54, %c0_55] : memref<384x64xbf16, #tpu.memory_space<vmem>>, vector<384x64xbf16>
    %192 = arith.extf %191 : vector<384x64xbf16> to vector<384x64xf32>
    %cst_56 = arith.constant dense<0.000000e+00> : vector<16x64xf32>
    %193 = tpu.matmul %190, %192, %cst_56 {dimension_numbers = #tpu.dot_dimension_numbers<[1], [0], [0], [1], [0, 0, 1, 1], [], []>} : vector<16x384xf32>, vector<384x64xf32>, vector<16x64xf32> -> vector<16x64xf32>
    %c0_57 = arith.constant 0 : index
    %c0_58 = arith.constant 0 : index
    %194 = vector.load %arg12[%c0_57, %c0_58] : memref<1x64xf32, #tpu.memory_space<vmem>>, vector<1x64xf32>
    %195 = vector.broadcast %194 : vector<1x64xf32> to vector<16x64xf32>
    %196 = arith.addf %193, %195 : vector<16x64xf32>
    %cst_59 = arith.constant 0.000000e+00 : f32
    %197 = vector.broadcast %cst_59 : f32 to vector<16x64xf32>
    %198 = arith.maximumf %196, %197 : vector<16x64xf32>
    %199 = vector.extract_strided_slice %198 {offsets = [0, 0], sizes = [8, 64], strides = [1, 1]} : vector<16x64xf32> to vector<8x64xf32>
    %200 = vector.extract_strided_slice %198 {offsets = [8, 0], sizes = [8, 64], strides = [1, 1]} : vector<16x64xf32> to vector<8x64xf32>
    %201 = arith.maximumf %199, %200 : vector<8x64xf32>
    %c0_60 = arith.constant 0 : index
    %c0_61 = arith.constant 0 : index
    %202 = vector.load %arg20[%c0_60, %c0_61] : memref<8x64xf32, #tpu.memory_space<vmem>>, vector<8x64xf32>
    tpu.vector_store %arg20[%c0_60, %c0_61], %201 {strides = array<i32>} : memref<8x64xf32, #tpu.memory_space<vmem>>, vector<8x64xf32>,
    %c0_62 = arith.constant 0 : index
    %c0_63 = arith.constant 0 : index
    %203 = vector.load %arg20[%c0_62, %c0_63] : memref<8x64xf32, #tpu.memory_space<vmem>>, vector<2x64xf32>
    %c2 = arith.constant 2 : index
    %c0_64 = arith.constant 0 : index
    %204 = vector.load %arg20[%c2, %c0_64] : memref<8x64xf32, #tpu.memory_space<vmem>>, vector<2x64xf32>
    %c4 = arith.constant 4 : index
    %c0_65 = arith.constant 0 : index
    %205 = vector.load %arg20[%c4, %c0_65] : memref<8x64xf32, #tpu.memory_space<vmem>>, vector<2x64xf32>
    %c6 = arith.constant 6 : index
    %c0_66 = arith.constant 0 : index
    %206 = vector.load %arg20[%c6, %c0_66] : memref<8x64xf32, #tpu.memory_space<vmem>>, vector<2x64xf32>
    %207 = tpu.concatenate %203, %204, %205, %206 in 1 : vector<2x64xf32>, vector<2x64xf32>, vector<2x64xf32>, vector<2x64xf32> -> vector<2x256xf32>
    %c0_67 = arith.constant 0 : index
    %c0_68 = arith.constant 0 : index
    %208 = vector.load %arg13[%c0_67, %c0_68] : memref<256x128xbf16, #tpu.memory_space<vmem>>, vector<256x128xbf16>
    %209 = arith.extf %208 : vector<256x128xbf16> to vector<256x128xf32>
    %cst_69 = arith.constant dense<0.000000e+00> : vector<2x128xf32>
    %210 = tpu.matmul %207, %209, %cst_69 {dimension_numbers = #tpu.dot_dimension_numbers<[1], [0], [0], [1], [0, 0, 1, 1], [], []>} : vector<2x256xf32>, vector<256x128xf32>, vector<2x128xf32> -> vector<2x128xf32>
    %c0_70 = arith.constant 0 : index
    %c0_71 = arith.constant 0 : index
    %211 = vector.load %arg14[%c0_70, %c0_71] : memref<1x128xf32, #tpu.memory_space<vmem>>, vector<1x128xf32>
    %212 = vector.broadcast %211 : vector<1x128xf32> to vector<2x128xf32>
    %213 = arith.addf %210, %212 : vector<2x128xf32>
    %cst_72 = arith.constant 0.000000e+00 : f32
    %214 = vector.broadcast %cst_72 : f32 to vector<2x128xf32>
    %215 = arith.maximumf %213, %214 : vector<2x128xf32>
    %c0_73 = arith.constant 0 : index
    %c0_74 = arith.constant 0 : index
    %216 = vector.load %arg15[%c0_73, %c0_74] : memref<128x128xbf16, #tpu.memory_space<vmem>>, vector<128x128xbf16>
    %217 = arith.extf %216 : vector<128x128xbf16> to vector<128x128xf32>
    %cst_75 = arith.constant dense<0.000000e+00> : vector<2x128xf32>
    %218 = tpu.matmul %215, %217, %cst_75 {dimension_numbers = #tpu.dot_dimension_numbers<[1], [0], [0], [1], [0, 0, 1, 1], [], []>} : vector<2x128xf32>, vector<128x128xf32>, vector<2x128xf32> -> vector<2x128xf32>
    %c0_76 = arith.constant 0 : index
    %c0_77 = arith.constant 0 : index
    %219 = vector.load %arg16[%c0_76, %c0_77] : memref<1x128xf32, #tpu.memory_space<vmem>>, vector<1x128xf32>
    %220 = vector.broadcast %219 : vector<1x128xf32> to vector<2x128xf32>
    %221 = arith.addf %218, %220 : vector<2x128xf32>
    %cst_78 = arith.constant 0.000000e+00 : f32
    %222 = vector.broadcast %cst_78 : f32 to vector<2x128xf32>
    %223 = arith.maximumf %221, %222 : vector<2x128xf32>
    %c0_79 = arith.constant 0 : index
    %c0_80 = arith.constant 0 : index
    %224 = vector.load %arg17[%c0_79, %c0_80] : memref<128x3xbf16, #tpu.memory_space<vmem>>, vector<128x3xbf16>
    %225 = arith.extf %224 : vector<128x3xbf16> to vector<128x3xf32>
    %cst_81 = arith.constant dense<0.000000e+00> : vector<2x3xf32>
    %226 = tpu.matmul %223, %225, %cst_81 {dimension_numbers = #tpu.dot_dimension_numbers<[1], [0], [0], [1], [0, 0, 1, 1], [], []>} : vector<2x128xf32>, vector<128x3xf32>, vector<2x3xf32> -> vector<2x3xf32>
    %c0_82 = arith.constant 0 : index
    %c0_83 = arith.constant 0 : index
    %227 = vector.load %arg18[%c0_82, %c0_83] : memref<1x3xf32, #tpu.memory_space<vmem>>, vector<1x3xf32>
    %228 = vector.broadcast %227 : vector<1x3xf32> to vector<2x3xf32>
    %229 = arith.addf %226, %228 : vector<2x3xf32>
    %c0_84 = arith.constant 0 : index
    %c0_85 = arith.constant 0 : index
    %230 = vector.load %arg19[%c0_84, %c0_85] : memref<2x3xf32, #tpu.memory_space<vmem>>, vector<2x3xf32>
    tpu.vector_store %arg19[%c0_84, %c0_85], %229 {strides = array<i32>} : memref<2x3xf32, #tpu.memory_space<vmem>>, vector<2x3xf32>,
    return
  }
}

</mosaic_0001>

<bundles_post_ra>
// kernel: forward.1
= control target key start
LH: loop header
LB: loop body
LE: loop exit
PB: predicated region body
PF: predicated region fallthrough
CT: control target
= control target key end

     0   :  { %s7174_s0 = inlined_call_operand.vmem [shape: f32[256,64], index: 0, kind: input, shape index: {}]   ;;  %s7175_s1 = inlined_call_operand.vmem [shape: bf16[64,64], index: 1, kind: input, shape index: {}]   ;;  %s7176_s2 = inlined_call_operand.vmem [shape: f32[1,64], index: 2, kind: input, shape index: {}]   ;;  %s7177_s3 = inlined_call_operand.vmem [shape: f32[64,64], index: 3, kind: input, shape index: {}]   ;;  %s7178_s4 = inlined_call_operand.vmem [shape: bf16[960,128], index: 4, kind: input, shape index: {}]   ;;  %s7179_s5 = inlined_call_operand.vmem [shape: f32[1,128], index: 5, kind: input, shape index: {}]   ;;  %s7180_s6 = inlined_call_operand.vmem [shape: f32[128,128], index: 6, kind: input, shape index: {}]   ;;  %s7181_s7 = inlined_call_operand.vmem [shape: bf16[384,256], index: 7, kind: input, shape index: {}]   ;;  %s7182_s8 = inlined_call_operand.vmem [shape: f32[1,256], index: 8, kind: input, shape index: {}]   ;;  %s7183_s9 = inlined_call_operand.vmem [shape: bf16[768,128], index: 9, kind: input, shape index: {}]   ;;  %s7184_s10 = inlined_call_operand.vmem [shape: f32[1,128], index: 10, kind: input, shape index: {}]   ;;  %s7185_s11 = inlined_call_operand.vmem [shape: bf16[384,64], index: 11, kind: input, shape index: {}]   ;;  %s7186_s12 = inlined_call_operand.vmem [shape: f32[1,64], index: 12, kind: input, shape index: {}]   ;;  %s7187_s13 = inlined_call_operand.vmem [shape: bf16[256,128], index: 13, kind: input, shape index: {}]   ;;  %s7188_s14 = inlined_call_operand.vmem [shape: f32[1,128], index: 14, kind: input, shape index: {}]   ;;  %s7189_s15 = inlined_call_operand.vmem [shape: bf16[128,128], index: 15, kind: input, shape index: {}]   ;;  %s7190_s16 = inlined_call_operand.vmem [shape: f32[1,128], index: 16, kind: input, shape index: {}]   ;;  %s7191_s17 = inlined_call_operand.vmem [shape: bf16[128,3], index: 17, kind: input, shape index: {}]   ;;  %s7192_s18 = inlined_call_operand.vmem [shape: f32[1,3], index: 18, kind: input, shape index: {}]   ;;  %s7193_s19 = inlined_call_operand.hbm [shape: f32[2,3], index: 19, kind: output, shape index: {}]  }
   0x1   :  { %7207 = sst [smem:[#allocation12_spill]] %s7174_s0 }
   0x2   :  { %7208 = sst [smem:[#allocation13_spill]] %s7175_s1 }
   0x3   :  { %7209 = sst [smem:[#allocation14_spill]] %s7176_s2 }
   0x4   :  { %7210 = sst [smem:[#allocation15_spill]] %s7177_s3 }
   0x5   :  { %s7211_s20 = sld [smem:[#allocation13_spill]] }
   0xb   :  { %v4215_v0 = vld [vmem:[%s7211_s20 + $0x18] sm:$0xff]   ;;  %v4214_v1 = vld [vmem:[%s7211_s20 + $0x10] sm:$0xff]   ;;  %v4213_v4 = vld [vmem:[%s7211_s20 + $0x8] sm:$0xff]  }
   0xc   :  { %v3556_v2 = vunpack.c.h.bf16 %v4215_v0  ;;  %v3555_v3 = vunpack.c.l.bf16 %v4215_v0  ;;  %v3552_v5 = vunpack.c.h.bf16 %v4214_v1  ;;  %v3551_v6 = vunpack.c.l.bf16 %v4214_v1 }
   0xe   :  { %220 = vmatpush.msra.mxu0 %v3556_v2  ;;  %4374 = vmatpush.msra.mxu1 %v3556_v2 }
  0x10   :  { %221 = vmatpush.msra.mxu0 %v3555_v3  ;;  %4375 = vmatpush.msra.mxu1 %v3555_v3 }
  0x11   :  { %24 = vsyncpa [#allocation4], 0  ;;  %v3548_v7 = vunpack.c.h.bf16 %v4213_v4  ;;  %v3542_v8 = vld [vmem:[%s7211_s20] sm:$0xff]   ;;  %v3547_v9 = vunpack.c.l.bf16 %v4213_v4  ;;  %s7212_s26 = sld [smem:[#allocation12_spill]]  ;;  %vm115_vm0 = vcmask 523264  }
  0x12   :  { %222 = vmatpush.msra.mxu0 %v3552_v5  ;;  %4376 = vmatpush.msra.mxu1 %v3552_v5  ;;  %v3544_v10 = vunpack.c.h.bf16 %v3542_v8  ;;  %v3543_v11 = vunpack.c.l.bf16 %v3542_v8  ;;  %s7213_s23 = sld [smem:[#allocation15_spill]] }
  0x13   :  { %s7214_s25 = sld [smem:[#allocation14_spill]] }
  0x14   :  { %223 = vmatpush.msra.mxu0 %v3551_v6  ;;  %4377 = vmatpush.msra.mxu1 %v3551_v6 }
  0x16   :  { %224 = vmatpush.msra.mxu0 %v3548_v7  ;;  %4378 = vmatpush.msra.mxu1 %v3548_v7 }
  0x17   :  { %v63_v12 = vld [vmem:[%s7212_s26] sm:$0xff]  ;;  %v64_v13 = vld [vmem:[%s7212_s26 + $0x8] sm:$0xff]  ;;  %v65_v14 = vld [vmem:[%s7212_s26 + $0x10] sm:$0xff] }
  0x18   :  { %225 = vmatpush.msra.mxu0 %v3547_v9  ;;  %4379 = vmatpush.msra.mxu1 %v3547_v9  ;;  %v66_v15 = vld [vmem:[%s7212_s26 + $0x18] sm:$0xff]  ;;  %v67_v16 = vld [vmem:[%s7212_s26 + $0x20] sm:$0xff]  ;;  %v68_v17 = vld [vmem:[%s7212_s26 + $0x28] sm:$0xff] }
  0x19   :  { %v69_v18 = vld [vmem:[%s7212_s26 + $0x30] sm:$0xff]  ;;  %v70_v19 = vld [vmem:[%s7212_s26 + $0x38] sm:$0xff]  ;;  %v71_v20 = vld [vmem:[%s7212_s26 + $0x40] sm:$0xff] }
  0x1a   :  { %226 = vmatpush.msra.mxu0 %v3544_v10  ;;  %4380 = vmatpush.msra.mxu1 %v3544_v10  ;;  %v72_v21 = vld [vmem:[%s7212_s26 + $0x48] sm:$0xff]  ;;  %v73_v22 = vld [vmem:[%s7212_s26 + $0x50] sm:$0xff]  ;;  %v396_v24 = vld [vmem:[%s7213_s23 + $0x38] sm:$0xff] }
  0x1b   :  { %v93_v23 = vld [vmem:[%s7212_s26 + $0xf0] sm:$0xff]  ;;  %v74_v26 = vld [vmem:[%s7212_s26 + $0x58] sm:$0xff]  ;;  %v394_v27 = vld [vmem:[%s7213_s23 + $0x28] sm:$0xff] }
  0x1c   :  { %227 = vmatpush.msra.mxu0 %v3543_v11  ;;  %4381 = vmatpush.msra.mxu1 %v3543_v11  ;;  %v395_v25 = vld [vmem:[%s7213_s23 + $0x30] sm:$0xff]  ;;  %v393_v28 = vld [vmem:[%s7213_s23 + $0x20] sm:$0xff]  ;;  %v94_v29 = vld [vmem:[%s7212_s26 + $0xf8] sm:$0xff] }
  0x1d   :  { %3426 = vmatmul.msk.f32.vlgmr.msra.gmra.mxu0 %vm115_vm0, %v63_v12  ;;  %3456 = vmatmul.msk.f32.vlgmr.msra.gmra.mxu1 %vm115_vm0, %v93_v23  ;;  %v392_v30 = vld [vmem:[%s7213_s23 + $0x18] sm:$0xff]  ;;  %v75_v31 = vld [vmem:[%s7212_s26 + $0x60] sm:$0xff]  ;;  %v391_v32 = vld [vmem:[%s7213_s23 + $0x10] sm:$0xff] }
  0x1e   :  { %501 = vmatpush.msrb.mxu1 %v396_v24  ;;  %v390_v33 = vld [vmem:[%s7213_s23 + $0x8] sm:$0xff]  ;;  %v389_v34 = vld [vmem:[%s7213_s23] sm:$0xff]  ;;  %v77_v36 = vld [vmem:[%s7212_s26 + $0x70] sm:$0xff] }
  0x1f   :  { %v76_v35 = vld [vmem:[%s7212_s26 + $0x68] sm:$0xff]  ;;  %v78_v37 = vld [vmem:[%s7212_s26 + $0x78] sm:$0xff]  ;;  %v4792_v38 = vld [vmem:[%s7214_s25] ss:$0 sm:$0xff] }
  0x20   :  { %502 = vmatpush.msrb.mxu1 %v395_v25  ;;  %v79_v40 = vld [vmem:[%s7212_s26 + $0x80] sm:$0xff]  ;;  %v80_v45 = vld [vmem:[%s7212_s26 + $0x88] sm:$0xff]  ;;  %v81_v50 = vld [vmem:[%s7212_s26 + $0x90] sm:$0xff] }
  0x21   :  { %v82_v55 = vld [vmem:[%s7212_s26 + $0x98] sm:$0xff]  ;;  %v83_v60 = vld [vmem:[%s7212_s26 + $0xa0] sm:$0xff]  ;;  %v84_v1 = vld [vmem:[%s7212_s26 + $0xa8] sm:$0xff] }
  0x22   :  { %503 = vmatpush.msrb.mxu1 %v394_v27  ;;  %v85_v6 = vld [vmem:[%s7212_s26 + $0xb0] sm:$0xff]  ;;  %v86_v11 = vld [vmem:[%s7212_s26 + $0xb8] sm:$0xff] }
  0x24   :  { %504 = vmatpush.msrb.mxu1 %v393_v28 }
  0x25   :  { %3427 = vmatmul.msk.f32.gmra.mxu0 %vm115_vm0, %v64_v13  ;;  %3457 = vmatmul.msk.f32.gmra.mxu1 %vm115_vm0, %v94_v29 }
  0x26   :  { %505 = vmatpush.msrb.mxu1 %v392_v30 }
  0x28   :  { %506 = vmatpush.msrb.mxu1 %v391_v32 }
  0x2a   :  { %507 = vmatpush.msrb.mxu1 %v390_v33 }
  0x2c   :  { %508 = vmatpush.msrb.mxu1 %v389_v34 }
  0x2d   :  { %3428 = vmatmul.msk.f32.gmra.mxu0 %vm115_vm0, %v65_v14 }
  0x35   :  { %3429 = vmatmul.msk.f32.gmra.mxu0 %vm115_vm0, %v66_v15 }
  0x3d   :  { %3430 = vmatmul.msk.f32.gmra.mxu0 %vm115_vm0, %v67_v16  ;;  %v87_v16 = vld [vmem:[%s7212_s26 + $0xc0] sm:$0xff] }
  0x45   :  { %3431 = vmatmul.msk.f32.gmra.mxu0 %vm115_vm0, %v68_v17 }
  0x4d   :  { %3432 = vmatmul.msk.f32.gmra.mxu0 %vm115_vm0, %v69_v18 }
  0x55   :  { %3433 = vmatmul.msk.f32.gmra.mxu0 %vm115_vm0, %v70_v19 }
  0x5d   :  { %3434 = vmatmul.msk.f32.gmra.mxu0 %vm115_vm0, %v71_v20 }
  0x65   :  { %3435 = vmatmul.msk.f32.gmra.mxu0 %vm115_vm0, %v72_v21  ;;  %v88_v21 = vld [vmem:[%s7212_s26 + $0xc8] sm:$0xff] }
  0x6d   :  { %3436 = vmatmul.msk.f32.gmra.mxu0 %vm115_vm0, %v73_v22 }
  0x75   :  { %3437 = vmatmul.msk.f32.gmra.mxu0 %vm115_vm0, %v74_v26  ;;  %v89_v26 = vld [vmem:[%s7212_s26 + $0xd0] sm:$0xff] }
  0x7d   :  { %3438 = vmatmul.msk.f32.gmra.mxu0 %vm115_vm0, %v75_v31  ;;  %v90_v31 = vld [vmem:[%s7212_s26 + $0xd8] sm:$0xff] }
  0x85   :  { %3439 = vmatmul.msk.f32.gmra.mxu0 %vm115_vm0, %v76_v35 }
  0x8d   :  { %3440 = vmatmul.msk.f32.gmra.mxu0 %vm115_vm0, %v77_v36  ;;  %v91_v36 = vld [vmem:[%s7212_s26 + $0xe0] sm:$0xff] }
  0x95   :  { %3441 = vmatmul.msk.f32.gmra.mxu0 %vm115_vm0, %v78_v37 }
  0x9a   :  { %v229_v39 = vpop.f32.mrf.mxu0 }
  0x9b   :  { %v230_v41 = vadd.f32 %v4792_v38, %v229_v39 }
  0x9d   :  { %v4798_v42 = vmax.f32 %v230_v41, 0.0  ;;  %3442 = vmatmul.msk.f32.gmra.mxu0 %vm115_vm0, %v79_v40 }
  0x9f   :  { %v357_v43 = vmul.f32 %v4798_v42, %v4798_v42 }
  0xa1   :  { %3458 = vmatmul.msk.f32.vlgmr.msrb.gmra.mxu1 %vm115_vm0, %v357_v43  ;;  %v92_v43 = vld [vmem:[%s7212_s26 + $0xe8] sm:$0xff]  ;;  %s4579_s26 = smov 64  }
  0xa2   :  { %v232_v44 = vpop.f32.mrf.mxu0 }
  0xa3   :  { %v233_v46 = vadd.f32 %v4792_v38, %v232_v44 }
  0xa5   :  { %v4808_v47 = vmax.f32 %v233_v46, 0.0  ;;  %3443 = vmatmul.msk.f32.gmra.mxu0 %vm115_vm0, %v80_v45 }
  0xa7   :  { %v358_v48 = vmul.f32 %v4808_v47, %v4808_v47 }
  0xa9   :  { %3459 = vmatmul.msk.f32.gmra.mxu1 %vm115_vm0, %v358_v48 }
  0xaa   :  { %v235_v49 = vpop.f32.mrf.mxu0 }
  0xab   :  { %v236_v51 = vadd.f32 %v4792_v38, %v235_v49  ;;  %v4934_v49 = vpop.f32.mrf.mxu1 }
  0xad   :  { %v4818_v52 = vmax.f32 %v236_v51, 0.0  ;;  %3444 = vmatmul.msk.f32.gmra.mxu0 %vm115_vm0, %v81_v50 }
  0xaf   :  { %v359_v53 = vmul.f32 %v4818_v52, %v4818_v52 }
  0xb1   :  { %3460 = vmatmul.msk.f32.gmra.mxu1 %vm115_vm0, %v359_v53 }
  0xb2   :  { %v238_v54 = vpop.f32.mrf.mxu0 }
  0xb3   :  { %v239_v56 = vadd.f32 %v4792_v38, %v238_v54 }
  0xb5   :  { %v4828_v57 = vmax.f32 %v239_v56, 0.0  ;;  %3445 = vmatmul.msk.f32.gmra.mxu0 %vm115_vm0, %v82_v55  ;;  %v4943_v56 = vpop.f32.mrf.mxu1 }
  0xb7   :  { %v360_v58 = vmul.f32 %v4828_v57, %v4828_v57 }
  0xb9   :  { %3461 = vmatmul.msk.f32.gmra.mxu1 %vm115_vm0, %v360_v58 }
  0xba   :  { %v241_v59 = vpop.f32.mrf.mxu0 }
  0xbb   :  { %v242_v61 = vadd.f32 %v4792_v38, %v241_v59 }
  0xbd   :  { %v4838_v62 = vmax.f32 %v242_v61, 0.0  ;;  %3446 = vmatmul.msk.f32.gmra.mxu0 %vm115_vm0, %v83_v60  ;;  %v7197_v60 = vmov 0.0  }
  0xbe   :  { %1465 = vrot.lane.b32.xlu0 %v7197_v60, %s4579_s26 }
  0xbf   :  { %v361_v63 = vmul.f32 %v4838_v62, %v4838_v62 }
  0xc1   :  { %3462 = vmatmul.msk.f32.gmra.mxu1 %vm115_vm0, %v361_v63 }
  0xc2   :  { %v244_v0 = vpop.f32.mrf.mxu0 }
  0xc3   :  { %v245_v2 = vadd.f32 %v4792_v38, %v244_v0 }
  0xc5   :  { %v4848_v3 = vmax.f32 %v245_v2, 0.0  ;;  %3447 = vmatmul.msk.f32.gmra.mxu0 %vm115_vm0, %v84_v1 }
  0xc7   :  { %v362_v4 = vmul.f32 %v4848_v3, %v4848_v3 }
  0xc9   :  { %3463 = vmatmul.msk.f32.gmra.mxu1 %vm115_vm0, %v362_v4 }
  0xca   :  { %v247_v5 = vpop.f32.mrf.mxu0 }
  0xcb   :  { %v248_v7 = vadd.f32 %v4792_v38, %v247_v5 }
  0xcd   :  { %v4858_v8 = vmax.f32 %v248_v7, 0.0  ;;  %3448 = vmatmul.msk.f32.gmra.mxu0 %vm115_vm0, %v85_v6 }
  0xcf   :  { %v363_v9 = vmul.f32 %v4858_v8, %v4858_v8 }
  0xd1   :  { %3464 = vmatmul.msk.f32.gmra.mxu1 %vm115_vm0, %v363_v9 }
  0xd2   :  { %v250_v10 = vpop.f32.mrf.mxu0 }
  0xd3   :  { %v251_v12 = vadd.f32 %v4792_v38, %v250_v10 }
  0xd5   :  { %v4868_v13 = vmax.f32 %v251_v12, 0.0  ;;  %3449 = vmatmul.msk.f32.gmra.mxu0 %vm115_vm0, %v86_v11 }
  0xd7   :  { %v364_v14 = vmul.f32 %v4868_v13, %v4868_v13 }
  0xd9   :  { %3465 = vmatmul.msk.f32.gmra.mxu1 %vm115_vm0, %v364_v14 }
  0xda   :  { %v253_v15 = vpop.f32.mrf.mxu0 }
  0xdb   :  { %v254_v17 = vadd.f32 %v4792_v38, %v253_v15 }
  0xdd   :  { %v4878_v18 = vmax.f32 %v254_v17, 0.0  ;;  %3450 = vmatmul.msk.f32.gmra.mxu0 %vm115_vm0, %v87_v16 }
  0xdf   :  { %v365_v19 = vmul.f32 %v4878_v18, %v4878_v18 }
  0xe1   :  { %3466 = vmatmul.msk.f32.gmra.mxu1 %vm115_vm0, %v365_v19 }
  0xe2   :  { %v256_v20 = vpop.f32.mrf.mxu0 }
  0xe3   :  { %v257_v22 = vadd.f32 %v4792_v38, %v256_v20 }
  0xe5   :  { %v4888_v23 = vmax.f32 %v257_v22, 0.0  ;;  %3451 = vmatmul.msk.f32.gmra.mxu0 %vm115_vm0, %v88_v21 }
  0xe7   :  { %v366_v24 = vmul.f32 %v4888_v23, %v4888_v23 }
  0xe9   :  { %3467 = vmatmul.msk.f32.gmra.mxu1 %vm115_vm0, %v366_v24 }
  0xea   :  { %v259_v25 = vpop.f32.mrf.mxu0 }
  0xeb   :  { %v260_v27 = vadd.f32 %v4792_v38, %v259_v25 }
  0xed   :  { %v4898_v28 = vmax.f32 %v260_v27, 0.0  ;;  %3452 = vmatmul.msk.f32.gmra.mxu0 %vm115_vm0, %v89_v26 }
  0xef   :  { %v367_v29 = vmul.f32 %v4898_v28, %v4898_v28 }
  0xf1   :  { %3468 = vmatmul.msk.f32.gmra.mxu1 %vm115_vm0, %v367_v29 }
  0xf2   :  { %v262_v30 = vpop.f32.mrf.mxu0 }
  0xf3   :  { %v263_v32 = vadd.f32 %v4792_v38, %v262_v30 }
  0xf5   :  { %v4908_v33 = vmax.f32 %v263_v32, 0.0  ;;  %3453 = vmatmul.msk.f32.gmra.mxu0 %vm115_vm0, %v90_v31 }
  0xf7   :  { %v368_v34 = vmul.f32 %v4908_v33, %v4908_v33 }
  0xf9   :  { %3469 = vmatmul.msk.f32.gmra.mxu1 %vm115_vm0, %v368_v34 }
  0xfa   :  { %v265_v35 = vpop.f32.mrf.mxu0 }
  0xfb   :  { %v266_v37 = vadd.f32 %v4792_v38, %v265_v35 }
  0xfd   :  { %v4918_v39 = vmax.f32 %v266_v37, 0.0  ;;  %3454 = vmatmul.msk.f32.gmra.mxu0 %vm115_vm0, %v91_v36 }
  0xff   :  { %v369_v40 = vmul.f32 %v4918_v39, %v4918_v39 }
 0x101   :  { %3470 = vmatmul.msk.f32.gmra.mxu1 %vm115_vm0, %v369_v40 }
 0x102   :  { %v268_v41 = vpop.f32.mrf.mxu0 }
 0x103   :  { %v269_v44 = vadd.f32 %v4792_v38, %v268_v41 }
 0x105   :  { %v4928_v45 = vmax.f32 %v269_v44, 0.0  ;;  %3455 = vmatmul.msk.f32.gmra.mxu0 %vm115_vm0, %v92_v43 }
 0x107   :  { %v370_v46 = vmul.f32 %v4928_v45, %v4928_v45 }
 0x109   :  { %3471 = vmatmul.msk.f32.gmra.mxu1 %vm115_vm0, %v370_v46 }
 0x10a   :  { %v271_v48 = vpop.f32.mrf.mxu0 }
 0x10b   :  { %v272_v50 = vadd.f32 %v4792_v38, %v271_v48 }
 0x10d   :  { %v4937_v51 = vmax.f32 %v272_v50, 0.0 }
 0x10f   :  { %v371_v53 = vmul.f32 %v4937_v51, %v4937_v51 }
 0x111   :  { %3472 = vmatmul.msk.f32.gmra.mxu1 %vm115_vm0, %v371_v53 }
 0x112   :  { %v274_v54 = vpop.f32.mrf.mxu0 }
 0x113   :  { %v275_v55 = vadd.f32 %v4792_v38, %v274_v54 }
 0x115   :  { %v4945_v58 = vmax.f32 %v275_v55, 0.0 }
 0x117   :  { %v372_v59 = vmul.f32 %v4945_v58, %v4945_v58 }
 0x119   :  { %3473 = vmatmul.msk.f32.gmra.mxu1 %vm115_vm0, %v372_v59 }
 0x11a   :  { %v277_v61 = vpop.f32.mrf.mxu0 }
 0x11b   :  { %v278_v63 = vadd.f32 %v4792_v38, %v277_v61 }
 0x11d   :  { %v4953_v0 = vmax.f32 %v278_v63, 0.0 }
 0x11e   :  { %v510_v1 = vpop.f32.mrf.mxu1 }
 0x11f   :  { %v606_v2 = vmul.f32 4e-06, %v510_v1  ;;  %v373_v4 = vmul.f32 %v4953_v0, %v4953_v0 }
 0x121   :  { %v638_v5 = vadd.f32 1.0, %v606_v2  ;;  %3474 = vmatmul.msk.f32.gmra.mxu1 %vm115_vm0, %v373_v4 }
 0x122   :  { %v280_v6 = vpop.f32.mrf.mxu0 }
 0x123   :  { %4392 = vrsqrt.f32 %v638_v5  ;;  %v281_v7 = vadd.f32 %v4792_v38, %v280_v6  ;;  %vm676_vm2 = vweird.f32 %v638_v5 }
 0x125   :  { %v4959_v9 = vmax.f32 %v281_v7, 0.0 }
 0x126   :  { %v513_v10 = vpop.f32.mrf.mxu1 }
 0x127   :  { %v607_v11 = vmul.f32 4e-06, %v513_v10  ;;  %v374_v12 = vmul.f32 %v4959_v9, %v4959_v9 }
 0x129   :  { %v4393_v14 = vpop.eup %4392  ;;  %v639_v15 = vadd.f32 1.0, %v607_v11  ;;  %3475 = vmatmul.msk.f32.gmra.mxu1 %vm115_vm0, %v374_v12 }
 0x12a   :  { %v671_v16 = vmul.f32 %v4393_v14, %v638_v5  ;;  %v283_v17 = vpop.f32.mrf.mxu0  ;;  %vm677_vm1 = vweird.f32 %v4393_v14 }
 0x12b   :  { %4394 = vrsqrt.f32 %v639_v15  ;;  %v284_v19 = vadd.f32 %v4792_v38, %v283_v17  ;;  %vm678_vm3 = vmor %vm676_vm2, %vm677_vm1  ;;  %vm686_vm5 = vweird.f32 %v639_v15 }
 0x12c   :  { %v672_v20 = vmul.f32 %v4393_v14, %v671_v16 }
 0x12d   :  { %v4965_v21 = vmax.f32 %v284_v19, 0.0 }
 0x12e   :  { %v673_v22 = vmul.f32 0.5, %v672_v20  ;;  %v516_v24 = vpop.f32.mrf.mxu1 }
 0x12f   :  { %v608_v25 = vmul.f32 4e-06, %v516_v24  ;;  %v375_v26 = vmul.f32 %v4965_v21, %v4965_v21 }
 0x130   :  { %v674_v27 = vsub.f32 1.5, %v673_v22 }
 0x131   :  { %v4395_v29 = vpop.eup %4394  ;;  %v640_v30 = vadd.f32 1.0, %v608_v25  ;;  %3476 = vmatmul.msk.f32.gmra.mxu1 %vm115_vm0, %v375_v26 }
 0x132   :  { %v675_v31 = vmul.f32 %v4393_v14, %v674_v27  ;;  %v681_v32 = vmul.f32 %v4395_v29, %v639_v15  ;;  %v286_v34 = vpop.f32.mrf.mxu0  ;;  %vm687_vm4 = vweird.f32 %v4395_v29 }
 0x133   :  { %4396 = vrsqrt.f32 %v640_v30  ;;  %v287_v35 = vadd.f32 %v4792_v38, %v286_v34  ;;  %vm688_vm6 = vmor %vm686_vm5, %vm687_vm4  ;;  %vm696_vm8 = vweird.f32 %v640_v30 }
 0x134   :  { %v4971_v36 = vsel %vm678_vm3, %v4393_v14, %v675_v31  ;;  %v682_v37 = vmul.f32 %v4395_v29, %v681_v32 }
 0x135   :  { %4398 = vrsqrt.f32 %v4971_v36  ;;  %v4974_v40 = vmax.f32 %v287_v35, 0.0  ;;  %vm997_vm13 = vcmp.eq.f32.partialorder %v4971_v36, inf  ;;  %vm999_vm14 = vcmp.eq.f32.partialorder %v4971_v36, 0.0 }
 0x136   :  { %v683_v41 = vmul.f32 0.5, %v682_v37  ;;  %v519_v43 = vpop.f32.mrf.mxu1 }
 0x137   :  { %v609_v44 = vmul.f32 4e-06, %v519_v43  ;;  %v376_v46 = vmul.f32 %v4974_v40, %v4974_v40 }
 0x138   :  { %v684_v48 = vsub.f32 1.5, %v683_v41 }
 0x139   :  { %v4397_v50 = vpop.eup %4396  ;;  %v641_v53 = vadd.f32 1.0, %v609_v44  ;;  %3477 = vmatmul.msk.f32.gmra.mxu1 %vm115_vm0, %v376_v46 }
 0x13a   :  { %v685_v54 = vmul.f32 %v4395_v29, %v684_v48  ;;  %v691_v55 = vmul.f32 %v4397_v50, %v640_v30  ;;  %v289_v59 = vpop.f32.mrf.mxu0  ;;  %vm697_vm7 = vweird.f32 %v4397_v50 }
 0x13b   :  { %v4399_v61 = vpop.eup %4398  ;;  %4400 = vrsqrt.f32 %v641_v53  ;;  %v290_v63 = vadd.f32 %v4792_v38, %v289_v59  ;;  %vm698_vm9 = vmor %vm696_vm8, %vm697_vm7  ;;  %vm706_vm11 = vweird.f32 %v641_v53 }
 0x13c   :  { %v991_v1 = vmul.f32 %v4399_v61, %v4971_v36  ;;  %v4981_v2 = vsel %vm688_vm6, %v4395_v29, %v685_v54  ;;  %v692_v4 = vmul.f32 %v4397_v50, %v691_v55 }
 0x13d   :  { %4402 = vrsqrt.f32 %v4981_v2  ;;  %v4984_v5 = vmax.f32 %v290_v63, 0.0  ;;  %vm1009_vm1 = vcmp.eq.f32.partialorder %v4981_v2, inf  ;;  %vm1011_vm2 = vcmp.eq.f32.partialorder %v4981_v2, 0.0 }
 0x13e   :  { %v693_v6 = vmul.f32 0.5, %v692_v4  ;;  %v522_v7 = vpop.f32.mrf.mxu1  ;;  %v992_v12 = vmul.f32 %v4399_v61, %v991_v1 }
 0x13f   :  { %v610_v10 = vmul.f32 4e-06, %v522_v7  ;;  %v377_v11 = vmul.f32 %v4984_v5, %v4984_v5 }
 0x140   :  { %v694_v14 = vsub.f32 1.5, %v693_v6  ;;  %v993_v25 = vmul.f32 0.5, %v992_v12 }
 0x141   :  { %v4401_v15 = vpop.eup %4400  ;;  %v4988_v16 = vadd.f32 1.0, %v610_v10  ;;  %3478 = vmatmul.msk.f32.gmra.mxu1 %vm115_vm0, %v377_v11 }
 0x142   :  { %v695_v17 = vmul.f32 %v4397_v50, %v694_v14  ;;  %v701_v19 = vmul.f32 %v4401_v15, %v641_v53  ;;  %v292_v20 = vpop.f32.mrf.mxu0  ;;  %v994_v41 = vsub.f32 1.5, %v993_v25  ;;  %vm707_vm10 = vweird.f32 %v4401_v15 }
 0x143   :  { %v4403_v22 = vpop.eup %4402  ;;  %4404 = vrsqrt.f32 %v4988_v16  ;;  %v293_v24 = vadd.f32 %v4792_v38, %v292_v20  ;;  %vm708_vm12 = vmor %vm706_vm11, %vm707_vm10  ;;  %vm716_vm3 = vweird.f32 %v4988_v16 }
 0x144   :  { %v1003_v26 = vmul.f32 %v4403_v22, %v4981_v2  ;;  %v4994_v27 = vsel %vm698_vm9, %v4397_v50, %v695_v17  ;;  %v702_v29 = vmul.f32 %v4401_v15, %v701_v19  ;;  %v995_v4 = vmul.f32 %v4399_v61, %v994_v41 }
 0x145   :  { %4406 = vrsqrt.f32 %v4994_v27  ;;  %v4997_v31 = vmax.f32 %v293_v24, 0.0  ;;  %v1000_v24 = vand.u32 2147483648, %v4971_v36  ;;  %vm1021_vm5 = vcmp.eq.f32.partialorder %v4994_v27, inf }
 0x146   :  { %v703_v32 = vmul.f32 0.5, %v702_v29  ;;  %v525_v30 = vpop.f32.mrf.mxu1  ;;  %v1004_v34 = vmul.f32 %v4403_v22, %v1003_v26  ;;  %v996_v19 = vmul.f32 %v995_v4, %v4971_v36  ;;  %vm1023_vm6 = vcmp.eq.f32.partialorder %v4994_v27, 0.0 }
 0x147   :  { %v378_v35 = vmul.f32 %v4997_v31, %v4997_v31  ;;  %v611_v37 = vmul.f32 4e-06, %v525_v30 }
 0x148   :  { %v704_v43 = vsub.f32 1.5, %v703_v32  ;;  %v1005_v44 = vmul.f32 0.5, %v1004_v34  ;;  %v1012_v32 = vand.u32 2147483648, %v4981_v2 }
 0x149   :  { %v4405_v46 = vpop.eup %4404  ;;  %v5001_v48 = vadd.f32 1.0, %v611_v37  ;;  %3479 = vmatmul.msk.f32.gmra.mxu1 %vm115_vm0, %v378_v35 }
 0x14a   :  { %v705_v50 = vmul.f32 %v4401_v15, %v704_v43  ;;  %v711_v54 = vmul.f32 %v4405_v46, %v4988_v16  ;;  %v295_v55 = vpop.f32.mrf.mxu0  ;;  %v1006_v59 = vsub.f32 1.5, %v1005_v44  ;;  %vm717_vm15 = vweird.f32 %v4405_v46 }
 0x14b   :  { %v4407_v63 = vpop.eup %4406  ;;  %4408 = vrsqrt.f32 %v5001_v48  ;;  %v296_v1 = vadd.f32 %v4792_v38, %v295_v55  ;;  %vm718_vm4 = vmor %vm716_vm3, %vm717_vm15  ;;  %v998_v44 = vsel %vm997_vm13, %v4971_v36, %v996_v19  ;;  %vm726_vm8 = vweird.f32 %v5001_v48 }
 0x14c   :  { %v5007_v6 = vsel %vm708_vm12, %v4401_v15, %v705_v50  ;;  %v712_v7 = vmul.f32 %v4405_v46, %v711_v54  ;;  %v1007_v10 = vmul.f32 %v4403_v22, %v1006_v59  ;;  %v1015_v11 = vmul.f32 %v4407_v63, %v4994_v27 }
 0x14d   :  { %4410 = vrsqrt.f32 %v5007_v6  ;;  %v5011_v53 = vmax.f32 %v296_v1, 0.0  ;;  %vm1033_vm10 = vcmp.eq.f32.partialorder %v5007_v6, inf  ;;  %vm1035_vm11 = vcmp.eq.f32.partialorder %v5007_v6, 0.0 }
 0x14e   :  { %v713_v12 = vmul.f32 0.5, %v712_v7  ;;  %v528_v14 = vpop.f32.mrf.mxu1  ;;  %v1016_v17 = vmul.f32 %v4407_v63, %v1015_v11  ;;  %v1008_v20 = vmul.f32 %v1007_v10, %v4981_v2 }
 0x14f   :  { %v379_v61 = vmul.f32 %v5011_v53, %v5011_v53  ;;  %v612_v15 = vmul.f32 4e-06, %v528_v14  ;;  %v1001_v14 = vsel %vm999_vm14, %v1000_v24, %v998_v44 }
 0x150   :  { %v714_v22 = vsub.f32 1.5, %v713_v12  ;;  %v1017_v25 = vmul.f32 0.5, %v1016_v17  ;;  %v1010_v50 = vsel %vm1009_vm1, %v4981_v2, %v1008_v20  ;;  %v1024_v17 = vand.u32 2147483648, %v4994_v27 }
 0x151   :  { %v4409_v26 = vpop.eup %4408  ;;  %v5020_v29 = vadd.f32 1.0, %v612_v15  ;;  %3480 = vmatmul.msk.f32.gmra.mxu1 %vm115_vm0, %v379_v61  ;;  %v1013_v10 = vsel %vm1011_vm2, %v1012_v32, %v1010_v50 }
 0x152   :  { %v715_v30 = vmul.f32 %v4405_v46, %v714_v22  ;;  %v721_v34 = vmul.f32 %v4409_v26, %v5001_v48  ;;  %v298_v35 = vpop.f32.mrf.mxu0  ;;  %v1018_v37 = vsub.f32 1.5, %v1017_v25  ;;  %vm727_vm7 = vweird.f32 %v4409_v26 }
 0x153   :  { %v4411_v41 = vpop.eup %4410  ;;  %4412 = vrsqrt.f32 %v5020_v29  ;;  %v299_v43 = vadd.f32 %v4792_v38, %v298_v35  ;;  %v1375_v32 = vmul.f32 %v1013_v10, %v4981_v2  ;;  %vm728_vm9 = vmor %vm726_vm8, %vm727_vm7  ;;  %vm736_vm13 = vweird.f32 %v5020_v29 }
 0x154   :  { %v5035_v54 = vsel %vm718_vm4, %v4405_v46, %v715_v30  ;;  %v722_v16 = vmul.f32 %v4409_v26, %v721_v34  ;;  %v1019_v55 = vmul.f32 %v4407_v63, %v1018_v37  ;;  %v1027_v59 = vmul.f32 %v4411_v41, %v5007_v6 }
 0x155   :  { %4414 = vrsqrt.f32 %v5035_v54  ;;  %v5039_v1 = vmax.f32 %v299_v43, 0.0  ;;  %v1374_v37 = vmul.f32 %v1001_v14, %v4971_v36  ;;  %vm1045_vm1 = vcmp.eq.f32.partialorder %v5035_v54, inf }
 0x156   :  { %v723_v4 = vmul.f32 0.5, %v722_v16  ;;  %v531_v7 = vpop.f32.mrf.mxu1  ;;  %v1020_v46 = vmul.f32 %v1019_v55, %v4994_v27  ;;  %v1028_v11 = vmul.f32 %v4411_v41, %v1027_v59  ;;  %v1407_v59 = vmul.f32 %v1375_v32, %v4808_v47 }
 0x157   :  { %v380_v63 = vmul.f32 %v5039_v1, %v5039_v1  ;;  %v613_v12 = vmul.f32 4e-06, %v531_v7  ;;  %vm1047_vm2 = vcmp.eq.f32.partialorder %v5035_v54, 0.0 }
 0x158   :  { %v724_v61 = vsub.f32 1.5, %v723_v4  ;;  %v1022_v15 = vsel %vm1021_vm5, %v4994_v27, %v1020_v46  ;;  %v1029_v19 = vmul.f32 0.5, %v1028_v11  ;;  %v1406_v11 = vmul.f32 %v1374_v37, %v4798_v42 }
 0x159   :  { %v4413_v20 = vpop.eup %4412  ;;  %v5053_v22 = vadd.f32 1.0, %v613_v12  ;;  %3481 = vmatmul.msk.f32.gmra.mxu1 %vm115_vm0, %v380_v63  ;;  %v1025_v25 = vsel %vm1023_vm6, %v1024_v17, %v1022_v15 }
 0x15a   :  { %v725_v24 = vmul.f32 %v4409_v26, %v724_v61  ;;  %v731_v30 = vmul.f32 %v4413_v20, %v5020_v29  ;;  %v301_v34 = vpop.f32.mrf.mxu0  ;;  %v1030_v35 = vsub.f32 1.5, %v1029_v19  ;;  %v1376_v44 = vmul.f32 %v1025_v25, %v4994_v27 }
 0x15b   :  { %v4415_v43 = vpop.eup %4414  ;;  %4416 = vrsqrt.f32 %v5053_v22  ;;  %v302_v48 = vadd.f32 %v4792_v38, %v301_v34  ;;  %v1036_v27 = vand.u32 2147483648, %v5007_v6  ;;  %vm737_vm12 = vweird.f32 %v4413_v20 }
 0x15c   :  { %v5066_v50 = vsel %vm728_vm9, %v4409_v26, %v725_v24  ;;  %v732_v2 = vmul.f32 %v4413_v20, %v731_v30  ;;  %v1031_v16 = vmul.f32 %v4411_v41, %v1030_v35  ;;  %v1039_v55 = vmul.f32 %v4415_v43, %v5035_v54  ;;  %vm738_vm14 = vmor %vm736_vm13, %vm737_vm12 }
 0x15d   :  { %4418 = vrsqrt.f32 %v5066_v50  ;;  %v5070_v36 = vmax.f32 %v302_v48, 0.0  ;;  %v1408_v63 = vmul.f32 %v1376_v44, %v4818_v52  ;;  %v1438_v19 = vmax.f32 %v1406_v11, %v1407_v59 }
 0x15e   :  { %v733_v4 = vmul.f32 0.5, %v732_v2  ;;  %v534_v7 = vpop.f32.mrf.mxu1  ;;  %v1032_v10 = vmul.f32 %v1031_v16, %v5007_v6  ;;  %v1040_v26 = vmul.f32 %v4415_v43, %v1039_v55  ;;  %vm746_vm3 = vweird.f32 %v5053_v22 }
 0x15f   :  { %v381_v41 = vmul.f32 %v5070_v36, %v5070_v36  ;;  %v614_v46 = vmul.f32 4e-06, %v534_v7  ;;  %v1439_v34 = vmax.f32 %v1438_v19, %v1408_v63  ;;  %v5104_v7 = vadd.f32 %v4792_v38, %v4934_v49 }
 0x160   :  { %v734_v12 = vsub.f32 1.5, %v733_v4  ;;  %v1034_v47 = vsel %vm1033_vm10, %v5007_v6, %v1032_v10  ;;  %v1041_v14 = vmul.f32 0.5, %v1040_v26  ;;  %v1048_v49 = vand.u32 2147483648, %v5035_v54 }
 0x161   :  { %v4417_v17 = vpop.eup %4416  ;;  %v5083_v61 = vadd.f32 1.0, %v614_v46  ;;  %3482 = vmatmul.msk.f32.gmra.mxu1 %vm115_vm0, %v381_v41  ;;  %v1037_v15 = vsel %vm1035_vm11, %v1036_v27, %v1034_v47  ;;  %vm1057_vm4 = vcmp.eq.f32.partialorder %v5066_v50, inf  ;;  %vm1059_vm6 = vcmp.eq.f32.partialorder %v5066_v50, 0.0 }
 0x162   :  { %v735_v25 = vmul.f32 %v4413_v20, %v734_v12  ;;  %v741_v42 = vmul.f32 %v4417_v17, %v5053_v22  ;;  %v304_v52 = vpop.f32.mrf.mxu0  ;;  %v1377_v32 = vmul.f32 %v1037_v15, %v5007_v6  ;;  %v1042_v35 = vsub.f32 1.5, %v1041_v14 }
 0x163   :  { %v4419_v24 = vpop.eup %4418  ;;  %4420 = vrsqrt.f32 %v5083_v61  ;;  %v305_v30 = vadd.f32 %v4792_v38, %v304_v52  ;;  %vm747_vm15 = vweird.f32 %v4417_v17  ;;  %vm756_vm7 = vweird.f32 %v5083_v61 }
 0x164   :  { %v5093_v37 = vsel %vm738_vm14, %v4413_v20, %v735_v25  ;;  %v742_v48 = vmul.f32 %v4417_v17, %v741_v42  ;;  %v1409_v44 = vmul.f32 %v1377_v32, %v4828_v57  ;;  %v1051_v29 = vmul.f32 %v4419_v24, %v5066_v50  ;;  %vm748_vm5 = vmor %vm746_vm3, %vm747_vm15 }
 0x165   :  { %4422 = vrsqrt.f32 %v5093_v37  ;;  %v5098_v2 = vmax.f32 %v305_v30, 0.0  ;;  %v1043_v6 = vmul.f32 %v4415_v43, %v1042_v35  ;;  %v5108_v20 = vadd.f32 %v4792_v38, %v4943_v56  ;;  %v4222_v30 = vld [vmem:[%s7178_s4 + $0x38] sm:$0xff]  }
 0x166   :  { %v743_v16 = vmul.f32 0.5, %v742_v48  ;;  %v537_v55 = vpop.f32.mrf.mxu1  ;;  %v5100_v59 = vmax.f32 %v1439_v34, %v1409_v44  ;;  %v1052_v4 = vmul.f32 %v4419_v24, %v1051_v29  ;;  %v1060_v32 = vand.u32 2147483648, %v5066_v50 }
 0x167   :  { %v382_v57 = vmul.f32 %v5098_v2, %v5098_v2  ;;  %v615_v10 = vmul.f32 4e-06, %v537_v55  ;;  %v1044_v43 = vmul.f32 %v1043_v6, %v5035_v54  ;;  %vm1069_vm9 = vcmp.eq.f32.partialorder %v5093_v37, inf }
 0x168   :  { %v744_v27 = vsub.f32 1.5, %v743_v16  ;;  %1467 = vrot.lane.b32.xlu0 %v5100_v59, %s4579_s26  ;;  %v1053_v26 = vmul.f32 0.5, %v1052_v4  ;;  %v3588_v55 = vunpack.c.h.bf16 %v4222_v30  ;;  %v3587_v4 = vunpack.c.l.bf16 %v4222_v30 }
 0x169   :  { %v4421_v41 = vpop.eup %4420  ;;  %v5115_v46 = vadd.f32 1.0, %v615_v10  ;;  %3483 = vmatmul.msk.f32.gmra.mxu1 %vm115_vm0, %v382_v57  ;;  %v1046_v22 = vsel %vm1045_vm1, %v5035_v54, %v1044_v43  ;;  %v4221_v57 = vld [vmem:[%s7178_s4 + $0x30] sm:$0xff]   ;;  %vm1071_vm10 = vcmp.eq.f32.partialorder %v5093_v37, 0.0 }
 0x16a   :  { %v745_v56 = vmul.f32 %v4417_v17, %v744_v27  ;;  %v751_v11 = vmul.f32 %v4421_v41, %v5083_v61  ;;  %v307_v63 = vpop.f32.mrf.mxu0  ;;  %v1054_v14 = vsub.f32 1.5, %v1053_v26  ;;  %vm757_vm8 = vweird.f32 %v4421_v41  ;;  %1756 = vmatpush.msra.mxu2 %v3588_v55  ;;  %v4220_v61 = vld [vmem:[%s7178_s4 + $0x28] sm:$0xff]  }
 0x16b   :  { %v4423_v12 = vpop.eup %4422  ;;  %4424 = vrsqrt.f32 %v5115_v46  ;;  %v308_v47 = vadd.f32 %v4792_v38, %v307_v63  ;;  %v1049_v29 = vsel %vm1047_vm2, %v1048_v49, %v1046_v22  ;;  %v1072_v26 = vand.u32 2147483648, %v5093_v37  ;;  %vm758_vm11 = vmor %vm756_vm7, %vm757_vm8 }
 0x16c   :  { %v5128_v15 = vsel %vm748_vm5, %v4417_v17, %v745_v56  ;;  %v752_v19 = vmul.f32 %v4421_v41, %v751_v11  ;;  %v1063_v25 = vmul.f32 %v4423_v12, %v5093_v37  ;;  %v1055_v52 = vmul.f32 %v4419_v24, %v1054_v14  ;;  %1757 = vmatpush.msra.mxu2 %v3587_v4 }
 0x16d   :  { %4426 = vrsqrt.f32 %v5128_v15  ;;  %v5135_v42 = vmax.f32 %v308_v47, 0.0  ;;  %v3584_v47 = vunpack.c.h.bf16 %v4221_v57  ;;  %vm766_vm12 = vweird.f32 %v5115_v46 }
 0x16e   :  { %v753_v17 = vmul.f32 0.5, %v752_v19  ;;  %v540_v34 = vpop.f32.mrf.mxu1  ;;  %v1064_v35 = vmul.f32 %v4423_v12, %v1063_v25  ;;  %v1056_v24 = vmul.f32 %v1055_v52, %v5066_v50  ;;  %v1378_v25 = vmul.f32 %v1049_v29, %v5035_v54 }
 0x16f   :  { %v383_v48 = vmul.f32 %v5135_v42, %v5135_v42  ;;  %v616_v44 = vmul.f32 4e-06, %v540_v34  ;;  %1758 = vmatpush.msra.mxu2 %v3584_v47  ;;  %v3580_v29 = vunpack.c.h.bf16 %v4220_v61  ;;  %vm1081_vm14 = vcmp.eq.f32.partialorder %v5128_v15, inf }
 0x170   :  { %v754_v6 = vsub.f32 1.5, %v753_v17  ;;  %v1065_v16 = vmul.f32 0.5, %v1064_v35  ;;  %v1058_v43 = vsel %vm1057_vm4, %v5066_v50, %v1056_v24  ;;  %v3579_v4 = vunpack.c.l.bf16 %v4220_v61 }
 0x171   :  { %v5151_v10 = vpop.eup %4424  ;;  %v5153_v27 = vadd.f32 1.0, %v616_v44  ;;  %3484 = vmatmul.msk.f32.gmra.mxu1 %vm115_vm0, %v383_v48  ;;  %v1061_v63 = vsel %vm1059_vm6, %v1060_v32, %v1058_v43  ;;  %v3583_v48 = vunpack.c.l.bf16 %v4221_v57  ;;  %v4219_v57 = vld [vmem:[%s7178_s4 + $0x20] sm:$0xff]   ;;  %vm1083_vm15 = vcmp.eq.f32.partialorder %v5128_v15, 0.0 }
 0x172   :  { %v755_v49 = vmul.f32 %v4421_v41, %v754_v6  ;;  %v761_v56 = vmul.f32 %v5151_v10, %v5115_v46  ;;  %v310_v11 = vpop.f32.mrf.mxu0  ;;  %v1066_v22 = vsub.f32 1.5, %v1065_v16  ;;  %v1379_v17 = vmul.f32 %v1061_v63, %v5066_v50  ;;  %v4218_v46 = vld [vmem:[%s7178_s4 + $0x18] sm:$0xff]  }
 0x173   :  { %v4427_v14 = vpop.eup %4426  ;;  %4428 = vrsqrt.f32 %v5153_v27  ;;  %v311_v19 = vadd.f32 %v4792_v38, %v310_v11  ;;  %v1084_v16 = vand.u32 2147483648, %v5128_v15  ;;  %vm767_vm13 = vweird.f32 %v5151_v10  ;;  %1759 = vmatpush.msra.mxu2 %v3583_v48  ;;  %v4230_v48 = vld [vmem:[%s7178_s4 + $0x78] sm:$0xff]  }
 0x174   :  { %v5171_v52 = vsel %vm758_vm11, %v4421_v41, %v755_v49  ;;  %v762_v30 = vmul.f32 %v5151_v10, %v761_v56  ;;  %v1075_v32 = vmul.f32 %v4427_v14, %v5128_v15  ;;  %v1067_v35 = vmul.f32 %v4423_v12, %v1066_v22  ;;  %vm768_vm1 = vmor %vm766_vm12, %vm767_vm13 }
 0x175   :  { %4430 = vrsqrt.f32 %v5171_v52  ;;  %v5180_v34 = vmax.f32 %v311_v19, 0.0  ;;  %v1410_v11 = vmul.f32 %v1378_v25, %v4838_v62  ;;  %v1411_v63 = vmul.f32 %v1379_v17, %v4848_v3  ;;  %1760 = vmatpush.msra.mxu2 %v3580_v29 }
 0x176   :  { %v763_v54 = vmul.f32 0.5, %v762_v30  ;;  %v543_v41 = vpop.f32.mrf.mxu1  ;;  %v1076_v44 = vmul.f32 %v4427_v14, %v1075_v32  ;;  %v1068_v6 = vmul.f32 %v1067_v35, %v5093_v37  ;;  %v3576_v32 = vunpack.c.h.bf16 %v4219_v57 }
 0x177   :  { %v384_v50 = vmul.f32 %v5180_v34, %v5180_v34  ;;  %v617_v24 = vmul.f32 4e-06, %v543_v41  ;;  %vm776_vm2 = vweird.f32 %v5153_v27  ;;  %1761 = vmatpush.msra.mxu2 %v3579_v4  ;;  %vm1095_vm11 = vcmp.eq.f32.partialorder %v5171_v52, 0.0 }
 0x178   :  { %v764_v55 = vsub.f32 1.5, %v763_v54  ;;  %v1077_v12 = vmul.f32 0.5, %v1076_v44  ;;  %v1070_v56 = vsel %vm1069_vm9, %v5093_v37, %v1068_v6  ;;  %vm1093_vm9 = vcmp.eq.f32.partialorder %v5171_v52, inf }
 0x179   :  { %v5192_v43 = vpop.eup %4428  ;;  %v5194_v49 = vadd.f32 1.0, %v617_v24  ;;  %3485 = vmatmul.msk.f32.gmra.mxu1 %vm115_vm0, %v384_v50  ;;  %v1073_v30 = vsel %vm1071_vm10, %v1072_v26, %v1070_v56  ;;  %v1441_v50 = vmax.f32 %v1410_v11, %v1411_v63  ;;  %1762 = vmatpush.msra.mxu2 %v3576_v32  ;;  %v3620_v24 = vunpack.c.h.bf16 %v4230_v48  ;;  %v4217_v11 = vld [vmem:[%s7178_s4 + $0x10] sm:$0xff]  }
 0x17a   :  { %v765_v47 = vmul.f32 %v5151_v10, %v764_v55  ;;  %v771_v19 = vmul.f32 %v5192_v43, %v5153_v27  ;;  %v313_v22 = vpop.f32.mrf.mxu0  ;;  %v1078_v3 = vsub.f32 1.5, %v1077_v12  ;;  %v1380_v35 = vmul.f32 %v1073_v30, %v5093_v37  ;;  %v4229_v63 = vld [vmem:[%s7178_s4 + $0x70] sm:$0xff]   ;;  %v4216_v27 = vld [vmem:[%s7178_s4 + $0x8] sm:$0xff]  }
 0x17b   :  { %v5208_v61 = vpop.eup %4430  ;;  %4432 = vrsqrt.f32 %v5194_v49  ;;  %v314_v62 = vadd.f32 %v4792_v38, %v313_v22  ;;  %v3572_v37 = vunpack.c.h.bf16 %v4218_v46  ;;  %vm777_vm3 = vweird.f32 %v5192_v43  ;;  %1797 = vmatpush.msra.mxu3 %v3620_v24 }
 0x17c   :  { %v1087_v25 = vmul.f32 %v5208_v61, %v5171_v52  ;;  %v5220_v26 = vsel %vm768_vm1, %v5151_v10, %v765_v47  ;;  %v772_v17 = vmul.f32 %v5192_v43, %v771_v19  ;;  %v1079_v41 = vmul.f32 %v4427_v14, %v1078_v3  ;;  %vm778_vm4 = vmor %vm776_vm2, %vm777_vm3 }
 0x17d   :  { %4434 = vrsqrt.f32 %v5220_v26  ;;  %v5231_v54 = vmax.f32 %v314_v62, 0.0  ;;  %v3575_v10 = vunpack.c.l.bf16 %v4219_v57  ;;  %v1412_v4 = vmul.f32 %v1380_v35, %v4858_v8 }
 0x17e   :  { %v773_v44 = vmul.f32 0.5, %v772_v17  ;;  %v546_v29 = vpop.f32.mrf.mxu1  ;;  %v1080_v12 = vmul.f32 %v1079_v41, %v5128_v15  ;;  %v3571_v14 = vunpack.c.l.bf16 %v4218_v46  ;;  %v3619_v57 = vunpack.c.l.bf16 %v4230_v48 }
 0x17f   :  { %v385_v6 = vmul.f32 %v5231_v54, %v5231_v54  ;;  %v618_v55 = vmul.f32 4e-06, %v546_v29  ;;  %1763 = vmatpush.msra.mxu2 %v3575_v10  ;;  %v3616_v22 = vunpack.c.h.bf16 %v4229_v63  ;;  %v1088_v30 = vmul.f32 %v5208_v61, %v1087_v25 }
 0x180   :  { %v774_v56 = vsub.f32 1.5, %v773_v44  ;;  %v1082_v8 = vsel %vm1081_vm14, %v5128_v15, %v1080_v12  ;;  %1798 = vmatpush.msra.mxu3 %v3619_v57  ;;  %v3568_v35 = vunpack.c.h.bf16 %v4217_v11  ;;  %v1442_v41 = vmax.f32 %v1441_v50, %v1412_v4 }
 0x181   :  { %v5244_v47 = vpop.eup %4432  ;;  %v5246_v19 = vadd.f32 1.0, %v618_v55  ;;  %3486 = vmatmul.msk.f32.gmra.mxu1 %vm115_vm0, %v385_v6  ;;  %v1085_v17 = vsel %vm1083_vm15, %v1084_v16, %v1082_v8  ;;  %1764 = vmatpush.msra.mxu2 %v3572_v37  ;;  %v3567_v29 = vunpack.c.l.bf16 %v4217_v11  ;;  %v3615_v50 = vunpack.c.l.bf16 %v4229_v63  ;;  %v5293_v63 = vld [vmem:[%s7178_s4] sm:$0xff]  }
 0x182   :  { %v775_v32 = vmul.f32 %v5192_v43, %v774_v56  ;;  %v781_v62 = vmul.f32 %v5244_v47, %v5194_v49  ;;  %v316_v3 = vpop.f32.mrf.mxu0  ;;  %v1381_v48 = vmul.f32 %v1085_v17, %v5128_v15  ;;  %1799 = vmatpush.msra.mxu3 %v3616_v22  ;;  %v3564_v6 = vunpack.c.h.bf16 %v4216_v27  ;;  %v5298_v8 = vld [vmem:[%s7178_s4 + $0x60] sm:$0xff]  }
 0x183   :  { %v5260_v46 = vpop.eup %4434  ;;  %4436 = vrsqrt.f32 %v5246_v19  ;;  %v317_v25 = vadd.f32 %v4792_v38, %v316_v3  ;;  %1765 = vmatpush.msra.mxu2 %v3571_v14  ;;  %v4228_v38 = vld [vmem:[%s7178_s4 + $0x68] sm:$0xff]   ;;  %v1089_v12 = vmul.f32 0.5, %v1088_v30  ;;  %vm787_vm5 = vweird.f32 %v5244_v47 }
 0x184   :  { %v1099_v16 = vmul.f32 %v5260_v46, %v5220_v26  ;;  %v5272_v10 = vsel %vm778_vm4, %v5192_v43, %v775_v32  ;;  %v782_v44 = vmul.f32 %v5244_v47, %v781_v62  ;;  %v1413_v43 = vmul.f32 %v1381_v48, %v4868_v13  ;;  %1800 = vmatpush.msra.mxu3 %v3615_v50 }
 0x185   :  { %4438 = vrsqrt.f32 %v5272_v10  ;;  %v5282_v15 = vmax.f32 %v317_v25, 0.0  ;;  %1766 = vmatpush.msra.mxu2 %v3568_v35  ;;  %v3612_v55 = vunpack.c.h.bf16 %v4228_v38  ;;  %v3563_v11 = vunpack.c.l.bf16 %v4216_v27 }
 0x186   :  { %v783_v37 = vmul.f32 0.5, %v782_v44  ;;  %v549_v24 = vpop.f32.mrf.mxu1  ;;  %v5288_v14 = vmax.f32 %v1442_v41, %v1413_v43  ;;  %v3611_v13 = vunpack.c.l.bf16 %v4228_v38  ;;  %v1090_v22 = vsub.f32 1.5, %v1089_v12 }
 0x187   :  { %v386_v4 = vmul.f32 %v5282_v15, %v5282_v15  ;;  %v619_v56 = vmul.f32 4e-06, %v549_v24  ;;  %1767 = vmatpush.msra.mxu2 %v3567_v29  ;;  %v5301_v32 = vmax.f32 %v5104_v7, 0.0  ;;  %vm786_vm6 = vweird.f32 %v5194_v49  ;;  %1801 = vmatpush.msra.mxu3 %v3612_v55 }
 0x188   :  { %v784_v57 = vsub.f32 1.5, %v783_v37  ;;  %1469 = vrot.lane.b32.xlu1 %v5288_v14, %s4579_s26  ;;  %v1100_v3 = vmul.f32 %v5260_v46, %v1099_v16  ;;  %v3560_v7 = vunpack.c.h.bf16 %v5293_v63  ;;  %v3608_v25 = vunpack.c.h.bf16 %v5298_v8  ;;  %vm788_vm7 = vmor %vm786_vm6, %vm787_vm5 }
 0x189   :  { %v4437_v30 = vpop.eup %4436  ;;  %v5304_v62 = vadd.f32 1.0, %v619_v56  ;;  %3487 = vmatmul.msk.f32.gmra.mxu1 %vm115_vm0, %v386_v4  ;;  %1768 = vmatpush.msra.mxu2 %v3564_v6  ;;  %v1091_v48 = vmul.f32 %v5208_v61, %v1090_v22  ;;  %v5319_v16 = vmax.f32 %v5108_v20, 0.0  ;;  %v387_v43 = vmul.f32 %v5301_v32, %v5301_v32  ;;  %vm5381_vm6 = vmneg %vm115_vm0 }
 0x18a   :  { %v785_v17 = vmul.f32 %v5244_v47, %v784_v57  ;;  %v791_v35 = vmul.f32 %v4437_v30, %v5246_v19  ;;  %v1101_v41 = vmul.f32 0.5, %v1100_v3  ;;  %1802 = vmatpush.msra.mxu3 %v3611_v13  ;;  %vm797_vm8 = vweird.f32 %v4437_v30 }
 0x18b   :  { %v4439_v49 = vpop.eup %4438  ;;  %4440 = vrsqrt.f32 %v5304_v62  ;;  %1769 = vmatpush.msra.mxu2 %v3563_v11  ;;  %v1092_v37 = vmul.f32 %v1091_v48, %v5171_v52  ;;  %v388_v6 = vmul.f32 %v5319_v16, %v5319_v16  ;;  %vm796_vm10 = vweird.f32 %v5246_v19 }
 0x18c   :  { %v5322_v44 = vsel %vm788_vm7, %v5244_v47, %v785_v17  ;;  %v792_v29 = vmul.f32 %v4437_v30, %v791_v35  ;;  %v1102_v27 = vsub.f32 1.5, %v1101_v41  ;;  %v1111_v38 = vmul.f32 %v4439_v49, %v5272_v10  ;;  %1803 = vmatpush.msra.mxu3 %v3608_v25  ;;  %vm798_vm12 = vmor %vm796_vm10, %vm797_vm8 }
 0x18d   :  { %4442 = vrsqrt.f32 %v5322_v44  ;;  %1770 = vmatpush.msra.mxu2 %v3560_v7  ;;  %v1094_v22 = vsel %vm1093_vm9, %v5171_v52, %v1092_v37  ;;  %vm1105_vm13 = vcmp.eq.f32.partialorder %v5220_v26, inf  ;;  %v1096_v25 = vand.u32 2147483648, %v5171_v52 }
 0x18e   :  { %v793_v50 = vmul.f32 0.5, %v792_v29  ;;  %v552_v61 = vpop.f32.mrf.mxu1  ;;  %v1103_v47 = vmul.f32 %v5260_v46, %v1102_v27  ;;  %v1112_v24 = vmul.f32 %v4439_v49, %v1111_v38  ;;  %vm1107_vm14 = vcmp.eq.f32.partialorder %v5220_v26, 0.0 }
 0x18f   :  { %v620_v20 = vmul.f32 4e-06, %v552_v61  ;;  %v1108_v48 = vand.u32 2147483648, %v5220_v26  ;;  %vm1117_vm15 = vcmp.eq.f32.partialorder %v5272_v10, inf  ;;  %v1120_v37 = vand.u32 2147483648, %v5272_v10 }
 0x190   :  { %v794_v55 = vsub.f32 1.5, %v793_v50  ;;  %v1104_v56 = vmul.f32 %v1103_v47, %v5220_v26  ;;  %v1113_v57 = vmul.f32 0.5, %v1112_v24  ;;  %vm806_vm2 = vweird.f32 %v5304_v62 }
 0x191   :  { %v4441_v12 = vpop.eup %4440  ;;  %v5332_v4 = vadd.f32 1.0, %v620_v20  ;;  %3488 = vmatmul.msk.f32.gmra.mxu1 %vm115_vm0, %v387_v43  ;;  %v1097_v43 = vsel %vm1095_vm11, %v1096_v25, %v1094_v22  ;;  %vm1119_vm3 = vcmp.eq.f32.partialorder %v5272_v10, 0.0  ;;  %vm1129_vm5 = vcmp.eq.f32.partialorder %v5322_v44, inf }
 0x192   :  { %v795_v11 = vmul.f32 %v4437_v30, %v794_v55  ;;  %v801_v46 = vmul.f32 %v4441_v12, %v5304_v62  ;;  %v1114_v3 = vsub.f32 1.5, %v1113_v57  ;;  %v1106_v7 = vsel %vm1105_vm13, %v5220_v26, %v1104_v56 }
 0x193   :  { %v4443_v13 = vpop.eup %4442  ;;  %4444 = vrsqrt.f32 %v5332_v4  ;;  %v1109_v50 = vsel %vm1107_vm14, %v1108_v48, %v1106_v7  ;;  %vm807_vm1 = vweird.f32 %v4441_v12  ;;  %v1382_v62 = vmul.f32 %v1097_v43, %v5171_v52 }
 0x194   :  { %v5343_v17 = vsel %vm798_vm12, %v4437_v30, %v795_v11  ;;  %v802_v35 = vmul.f32 %v4441_v12, %v801_v46  ;;  %v1123_v19 = vmul.f32 %v4443_v13, %v5322_v44  ;;  %v1115_v41 = vmul.f32 %v4439_v49, %v1114_v3  ;;  %vm808_vm4 = vmor %vm806_vm2, %vm807_vm1 }
 0x195   :  { %4446 = vrsqrt.f32 %v5343_v17  ;;  %v1383_v46 = vmul.f32 %v1109_v50, %v5220_v26  ;;  %v3559_v7 = vunpack.c.l.bf16 %v5293_v63  ;;  %v4226_v26 = vld [vmem:[%s7178_s4 + $0x58] sm:$0xff]   ;;  %vm1131_vm7 = vcmp.eq.f32.partialorder %v5322_v44, 0.0 }
 0x196   :  { %v803_v29 = vmul.f32 0.5, %v802_v35  ;;  %v555_v27 = vpop.f32.mrf.mxu1  ;;  %v1124_v30 = vmul.f32 %v4443_v13, %v1123_v19  ;;  %v1116_v61 = vmul.f32 %v1115_v41, %v5272_v10  ;;  %v3607_v19 = vunpack.c.l.bf16 %v5298_v8  ;;  %v5378_v41 = vpop.permute.xlu0 %1465 }
 0x197   :  { %v621_v38 = vmul.f32 4e-06, %v555_v27  ;;  %v1132_v8 = vand.u32 2147483648, %v5322_v44  ;;  %v1415_v27 = vmul.f32 %v1383_v46, %v4888_v23  ;;  %1771 = vmatpush.msra.mxu2 %v3559_v7  ;;  %vm816_vm8 = vweird.f32 %v5332_v4  ;;  %v4225_v23 = vld [vmem:[%s7178_s4 + $0x50] sm:$0xff]  }
 0x198   :  { %v804_v20 = vsub.f32 1.5, %v803_v29  ;;  %v1125_v47 = vmul.f32 0.5, %v1124_v30  ;;  %v1118_v55 = vsel %vm1117_vm15, %v5272_v10, %v1116_v61  ;;  %1804 = vmatpush.msra.mxu3 %v3607_v19  ;;  %3491 = vmatmul.msk.f32.vlgmr.msra.gmra.mxu2 %vm5381_vm6, %v5378_v41  ;;  %v3603_v30 = vunpack.c.l.bf16 %v4226_v26  ;;  %v4224_v19 = vld [vmem:[%s7178_s4 + $0x48] sm:$0xff]  }
 0x199   :  { %v4445_v49 = vpop.eup %4444  ;;  %v5357_v24 = vadd.f32 1.0, %v621_v38  ;;  %3489 = vmatmul.msk.f32.gmra.mxu1 %vm115_vm0, %v388_v6  ;;  %v1121_v11 = vsel %vm1119_vm3, %v1120_v37, %v1118_v55  ;;  %v1414_v50 = vmul.f32 %v1382_v62, %v4878_v18  ;;  %v3600_v55 = vunpack.c.h.bf16 %v4225_v23 }
 0x19a   :  { %v805_v56 = vmul.f32 %v4441_v12, %v804_v20  ;;  %v811_v57 = vmul.f32 %v4445_v49, %v5332_v4  ;;  %v1126_v22 = vsub.f32 1.5, %v1125_v47  ;;  %v1384_v48 = vmul.f32 %v1121_v11, %v5272_v10 }
 0x19b   :  { %4448 = vrsqrt.f32 %v5357_v24  ;;  %v5367_v3 = vpop.eup %4446  ;;  %vm817_vm9 = vweird.f32 %v4445_v49  ;;  %v1444_v11 = vmax.f32 %v1414_v50, %v1415_v27  ;;  %v3599_v62 = vunpack.c.l.bf16 %v4225_v23 }
 0x19c   :  { %v5369_v6 = vsel %vm808_vm4, %v4441_v12, %v805_v56  ;;  %v812_v35 = vmul.f32 %v4445_v49, %v811_v57  ;;  %v1127_v25 = vmul.f32 %v4443_v13, %v1126_v22  ;;  %v3604_v12 = vunpack.c.h.bf16 %v4226_v26  ;;  %vm818_vm10 = vmor %vm816_vm8, %vm817_vm9 }
 0x19d   :  { %4450 = vrsqrt.f32 %v5369_v6  ;;  %v1135_v38 = vmul.f32 %v5367_v3, %v5343_v17  ;;  %v1416_v47 = vmul.f32 %v1384_v48, %v4898_v28  ;;  %v3596_v48 = vunpack.c.h.bf16 %v4224_v19 }
 0x19e   :  { %v813_v63 = vmul.f32 0.5, %v812_v35  ;;  %v558_v29 = vpop.f32.mrf.mxu1  ;;  %v1128_v10 = vmul.f32 %v1127_v25, %v5322_v44  ;;  %1805 = vmatpush.msra.mxu3 %v3604_v12  ;;  %vm826_vm12 = vweird.f32 %v5357_v24  ;;  %vm1141_vm15 = vcmp.eq.f32.partialorder %v5343_v17, inf }
 0x19f   :  { %v622_v13 = vmul.f32 4e-06, %v558_v29  ;;  %v1136_v28 = vmul.f32 %v5367_v3, %v1135_v38  ;;  %v1445_v25 = vmax.f32 %v1444_v11, %v1416_v47  ;;  %vm1143_vm2 = vcmp.eq.f32.partialorder %v5343_v17, 0.0 }
 0x1a0   :  { %v814_v43 = vsub.f32 1.5, %v813_v63  ;;  %v1130_v37 = vsel %vm1129_vm5, %v5322_v44, %v1128_v10  ;;  %1806 = vmatpush.msra.mxu3 %v3603_v30  ;;  %3493 = vmatmul.msk.f32.gmra.mxu2 %vm5381_vm6, %v5378_v41  ;;  %vm1153_vm4 = vcmp.eq.f32.partialorder %v5369_v6, inf  ;;  %vm1155_vm5 = vcmp.eq.f32.partialorder %v5369_v6, 0.0 }
 0x1a1   :  { %v4449_v61 = vpop.eup %4448  ;;  %v5399_v20 = vadd.f32 1.0, %v622_v13  ;;  %v1133_v18 = vsel %vm1131_vm7, %v1132_v8, %v1130_v37  ;;  %v3595_v8 = vunpack.c.l.bf16 %v4224_v19  ;;  %v1137_v27 = vmul.f32 0.5, %v1136_v28 }
 0x1a2   :  { %v815_v56 = vmul.f32 %v4445_v49, %v814_v43  ;;  %v821_v57 = vmul.f32 %v4449_v61, %v5357_v24  ;;  %v1385_v22 = vmul.f32 %v1133_v18, %v5322_v44  ;;  %1807 = vmatpush.msra.mxu3 %v3600_v55  ;;  %vm827_vm11 = vweird.f32 %v4449_v61 }
 0x1a3   :  { %v4451_v46 = vpop.eup %4450  ;;  %4452 = vrsqrt.f32 %v5399_v20  ;;  %vm828_vm13 = vmor %vm826_vm12, %vm827_vm11  ;;  %v1138_v55 = vsub.f32 1.5, %v1137_v27  ;;  %vm836_vm1 = vweird.f32 %v5399_v20 }
 0x1a4   :  { %v5414_v35 = vsel %vm818_vm10, %v4445_v49, %v815_v56  ;;  %v822_v7 = vmul.f32 %v4449_v61, %v821_v57  ;;  %v1147_v26 = vmul.f32 %v4451_v46, %v5369_v6  ;;  %v1417_v4 = vmul.f32 %v1385_v22, %v4908_v33  ;;  %1808 = vmatpush.msra.mxu3 %v3599_v62  ;;  %v4223_v33 = vld [vmem:[%s7178_s4 + $0x40] sm:$0xff]  }
 0x1a5   :  { %4454 = vrsqrt.f32 %v5414_v35  ;;  %v3592_v43 = vunpack.c.h.bf16 %v4223_v33  ;;  %v3591_v47 = vunpack.c.l.bf16 %v4223_v33  ;;  %vm1165_vm7 = vcmp.eq.f32.partialorder %v5414_v35, inf }
 0x1a6   :  { %v823_v44 = vmul.f32 0.5, %v822_v7  ;;  %v561_v12 = vpop.f32.mrf.mxu1  ;;  %v1148_v63 = vmul.f32 %v4451_v46, %v1147_v26  ;;  %v5422_v29 = vmax.f32 %v1445_v25, %v1417_v4  ;;  %1809 = vmatpush.msra.mxu3 %v3596_v48  ;;  %vm1167_vm10 = vcmp.eq.f32.partialorder %v5414_v35, 0.0 }
 0x1a7   :  { %v623_v49 = vmul.f32 4e-06, %v561_v12 }
 0x1a8   :  { %v824_v13 = vsub.f32 1.5, %v823_v44  ;;  %v1149_v10 = vmul.f32 0.5, %v1148_v63  ;;  %1476 = vrot.lane.b32.xlu1 %v5422_v29, %s4579_s26  ;;  %1810 = vmatpush.msra.mxu3 %v3595_v8  ;;  %v1144_v63 = vand.u32 2147483648, %v5343_v17 }
 0x1a9   :  { %v4453_v30 = vpop.eup %4452  ;;  %v5430_v38 = vadd.f32 1.0, %v623_v49  ;;  %3495 = vmatmul.msk.f32.gmra.mxu2 %vm5381_vm6, %v5378_v41 }
 0x1aa   :  { %v825_v50 = vmul.f32 %v4449_v61, %v824_v13  ;;  %v831_v23 = vmul.f32 %v4453_v30, %v5399_v20  ;;  %v1150_v56 = vsub.f32 1.5, %v1149_v10  ;;  %1811 = vmatpush.msra.mxu3 %v3592_v43  ;;  %vm837_vm14 = vweird.f32 %v4453_v30 }
 0x1ab   :  { %v4455_v37 = vpop.eup %4454  ;;  %4456 = vrsqrt.f32 %v5430_v38  ;;  %vm838_vm3 = vmor %vm836_vm1, %vm837_vm14  ;;  %vm846_vm9 = vweird.f32 %v5430_v38 }
 0x1ac   :  { %v5437_v57 = vsel %vm828_vm13, %v4449_v61, %v825_v50  ;;  %v832_v18 = vmul.f32 %v4453_v30, %v831_v23  ;;  %v1159_v11 = vmul.f32 %v4455_v37, %v5414_v35  ;;  %v1151_v22 = vmul.f32 %v4451_v46, %v1150_v56  ;;  %1812 = vmatpush.msra.mxu3 %v3591_v47 }
 0x1ad   :  { %4458 = vrsqrt.f32 %v5437_v57  ;;  %3505 = vmatmul.msk.f32.vlgmr.msra.gmra.mxu3 %vm5381_vm6, %v5378_v41  ;;  %v1139_v61 = vmul.f32 %v5367_v3, %v1138_v55  ;;  %v1156_v50 = vand.u32 2147483648, %v5369_v6  ;;  %v1168_v55 = vand.u32 2147483648, %v5414_v35 }
 0x1ae   :  { %v833_v24 = vmul.f32 0.5, %v832_v18  ;;  %v564_v62 = vpop.f32.mrf.mxu1  ;;  %v1160_v28 = vmul.f32 %v4455_v37, %v1159_v11  ;;  %v1152_v25 = vmul.f32 %v1151_v22, %v5369_v6  ;;  %vm1177_vm12 = vcmp.eq.f32.partialorder %v5437_v57, inf }
 0x1af   :  { %v624_v7 = vmul.f32 4e-06, %v564_v62  ;;  %v1140_v3 = vmul.f32 %v1139_v61, %v5343_v17  ;;  %vm1179_vm13 = vcmp.eq.f32.partialorder %v5437_v57, 0.0 }
 0x1b0   :  { %v834_v19 = vsub.f32 1.5, %v833_v24  ;;  %v1161_v26 = vmul.f32 0.5, %v1160_v28  ;;  %v1154_v13 = vsel %vm1153_vm4, %v5369_v6, %v1152_v25 }
 0x1b1   :  { %v4457_v4 = vpop.eup %4456  ;;  %v5448_v46 = vadd.f32 1.0, %v624_v7  ;;  %3497 = vmatmul.msk.f32.gmra.mxu2 %vm5381_vm6, %v5378_v41  ;;  %v1157_v18 = vsel %vm1155_vm5, %v1156_v50, %v1154_v13 }
 0x1b2   :  { %v835_v48 = vmul.f32 %v4453_v30, %v834_v19  ;;  %v841_v44 = vmul.f32 %v4457_v4, %v5430_v38  ;;  %v1162_v49 = vsub.f32 1.5, %v1161_v26  ;;  %vm847_vm8 = vweird.f32 %v4457_v4 }
 0x1b3   :  { %v4459_v12 = vpop.eup %4458  ;;  %4460 = vrsqrt.f32 %v5448_v46  ;;  %vm848_vm11 = vmor %vm846_vm9, %vm847_vm8  ;;  %v1387_v38 = vmul.f32 %v1157_v18, %v5369_v6 }
 0x1b4   :  { %v5458_v8 = vsel %vm838_vm3, %v4453_v30, %v835_v48  ;;  %v842_v27 = vmul.f32 %v4457_v4, %v841_v44  ;;  %v1171_v20 = vmul.f32 %v4459_v12, %v5437_v57  ;;  %v1163_v33 = vmul.f32 %v4455_v37, %v1162_v49 }
 0x1b5   :  { %4462 = vrsqrt.f32 %v5458_v8  ;;  %3507 = vmatmul.msk.f32.gmra.mxu3 %vm5381_vm6, %v5378_v41  ;;  %v1142_v37 = vsel %vm1141_vm15, %v5343_v17, %v1140_v3  ;;  %vm856_vm15 = vweird.f32 %v5448_v46  ;;  %vm1189_vm5 = vcmp.eq.f32.partialorder %v5458_v8, inf }
 0x1b6   :  { %v843_v10 = vmul.f32 0.5, %v842_v27  ;;  %v567_v43 = vpop.f32.mrf.mxu1  ;;  %v1172_v30 = vmul.f32 %v4459_v12, %v1171_v20  ;;  %v1164_v47 = vmul.f32 %v1163_v33, %v5414_v35  ;;  %v1145_v61 = vsel %vm1143_vm2, %v1144_v63, %v1142_v37 }
 0x1b7   :  { %v625_v23 = vmul.f32 4e-06, %v567_v43  ;;  %v1386_v63 = vmul.f32 %v1145_v61, %v5343_v17  ;;  %vm1191_vm8 = vcmp.eq.f32.partialorder %v5458_v8, 0.0 }
 0x1b8   :  { %v844_v56 = vsub.f32 1.5, %v843_v10  ;;  %v1173_v11 = vmul.f32 0.5, %v1172_v30  ;;  %v1166_v62 = vsel %vm1165_vm7, %v5414_v35, %v1164_v47 }
 0x1b9   :  { %v4461_v22 = vpop.eup %4460  ;;  %v5479_v24 = vadd.f32 1.0, %v625_v23  ;;  %v1169_v19 = vsel %vm1167_vm10, %v1168_v55, %v1166_v62  ;;  %3499 = vmatmul.msk.f32.gmra.mxu2 %vm5381_vm6, %v5378_v41 }
 0x1ba   :  { %v845_v28 = vmul.f32 %v4457_v4, %v844_v56  ;;  %v851_v7 = vmul.f32 %v4461_v22, %v5448_v46  ;;  %v1174_v25 = vsub.f32 1.5, %v1173_v11  ;;  %v1388_v27 = vmul.f32 %v1169_v19, %v5414_v35 }
 0x1bb   :  { %v5486_v26 = vpop.eup %4462  ;;  %4464 = vrsqrt.f32 %v5479_v24  ;;  %vm857_vm14 = vweird.f32 %v4461_v22  ;;  %v1180_v35 = vand.u32 2147483648, %v5437_v57  ;;  %vm866_vm3 = vweird.f32 %v5479_v24 }
 0x1bc   :  { %v1183_v48 = vmul.f32 %v5486_v26, %v5458_v8  ;;  %v5492_v44 = vsel %vm848_vm11, %v4457_v4, %v845_v28  ;;  %v852_v3 = vmul.f32 %v4461_v22, %v851_v7  ;;  %v1175_v49 = vmul.f32 %v4459_v12, %v1174_v25  ;;  %vm858_vm1 = vmor %vm856_vm15, %vm857_vm14 }
 0x1bd   :  { %4466 = vrsqrt.f32 %v5492_v44  ;;  %v1419_v4 = vmul.f32 %v1387_v38, %v4928_v45  ;;  %3509 = vmatmul.msk.f32.gmra.mxu3 %vm5381_vm6, %v5378_v41  ;;  %v1418_v45 = vmul.f32 %v1386_v63, %v4918_v39  ;;  %v1420_v30 = vmul.f32 %v1388_v27, %v4937_v51 }
 0x1be   :  { %v853_v20 = vmul.f32 0.5, %v852_v3  ;;  %v570_v13 = vpop.f32.mrf.mxu1  ;;  %v1176_v6 = vmul.f32 %v1175_v49, %v5437_v57  ;;  %v1184_v12 = vmul.f32 %v5486_v26, %v1183_v48  ;;  %vm1201_vm10 = vcmp.eq.f32.partialorder %v5492_v44, inf }
 0x1bf   :  { %v626_v33 = vmul.f32 4e-06, %v570_v13  ;;  %v1447_v18 = vmax.f32 %v1418_v45, %v1419_v4 }
 0x1c0   :  { %v854_v17 = vsub.f32 1.5, %v853_v20  ;;  %v1178_v50 = vsel %vm1177_vm12, %v5437_v57, %v1176_v6  ;;  %v1185_v62 = vmul.f32 0.5, %v1184_v12  ;;  %vm1203_vm12 = vcmp.eq.f32.partialorder %v5492_v44, 0.0 }
 0x1c1   :  { %v4465_v10 = vpop.eup %4464  ;;  %v5509_v43 = vadd.f32 1.0, %v626_v33  ;;  %v1181_v47 = vsel %vm1179_vm13, %v1180_v35, %v1178_v50  ;;  %v1448_v28 = vmax.f32 %v1447_v18, %v1420_v30  ;;  %3501 = vmatmul.msk.f32.gmra.mxu2 %vm5381_vm6, %v5378_v41 }
 0x1c2   :  { %v855_v23 = vmul.f32 %v4461_v22, %v854_v17  ;;  %v861_v37 = vmul.f32 %v4465_v10, %v5479_v24  ;;  %v1389_v56 = vmul.f32 %v1181_v47, %v5437_v57  ;;  %vm867_vm2 = vweird.f32 %v4465_v10 }
 0x1c3   :  { %v4467_v55 = vpop.eup %4466  ;;  %4468 = vrsqrt.f32 %v5509_v43  ;;  %vm868_vm4 = vmor %vm866_vm3, %vm867_vm2  ;;  %vm876_vm9 = vweird.f32 %v5509_v43 }
 0x1c4   :  { %v1195_v11 = vmul.f32 %v4467_v55, %v5492_v44  ;;  %v5521_v39 = vsel %vm858_vm1, %v4461_v22, %v855_v23  ;;  %v862_v51 = vmul.f32 %v4465_v10, %v861_v37  ;;  %v1421_v46 = vmul.f32 %v1389_v56, %v4945_v58 }
 0x1c5   :  { %4470 = vrsqrt.f32 %v5521_v39  ;;  %3511 = vmatmul.msk.f32.gmra.mxu3 %vm5381_vm6, %v5378_v41  ;;  %v1186_v22 = vsub.f32 1.5, %v1185_v62  ;;  %vm1213_vm13 = vcmp.eq.f32.partialorder %v5521_v39, inf  ;;  %vm1215_vm15 = vcmp.eq.f32.partialorder %v5521_v39, 0.0 }
 0x1c6   :  { %v863_v7 = vmul.f32 0.5, %v862_v51  ;;  %v573_v61 = vpop.f32.mrf.mxu1  ;;  %v1196_v19 = vmul.f32 %v4467_v55, %v1195_v11  ;;  %v5525_v38 = vmax.f32 %v1448_v28, %v1421_v46  ;;  %v1204_v11 = vand.u32 2147483648, %v5492_v44 }
 0x1c7   :  { %v627_v25 = vmul.f32 4e-06, %v573_v61  ;;  %v1187_v6 = vmul.f32 %v5486_v26, %v1186_v22  ;;  %v1192_v26 = vand.u32 2147483648, %v5458_v8 }
 0x1c8   :  { %v864_v57 = vsub.f32 1.5, %v863_v7  ;;  %v1197_v48 = vmul.f32 0.5, %v1196_v19  ;;  %1478 = vrot.lane.b32.xlu2 %v5525_v38, %s4579_s26  ;;  %v4238_v7 = vld [vmem:[%s7178_s4 + $0xb8] sm:$0xff]  }
 0x1c9   :  { %v4469_v58 = vpop.eup %4468  ;;  %v5533_v3 = vadd.f32 1.0, %v627_v25  ;;  %v1188_v30 = vmul.f32 %v1187_v6, %v5458_v8  ;;  %v3652_v22 = vunpack.c.h.bf16 %v4238_v7  ;;  %v3651_v6 = vunpack.c.l.bf16 %v4238_v7 }
 0x1ca   :  { %v865_v49 = vmul.f32 %v4465_v10, %v864_v57  ;;  %v871_v63 = vmul.f32 %v4469_v58, %v5509_v43  ;;  %v1198_v20 = vsub.f32 1.5, %v1197_v48  ;;  %vm877_vm7 = vweird.f32 %v4469_v58 }
 0x1cb   :  { %v4471_v27 = vpop.eup %4470  ;;  %4472 = vrsqrt.f32 %v5533_v3  ;;  %vm878_vm11 = vmor %vm876_vm9, %vm877_vm7  ;;  %v1190_v43 = vsel %vm1189_vm5, %v5458_v8, %v1188_v30  ;;  %v1216_v48 = vand.u32 2147483648, %v5521_v39  ;;  %1838 = vmatpush.msrb.mxu2 %v3652_v22  ;;  %vm886_vm1 = vweird.f32 %v5533_v3 }
 0x1cc   :  { %v5540_v13 = vsel %vm868_vm4, %v4465_v10, %v865_v49  ;;  %v872_v33 = vmul.f32 %v4469_v58, %v871_v63  ;;  %v1207_v4 = vmul.f32 %v4471_v27, %v5521_v39  ;;  %v1199_v17 = vmul.f32 %v4467_v55, %v1198_v20 }
 0x1cd   :  { %4474 = vrsqrt.f32 %v5540_v13  ;;  %v1193_v63 = vsel %vm1191_vm8, %v1192_v26, %v1190_v43  ;;  %1839 = vmatpush.msrb.mxu2 %v3651_v6  ;;  %vm1225_vm3 = vcmp.eq.f32.partialorder %v5540_v13, inf  ;;  %vm1227_vm4 = vcmp.eq.f32.partialorder %v5540_v13, 0.0 }
 0x1ce   :  { %v873_v35 = vmul.f32 0.5, %v872_v33  ;;  %v576_v12 = vpop.f32.mrf.mxu1  ;;  %v1208_v24 = vmul.f32 %v4471_v27, %v1207_v4  ;;  %v1200_v47 = vmul.f32 %v1199_v17, %v5492_v44 }
 0x1cf   :  { %v628_v50 = vmul.f32 4e-06, %v576_v12 }
 0x1d0   :  { %v874_v45 = vsub.f32 1.5, %v873_v35  ;;  %v1209_v10 = vmul.f32 0.5, %v1208_v24  ;;  %v1202_v61 = vsel %vm1201_vm10, %v5492_v44, %v1200_v47  ;;  %v4237_v24 = vld [vmem:[%s7178_s4 + $0xb0] sm:$0xff]   ;;  %v1390_v47 = vmul.f32 %v1193_v63, %v5458_v8 }
 0x1d1   :  { %v4473_v23 = vpop.eup %4472  ;;  %v5547_v37 = vadd.f32 1.0, %v628_v50  ;;  %v3647_v7 = vunpack.c.l.bf16 %v4237_v24 }
 0x1d2   :  { %v875_v55 = vmul.f32 %v4469_v58, %v874_v45  ;;  %v881_v56 = vmul.f32 %v4473_v23, %v5533_v3  ;;  %v1210_v51 = vsub.f32 1.5, %v1209_v10  ;;  %vm887_vm14 = vweird.f32 %v4473_v23 }
 0x1d3   :  { %v4475_v18 = vpop.eup %4474  ;;  %4476 = vrsqrt.f32 %v5547_v37  ;;  %vm888_vm2 = vmor %vm886_vm1, %vm887_vm14  ;;  %v1422_v22 = vmul.f32 %v1390_v47, %v4953_v0  ;;  %vm896_vm7 = vweird.f32 %v5547_v37 }
 0x1d4   :  { %v5558_v62 = vsel %vm878_vm11, %v4469_v58, %v875_v55  ;;  %v882_v46 = vmul.f32 %v4473_v23, %v881_v56  ;;  %v1219_v28 = vmul.f32 %v4475_v18, %v5540_v13  ;;  %v1211_v19 = vmul.f32 %v4471_v27, %v1210_v51 }
 0x1d5   :  { %4478 = vrsqrt.f32 %v5558_v62  ;;  %v1205_v27 = vsel %vm1203_vm12, %v1204_v11, %v1202_v61  ;;  %v4236_v61 = vld [vmem:[%s7178_s4 + $0xa8] sm:$0xff]   ;;  %vm1237_vm12 = vcmp.eq.f32.partialorder %v5558_v62, inf  ;;  %vm1239_vm14 = vcmp.eq.f32.partialorder %v5558_v62, 0.0 }
 0x1d6   :  { %v883_v25 = vmul.f32 0.5, %v882_v46  ;;  %v579_v57 = vpop.f32.mrf.mxu1  ;;  %v1220_v58 = vmul.f32 %v4475_v18, %v1219_v28  ;;  %v1212_v20 = vmul.f32 %v1211_v19, %v5521_v39  ;;  %v1391_v55 = vmul.f32 %v1205_v27, %v5492_v44 }
 0x1d7   :  { %v629_v49 = vmul.f32 4e-06, %v579_v57  ;;  %v3648_v46 = vunpack.c.h.bf16 %v4237_v24  ;;  %v3644_v44 = vunpack.c.h.bf16 %v4236_v61 }
 0x1d8   :  { %v884_v33 = vsub.f32 1.5, %v883_v25  ;;  %v1221_v4 = vmul.f32 0.5, %v1220_v58  ;;  %v1214_v12 = vsel %vm1213_vm13, %v5521_v39, %v1212_v20  ;;  %v1228_v25 = vand.u32 2147483648, %v5540_v13 }
 0x1d9   :  { %v4477_v17 = vpop.eup %4476  ;;  %v5576_v35 = vadd.f32 1.0, %v629_v49  ;;  %v1217_v10 = vsel %vm1215_vm15, %v1216_v48, %v1214_v12  ;;  %1840 = vmatpush.msrb.mxu2 %v3648_v46  ;;  %v3643_v48 = vunpack.c.l.bf16 %v4236_v61 }
 0x1da   :  { %v885_v50 = vmul.f32 %v4473_v23, %v884_v33  ;;  %v891_v45 = vmul.f32 %v4477_v17, %v5547_v37  ;;  %v5587_v30 = vpop.permute.xlu0 %1467  ;;  %v1222_v3 = vsub.f32 1.5, %v1221_v4  ;;  %v1392_v51 = vmul.f32 %v1217_v10, %v5521_v39  ;;  %v4235_v33 = vld [vmem:[%s7178_s4 + $0xa0] sm:$0xff]  }
 0x1db   :  { %v5589_v26 = vpop.eup %4478  ;;  %4480 = vrsqrt.f32 %v5576_v35  ;;  %3503 = vmatmul.msk.f32.gmra.mxu2 %vm5381_vm6, %v5587_v30  ;;  %3513 = vmatmul.msk.f32.gmra.mxu3 %vm5381_vm6, %v5587_v30  ;;  %vm897_vm5 = vweird.f32 %v4477_v17  ;;  %v3640_v24 = vunpack.c.h.bf16 %v4235_v33  ;;  %v3639_v10 = vunpack.c.l.bf16 %v4235_v33 }
 0x1dc   :  { %v5601_v56 = vsel %vm888_vm2, %v4473_v23, %v885_v50  ;;  %v892_v11 = vmul.f32 %v4477_v17, %v891_v45  ;;  %v1231_v43 = vmul.f32 %v5589_v26, %v5558_v62  ;;  %v1223_v28 = vmul.f32 %v4475_v18, %v1222_v3  ;;  %1841 = vmatpush.msrb.mxu2 %v3647_v7  ;;  %vm898_vm8 = vmor %vm896_vm7, %vm897_vm5 }
 0x1dd   :  { %4482 = vrsqrt.f32 %v5601_v56  ;;  %v1423_v18 = vmul.f32 %v1391_v55, %v4959_v9  ;;  %v1424_v20 = vmul.f32 %v1392_v51, %v4965_v21  ;;  %v4234_v55 = vld [vmem:[%s7178_s4 + $0x98] sm:$0xff]   ;;  %vm906_vm10 = vweird.f32 %v5576_v35 }
 0x1de   :  { %v893_v8 = vmul.f32 0.5, %v892_v11  ;;  %v582_v19 = vpop.f32.mrf.mxu1  ;;  %v1224_v23 = vmul.f32 %v1223_v28, %v5540_v13  ;;  %v1232_v6 = vmul.f32 %v5589_v26, %v1231_v43  ;;  %1842 = vmatpush.msrb.mxu2 %v3644_v44  ;;  %v3636_v46 = vunpack.c.h.bf16 %v4234_v55  ;;  %v4233_v44 = vld [vmem:[%s7178_s4 + $0x90] sm:$0xff]  }
 0x1df   :  { %v630_v39 = vmul.f32 4e-06, %v582_v19  ;;  %v1450_v12 = vmax.f32 %v1422_v22, %v1423_v18  ;;  %v3635_v61 = vunpack.c.l.bf16 %v4234_v55  ;;  %v3632_v18 = vunpack.c.h.bf16 %v4233_v44 }
 0x1e0   :  { %v894_v57 = vsub.f32 1.5, %v893_v8  ;;  %v1226_v63 = vsel %vm1225_vm3, %v5540_v13, %v1224_v23  ;;  %1843 = vmatpush.msrb.mxu2 %v3643_v48  ;;  %v1233_v11 = vmul.f32 0.5, %v1232_v6  ;;  %vm1249_vm15 = vcmp.eq.f32.partialorder %v5601_v56, inf }
 0x1e1   :  { %v4481_v58 = vpop.eup %4480  ;;  %v5616_v49 = vadd.f32 1.0, %v630_v39  ;;  %v1229_v27 = vsel %vm1227_vm4, %v1228_v25, %v1226_v63  ;;  %v1451_v47 = vmax.f32 %v1450_v12, %v1424_v20  ;;  %v3631_v20 = vunpack.c.l.bf16 %v4233_v44 }
 0x1e2   :  { %v895_v9 = vmul.f32 %v4477_v17, %v894_v57  ;;  %v901_v0 = vmul.f32 %v4481_v58, %v5576_v35  ;;  %v1393_v21 = vmul.f32 %v1229_v27, %v5540_v13  ;;  %1844 = vmatpush.msrb.mxu2 %v3640_v24  ;;  %vm907_vm9 = vweird.f32 %v4481_v58  ;;  %v4232_v35 = vld [vmem:[%s7178_s4 + $0x88] sm:$0xff]  }
 0x1e3   :  { %v4483_v4 = vpop.eup %4482  ;;  %4484 = vrsqrt.f32 %v5616_v49  ;;  %v1234_v39 = vsub.f32 1.5, %v1233_v11  ;;  %vm908_vm11 = vmor %vm906_vm10, %vm907_vm9  ;;  %vm916_vm1 = vweird.f32 %v5616_v49  ;;  %vm1251_vm3 = vcmp.eq.f32.partialorder %v5601_v56, 0.0 }
 0x1e4   :  { %v1243_v50 = vmul.f32 %v4483_v4, %v5601_v56  ;;  %v5632_v45 = vsel %vm898_vm8, %v4477_v17, %v895_v9  ;;  %v902_v37 = vmul.f32 %v4481_v58, %v901_v0  ;;  %v1425_v3 = vmul.f32 %v1393_v21, %v4974_v40  ;;  %1845 = vmatpush.msrb.mxu2 %v3639_v10  ;;  %v4231_v10 = vld [vmem:[%s7178_s4 + $0x80] sm:$0xff]  }
 0x1e5   :  { %4486 = vrsqrt.f32 %v5632_v45  ;;  %v1235_v33 = vmul.f32 %v5589_v26, %v1234_v39  ;;  %v3628_v21 = vunpack.c.h.bf16 %v4232_v35  ;;  %v1252_v39 = vand.u32 2147483648, %v5601_v56 }
 0x1e6   :  { %v903_v13 = vmul.f32 0.5, %v902_v37  ;;  %v585_v51 = vpop.f32.mrf.mxu1  ;;  %v1244_v43 = vmul.f32 %v4483_v4, %v1243_v50  ;;  %v5639_v28 = vmax.f32 %v1451_v47, %v1425_v3  ;;  %1846 = vmatpush.msrb.mxu2 %v3636_v46  ;;  %v3627_v37 = vunpack.c.l.bf16 %v4232_v35 }
 0x1e7   :  { %v631_v17 = vmul.f32 4e-06, %v585_v51  ;;  %v1236_v3 = vmul.f32 %v1235_v33, %v5558_v62  ;;  %v1240_v46 = vand.u32 2147483648, %v5558_v62  ;;  %vm1261_vm4 = vcmp.eq.f32.partialorder %v5632_v45, inf }
 0x1e8   :  { %v904_v7 = vsub.f32 1.5, %v903_v13  ;;  %v1245_v8 = vmul.f32 0.5, %v1244_v43  ;;  %1484 = vrot.lane.b32.xlu2 %v5639_v28, %s4579_s26  ;;  %1847 = vmatpush.msrb.mxu2 %v3635_v61  ;;  %v3624_v13 = vunpack.c.h.bf16 %v4231_v10  ;;  %v1264_v35 = vand.u32 2147483648, %v5632_v45 }
 0x1e9   :  { %v4485_v40 = vpop.eup %4484  ;;  %v5641_v19 = vadd.f32 1.0, %v631_v17  ;;  %v1238_v44 = vsel %vm1237_vm12, %v5558_v62, %v1236_v3  ;;  %vm1263_vm8 = vcmp.eq.f32.partialorder %v5632_v45, 0.0 }
 0x1ea   :  { %v905_v23 = vmul.f32 %v4481_v58, %v904_v7  ;;  %v911_v25 = vmul.f32 %v4485_v40, %v5616_v49  ;;  %v1246_v22 = vsub.f32 1.5, %v1245_v8  ;;  %1848 = vmatpush.msrb.mxu2 %v3632_v18  ;;  %vm917_vm13 = vweird.f32 %v4485_v40 }
 0x1eb   :  { %v4487_v57 = vpop.eup %4486  ;;  %4488 = vrsqrt.f32 %v5641_v19  ;;  %vm918_vm2 = vmor %vm916_vm1, %vm917_vm13  ;;  %v3623_v8 = vunpack.c.l.bf16 %v4231_v10  ;;  %vm926_vm7 = vweird.f32 %v5641_v19 }
 0x1ec   :  { %v5652_v48 = vsel %vm908_vm11, %v4481_v58, %v905_v23  ;;  %v912_v63 = vmul.f32 %v4485_v40, %v911_v25  ;;  %v1247_v6 = vmul.f32 %v4483_v4, %v1246_v22  ;;  %v1255_v9 = vmul.f32 %v4487_v57, %v5632_v45  ;;  %1849 = vmatpush.msrb.mxu2 %v3631_v20 }
 0x1ed   :  { %4490 = vrsqrt.f32 %v5652_v48  ;;  %vm1273_vm10 = vcmp.eq.f32.partialorder %v5652_v48, inf  ;;  %vm1275_vm11 = vcmp.eq.f32.partialorder %v5652_v48, 0.0 }
 0x1ee   :  { %v913_v0 = vmul.f32 0.5, %v912_v63  ;;  %v588_v27 = vpop.f32.mrf.mxu1  ;;  %v1248_v12 = vmul.f32 %v1247_v6, %v5601_v56  ;;  %v1256_v24 = vmul.f32 %v4487_v57, %v1255_v9  ;;  %1850 = vmatpush.msrb.mxu2 %v3628_v21 }
 0x1ef   :  { %v632_v58 = vmul.f32 4e-06, %v588_v27 }
 0x1f0   :  { %v914_v50 = vsub.f32 1.5, %v913_v0  ;;  %v1257_v47 = vmul.f32 0.5, %v1256_v24  ;;  %v1250_v43 = vsel %vm1249_vm15, %v5601_v56, %v1248_v12  ;;  %1851 = vmatpush.msrb.mxu2 %v3627_v37 }
 0x1f1   :  { %v4489_v26 = vpop.eup %4488  ;;  %v5663_v4 = vadd.f32 1.0, %v632_v58  ;;  %v1253_v63 = vsel %vm1251_vm3, %v1252_v39, %v1250_v43 }
 0x1f2   :  { %v915_v55 = vmul.f32 %v4485_v40, %v914_v50  ;;  %v921_v11 = vmul.f32 %v4489_v26, %v5641_v19  ;;  %v1258_v17 = vsub.f32 1.5, %v1257_v47  ;;  %1852 = vmatpush.msrb.mxu2 %v3624_v13  ;;  %vm927_vm5 = vweird.f32 %v4489_v26 }
 0x1f3   :  { %v4491_v51 = vpop.eup %4490  ;;  %4492 = vrsqrt.f32 %v5663_v4  ;;  %v1395_v24 = vmul.f32 %v1253_v63, %v5601_v56  ;;  %vm928_vm9 = vmor %vm926_vm7, %vm927_vm5  ;;  %vm936_vm13 = vweird.f32 %v5663_v4 }
 0x1f4   :  { %v5676_v7 = vsel %vm918_vm2, %v4485_v40, %v915_v55  ;;  %v922_v61 = vmul.f32 %v4489_v26, %v921_v11  ;;  %v1267_v49 = vmul.f32 %v4491_v51, %v5652_v48  ;;  %v1259_v23 = vmul.f32 %v4487_v57, %v1258_v17  ;;  %1853 = vmatpush.msrb.mxu2 %v3623_v8 }
 0x1f5   :  { %4494 = vrsqrt.f32 %v5676_v7  ;;  %v1241_v57 = vsel %vm1239_vm14, %v1240_v46, %v1238_v44  ;;  %vm1285_vm3 = vcmp.eq.f32.partialorder %v5676_v7, inf }
 0x1f6   :  { %v923_v25 = vmul.f32 0.5, %v922_v61  ;;  %v591_v18 = vpop.f32.mrf.mxu1  ;;  %v1268_v40 = vmul.f32 %v4491_v51, %v1267_v49  ;;  %v1260_v20 = vmul.f32 %v1259_v23, %v5632_v45  ;;  %v1394_v19 = vmul.f32 %v1241_v57, %v5558_v62 }
 0x1f7   :  { %v633_v22 = vmul.f32 4e-06, %v591_v18  ;;  %v4245_v18 = vld [vmem:[%s7178_s4 + $0xf0] sm:$0xff]  }
 0x1f8   :  { %v924_v33 = vsub.f32 1.5, %v923_v25  ;;  %v1269_v6 = vmul.f32 0.5, %v1268_v40  ;;  %v1262_v27 = vsel %vm1261_vm4, %v5632_v45, %v1260_v20  ;;  %vm1287_vm4 = vcmp.eq.f32.partialorder %v5676_v7, 0.0 }
 0x1f9   :  { %v4493_v9 = vpop.eup %4492  ;;  %v5691_v0 = vadd.f32 1.0, %v633_v22  ;;  %v1265_v12 = vsel %vm1263_vm8, %v1264_v35, %v1262_v27  ;;  %v3679_v27 = vunpack.c.l.bf16 %v4245_v18 }
 0x1fa   :  { %v925_v21 = vmul.f32 %v4489_v26, %v924_v33  ;;  %v931_v58 = vmul.f32 %v4493_v9, %v5663_v4  ;;  %v1470_v37 = vpop.permute.xlu1 %1469  ;;  %v1270_v10 = vsub.f32 1.5, %v1269_v6  ;;  %v1396_v62 = vmul.f32 %v1265_v12, %v5632_v45 }
 0x1fb   :  { %v5697_v50 = vpop.eup %4494  ;;  %4496 = vrsqrt.f32 %v5691_v0  ;;  %v5707_v11 = vsel %vm115_vm0, %v5100_v59, %v1470_v37  ;;  %v1427_v59 = vmul.f32 %v1395_v24, %v4997_v31  ;;  %vm937_vm12 = vweird.f32 %v4493_v9 }
 0x1fc   :  { %v1279_v3 = vmul.f32 %v5697_v50, %v5676_v7  ;;  %v5703_v47 = vsel %vm928_vm9, %v4489_v26, %v925_v21  ;;  %v932_v55 = vmul.f32 %v4493_v9, %v931_v58  ;;  %1793 = vmatmul.f32.gmra.mxu2 %v5707_v11  ;;  %1828 = vmatmul.f32.gmra.mxu3 %v5707_v11  ;;  %v4246_v26 = vld [vmem:[%s7178_s4 + $0xf8] sm:$0xff]   ;;  %vm938_vm14 = vmor %vm936_vm13, %vm937_vm12  ;;  %vm946_vm1 = vweird.f32 %v5691_v0 }
 0x1fd   :  { %4498 = vrsqrt.f32 %v5703_v47  ;;  %v1271_v56 = vmul.f32 %v4491_v51, %v1270_v10  ;;  %v3684_v43 = vunpack.c.h.bf16 %v4246_v26  ;;  %v1276_v51 = vand.u32 2147483648, %v5652_v48 }
 0x1fe   :  { %v933_v13 = vmul.f32 0.5, %v932_v55  ;;  %v594_v46 = vpop.f32.mrf.mxu1  ;;  %v1280_v8 = vmul.f32 %v5697_v50, %v1279_v3  ;;  %v1426_v45 = vmul.f32 %v1394_v19, %v4984_v5  ;;  %v3683_v44 = vunpack.c.l.bf16 %v4246_v26 }
 0x1ff   :  { %v634_v17 = vmul.f32 4e-06, %v594_v46  ;;  %v1272_v61 = vmul.f32 %v1271_v56, %v5652_v48  ;;  %1879 = vmatpush.msrb.mxu3 %v3684_v43  ;;  %v1428_v25 = vmul.f32 %v1396_v62, %v5011_v53  ;;  %v3680_v53 = vunpack.c.h.bf16 %v4245_v18 }
 0x200   :  { %v934_v49 = vsub.f32 1.5, %v933_v13  ;;  %v1453_v63 = vmax.f32 %v1426_v45, %v1427_v59  ;;  %v1281_v35 = vmul.f32 0.5, %v1280_v8  ;;  %v4243_v13 = vld [vmem:[%s7178_s4 + $0xe0] sm:$0xff]   ;;  %vm1297_vm7 = vcmp.eq.f32.partialorder %v5703_v47, inf }
 0x201   :  { %v4497_v39 = vpop.eup %4496  ;;  %v5724_v23 = vadd.f32 1.0, %v634_v17  ;;  %v1274_v31 = vsel %vm1273_vm10, %v5652_v48, %v1272_v61  ;;  %1880 = vmatpush.msrb.mxu3 %v3683_v44  ;;  %v3672_v43 = vunpack.c.h.bf16 %v4243_v13  ;;  %vm1299_vm9 = vcmp.eq.f32.partialorder %v5703_v47, 0.0 }
 0x202   :  { %v935_v40 = vmul.f32 %v4493_v9, %v934_v49  ;;  %v941_v5 = vmul.f32 %v4497_v39, %v5691_v0  ;;  %v1277_v22 = vsel %vm1275_vm11, %v1276_v51, %v1274_v31  ;;  %v1454_v58 = vmax.f32 %v1453_v63, %v1428_v25  ;;  %v4242_v0 = vld [vmem:[%s7178_s4 + $0xd8] sm:$0xff]  }
 0x203   :  { %v4499_v4 = vpop.eup %4498  ;;  %4500 = vrsqrt.f32 %v5724_v23  ;;  %v1397_v20 = vmul.f32 %v1277_v22, %v5652_v48  ;;  %1881 = vmatpush.msrb.mxu3 %v3680_v53  ;;  %v4244_v48 = vld [vmem:[%s7178_s4 + $0xe8] sm:$0xff]   ;;  %vm947_vm15 = vweird.f32 %v4497_v39  ;;  %v1282_v56 = vsub.f32 1.5, %v1281_v35 }
 0x204   :  { %v1291_v33 = vmul.f32 %v4499_v4, %v5703_v47  ;;  %v5740_v57 = vsel %vm938_vm14, %v4493_v9, %v935_v40  ;;  %v942_v6 = vmul.f32 %v4497_v39, %v941_v5  ;;  %3515 = vmatmul.msk.f32.vlgmr.msrb.gmra.mxu2 %vm5381_vm6, %v5378_v41  ;;  %v3676_v9 = vunpack.c.h.bf16 %v4244_v48  ;;  %vm948_vm2 = vmor %vm946_vm1, %vm947_vm15 }
 0x205   :  { %4502 = vrsqrt.f32 %v5740_v57  ;;  %v1429_v21 = vmul.f32 %v1397_v20, %v5039_v1  ;;  %1882 = vmatpush.msrb.mxu3 %v3679_v27  ;;  %v3675_v55 = vunpack.c.l.bf16 %v4244_v48  ;;  %v3671_v49 = vunpack.c.l.bf16 %v4243_v13 }
 0x206   :  { %v943_v12 = vmul.f32 0.5, %v942_v6  ;;  %v597_v24 = vpop.f32.mrf.mxu1  ;;  %v1292_v37 = vmul.f32 %v4499_v4, %v1291_v33  ;;  %v1283_v45 = vmul.f32 %v5697_v50, %v1282_v56  ;;  %v3668_v18 = vunpack.c.h.bf16 %v4242_v0  ;;  %v4241_v50 = vld [vmem:[%s7178_s4 + $0xd0] sm:$0xff]  }
 0x207   :  { %v635_v10 = vmul.f32 4e-06, %v597_v24  ;;  %v5750_v19 = vmax.f32 %v1454_v58, %v1429_v21  ;;  %1883 = vmatpush.msrb.mxu3 %v3676_v9  ;;  %v3667_v5 = vunpack.c.l.bf16 %v4242_v0  ;;  %v1288_v22 = vand.u32 2147483648, %v5676_v7  ;;  %v4240_v58 = vld [vmem:[%s7178_s4 + $0xc8] sm:$0xff]  }
 0x208   :  { %v944_v3 = vsub.f32 1.5, %v943_v12  ;;  %v1293_v62 = vmul.f32 0.5, %v1292_v37  ;;  %v3664_v33 = vunpack.c.h.bf16 %v4241_v50  ;;  %vm956_vm8 = vweird.f32 %v5724_v23 }
 0x209   :  { %v4501_v1 = vpop.eup %4500  ;;  %v5752_v26 = vadd.f32 1.0, %v635_v10  ;;  %1486 = vrot.lane.b32.xlu0 %v5750_v19, %s4579_s26  ;;  %1884 = vmatpush.msrb.mxu3 %v3675_v55  ;;  %v3663_v12 = vunpack.c.l.bf16 %v4241_v50  ;;  %v1300_v24 = vand.u32 2147483648, %v5703_v47  ;;  %v3660_v55 = vunpack.c.h.bf16 %v4240_v58 }
 0x20a   :  { %v945_v46 = vmul.f32 %v4497_v39, %v944_v3  ;;  %v951_v59 = vmul.f32 %v4501_v1, %v5724_v23  ;;  %v1294_v61 = vsub.f32 1.5, %v1293_v62  ;;  %vm957_vm5 = vweird.f32 %v4501_v1 }
 0x20b   :  { %v5761_v17 = vpop.eup %4502  ;;  %4504 = vrsqrt.f32 %v5752_v26  ;;  %1885 = vmatpush.msrb.mxu3 %v3672_v43  ;;  %vm958_vm10 = vmor %vm956_vm8, %vm957_vm5  ;;  %vm1309_vm11 = vcmp.eq.f32.partialorder %v5740_v57, inf  ;;  %vm1311_vm12 = vcmp.eq.f32.partialorder %v5740_v57, 0.0  ;;  %v3659_v43 = vunpack.c.l.bf16 %v4240_v58 }
 0x20c   :  { %v5765_v51 = vsel %vm948_vm2, %v4497_v39, %v945_v46  ;;  %v952_v8 = vmul.f32 %v4501_v1, %v951_v59  ;;  %3517 = vmatmul.msk.f32.gmra.mxu2 %vm5381_vm6, %v5378_v41  ;;  %v1295_v44 = vmul.f32 %v4499_v4, %v1294_v61  ;;  %v1303_v39 = vmul.f32 %v5761_v17, %v5740_v57 }
 0x20d   :  { %4506 = vrsqrt.f32 %v5765_v51  ;;  %1886 = vmatpush.msrb.mxu3 %v3671_v49  ;;  %v1284_v4 = vmul.f32 %v1283_v45, %v5676_v7  ;;  %v4239_v49 = vld [vmem:[%s7178_s4 + $0xc0] sm:$0xff]   ;;  %vm966_vm14 = vweird.f32 %v5752_v26  ;;  %vm1321_vm1 = vcmp.eq.f32.partialorder %v5765_v51, inf }
 0x20e   :  { %v953_v31 = vmul.f32 0.5, %v952_v8  ;;  %v600_v25 = vpop.f32.mrf.mxu1  ;;  %v1304_v20 = vmul.f32 %v5761_v17, %v1303_v39  ;;  %v1296_v6 = vmul.f32 %v1295_v44, %v5703_v47 }
 0x20f   :  { %v636_v40 = vmul.f32 4e-06, %v600_v25  ;;  %1887 = vmatpush.msrb.mxu3 %v3668_v18  ;;  %v1286_v10 = vsel %vm1285_vm3, %v5676_v7, %v1284_v4  ;;  %vm1323_vm3 = vcmp.eq.f32.partialorder %v5765_v51, 0.0 }
 0x210   :  { %v954_v63 = vsub.f32 1.5, %v953_v31  ;;  %v1305_v9 = vmul.f32 0.5, %v1304_v20  ;;  %v1298_v56 = vsel %vm1297_vm7, %v5703_v47, %v1296_v6  ;;  %v1289_v61 = vsel %vm1287_vm4, %v1288_v22, %v1286_v10 }
 0x211   :  { %v4505_v53 = vpop.eup %4504  ;;  %v5785_v35 = vadd.f32 1.0, %v636_v40  ;;  %1888 = vmatpush.msrb.mxu3 %v3667_v5  ;;  %v1301_v0 = vsel %vm1299_vm9, %v1300_v24, %v1298_v56  ;;  %v3656_v5 = vunpack.c.h.bf16 %v4239_v49  ;;  %v1398_v4 = vmul.f32 %v1289_v61, %v5676_v7 }
 0x212   :  { %v955_v27 = vmul.f32 %v4501_v1, %v954_v63  ;;  %v961_v21 = vmul.f32 %v4505_v53, %v5752_v26  ;;  %v1306_v62 = vsub.f32 1.5, %v1305_v9  ;;  %vm967_vm13 = vweird.f32 %v4505_v53 }
 0x213   :  { %v4507_v48 = vpop.eup %4506  ;;  %4508 = vrsqrt.f32 %v5785_v35  ;;  %1889 = vmatpush.msrb.mxu3 %v3664_v33  ;;  %vm968_vm15 = vmor %vm966_vm14, %vm967_vm13  ;;  %v1399_v20 = vmul.f32 %v1301_v0, %v5703_v47  ;;  %vm976_vm4 = vweird.f32 %v5785_v35 }
 0x214   :  { %v5798_v37 = vsel %vm958_vm10, %v4501_v1, %v955_v27  ;;  %v962_v23 = vmul.f32 %v4505_v53, %v961_v21  ;;  %v1315_v3 = vmul.f32 %v4507_v48, %v5765_v51  ;;  %3519 = vmatmul.msk.f32.gmra.mxu2 %vm5381_vm6, %v5587_v30  ;;  %v1307_v8 = vmul.f32 %v5761_v17, %v1306_v62 }
 0x215   :  { %4510 = vrsqrt.f32 %v5798_v37  ;;  %1890 = vmatpush.msrb.mxu3 %v3663_v12  ;;  %v1312_v17 = vand.u32 2147483648, %v5740_v57  ;;  %v3655_v21 = vunpack.c.l.bf16 %v4239_v49  ;;  %v1431_v24 = vmul.f32 %v1399_v20, %v5098_v2 }
 0x216   :  { %v963_v1 = vmul.f32 0.5, %v962_v23  ;;  %v603_v13 = vpop.f32.mrf.mxu1  ;;  %v1316_v46 = vmul.f32 %v4507_v48, %v1315_v3  ;;  %v1308_v25 = vmul.f32 %v1307_v8, %v5740_v57  ;;  %v1324_v23 = vand.u32 2147483648, %v5765_v51 }
 0x217   :  { %v637_v59 = vmul.f32 4e-06, %v603_v13  ;;  %1891 = vmatpush.msrb.mxu3 %v3660_v55  ;;  %v1430_v3 = vmul.f32 %v1398_v4, %v5070_v36  ;;  %vm1335_vm13 = vcmp.eq.f32.partialorder %v5798_v37, 0.0 }
 0x218   :  { %v964_v45 = vsub.f32 1.5, %v963_v1  ;;  %v1317_v44 = vmul.f32 0.5, %v1316_v46  ;;  %v1310_v26 = vsel %vm1309_vm11, %v5740_v57, %v1308_v25  ;;  %vm1333_vm11 = vcmp.eq.f32.partialorder %v5798_v37, inf }
 0x219   :  { %v4509_v39 = vpop.eup %4508  ;;  %v5822_v31 = vadd.f32 1.0, %v637_v59  ;;  %1892 = vmatpush.msrb.mxu3 %v3659_v43  ;;  %v1313_v7 = vsel %vm1311_vm12, %v1312_v17, %v1310_v26  ;;  %v1456_v59 = vmax.f32 %v1430_v3, %v1431_v24 }
 0x21a   :  { %v965_v18 = vmul.f32 %v4505_v53, %v964_v45  ;;  %v971_v50 = vmul.f32 %v4509_v39, %v5785_v35  ;;  %v1318_v40 = vsub.f32 1.5, %v1317_v44  ;;  %v1477_v63 = vpop.permute.xlu1 %1476  ;;  %v1400_v12 = vmul.f32 %v1313_v7, %v5740_v57 }
 0x21b   :  { %v5827_v22 = vpop.eup %4510  ;;  %4512 = vrsqrt.f32 %v5822_v31  ;;  %v5839_v27 = vsel %vm115_vm0, %v5288_v14, %v1477_v63  ;;  %1893 = vmatpush.msrb.mxu3 %v3656_v5  ;;  %vm977_vm2 = vweird.f32 %v4509_v39  ;;  %vm986_vm8 = vweird.f32 %v5822_v31 }
 0x21c   :  { %v5835_v33 = vsel %vm968_vm15, %v4505_v53, %v965_v18  ;;  %v972_v6 = vmul.f32 %v4509_v39, %v971_v50  ;;  %v1327_v58 = vmul.f32 %v5827_v22, %v5798_v37  ;;  %1831 = vmatmul.f32.gmra.mxu3 %v5839_v27  ;;  %1863 = vmatmul.f32.gmra.mxu2 %v5707_v11  ;;  %vm978_vm5 = vmor %vm976_vm4, %vm977_vm2 }
 0x21d   :  { %4514 = vrsqrt.f32 %v5835_v33  ;;  %v1319_v47 = vmul.f32 %v4507_v48, %v1318_v40  ;;  %1894 = vmatpush.msrb.mxu3 %v3655_v21  ;;  %v1432_v57 = vmul.f32 %v1400_v12, %v5135_v42  ;;  %vm1345_vm10 = vcmp.eq.f32.partialorder %v5835_v33, inf }
 0x21e   :  { %v973_v53 = vmul.f32 0.5, %v972_v6  ;;  %v1328_v55 = vmul.f32 %v5827_v22, %v1327_v58  ;;  %vm1347_vm12 = vcmp.eq.f32.partialorder %v5835_v33, 0.0 }
 0x21f   :  { %v1320_v14 = vmul.f32 %v1319_v47, %v5765_v51  ;;  %v1457_v8 = vmax.f32 %v1456_v59, %v1432_v57  ;;  %v1336_v47 = vand.u32 2147483648, %v5798_v37 }
 0x220   :  { %v974_v9 = vsub.f32 1.5, %v973_v53  ;;  %v1329_v49 = vmul.f32 0.5, %v1328_v55 }
 0x221   :  { %v4513_v10 = vpop.eup %4512  ;;  %v1322_v48 = vsel %vm1321_vm1, %v5765_v51, %v1320_v14 }
 0x222   :  { %v975_v56 = vmul.f32 %v4509_v39, %v974_v9  ;;  %v981_v2 = vmul.f32 %v4513_v10, %v5822_v31  ;;  %v1325_v62 = vsel %vm1323_vm3, %v1324_v23, %v1322_v48  ;;  %v1479_v13 = vpop.permute.xlu2 %1478  ;;  %vm987_vm7 = vweird.f32 %v4513_v10 }
 0x223   :  { %v4515_v1 = vpop.eup %4514  ;;  %v1401_v46 = vmul.f32 %v1325_v62, %v5765_v51  ;;  %v5864_v42 = vsel %vm115_vm0, %v5422_v29, %v1479_v13  ;;  %v1330_v29 = vsub.f32 1.5, %v1329_v49  ;;  %vm988_vm9 = vmor %vm986_vm8, %vm987_vm7 }
 0x224   :  { %v1339_v43 = vmul.f32 %v4515_v1, %v5835_v33  ;;  %v979_v61 = vsel %vm978_vm5, %v4509_v39, %v975_v56  ;;  %v982_v36 = vmul.f32 %v4513_v10, %v981_v2  ;;  %1834 = vmatmul.f32.gmra.mxu3 %v5864_v42  ;;  %1866 = vmatmul.f32.gmra.mxu2 %v5839_v27 }
 0x225   :  { %4516 = vrsqrt.f32 %v979_v61  ;;  %v1433_v35 = vmul.f32 %v1401_v46, %v5180_v34  ;;  %v1331_v5 = vmul.f32 %v5827_v22, %v1330_v29  ;;  %v1348_v22 = vand.u32 2147483648, %v5835_v33  ;;  %v4254_v46 = vld [vmem:[%s7178_s4 + $0x138] sm:$0xff]  }
 0x226   :  { %v983_v45 = vmul.f32 0.5, %v982_v36  ;;  %v1340_v51 = vmul.f32 %v4515_v1, %v1339_v43  ;;  %vm1357_vm14 = vcmp.eq.f32.partialorder %v979_v61, inf  ;;  %v1360_v24 = vand.u32 2147483648, %v979_v61 }
 0x227   :  { %v5869_v0 = vmax.f32 %v1457_v8, %v1433_v35  ;;  %v1332_v31 = vmul.f32 %v1331_v5, %v5798_v37  ;;  %vm1359_vm15 = vcmp.eq.f32.partialorder %v979_v61, 0.0  ;;  %v3716_v43 = vunpack.c.h.bf16 %v4254_v46 }
 0x228   :  { %v984_v44 = vsub.f32 1.5, %v983_v45  ;;  %v1341_v39 = vmul.f32 0.5, %v1340_v51  ;;  %v4261_v51 = vld [vmem:[%s7178_s4 + $0x170] sm:$0xff]  }
 0x229   :  { %1492 = vrot.lane.b32.xlu1 %v5869_v0, %s4579_s26  ;;  %1920 = vmatpush.msra.mxu2 %v3716_v43  ;;  %v2113_v43 = vld [vmem:[%s7180_s6 + $0x68] sm:$0xff] }
 0x22a   :  { %v985_v25 = vmul.f32 %v4513_v10, %v984_v44  ;;  %v1342_v17 = vsub.f32 1.5, %v1341_v39  ;;  %v4252_v39 = vld [vmem:[%s7178_s4 + $0x128] sm:$0xff]  }
 0x22b   :  { %v4517_v18 = vpop.eup %4516 }
 0x22c   :  { %v989_v34 = vsel %vm988_vm9, %v4513_v10, %v985_v25  ;;  %v1343_v50 = vmul.f32 %v4515_v1, %v1342_v17  ;;  %v1351_v40 = vmul.f32 %v4517_v18, %v979_v61  ;;  %1869 = vmatmul.f32.gmra.mxu2 %v5864_v42  ;;  %3521 = vmatmul.msk.f32.vlgmr.msrb.gmra.mxu3 %vm5381_vm6, %v5587_v30 }
 0x22d   :  { %4518 = vrsqrt.f32 %v989_v34  ;;  %v1334_v30 = vsel %vm1333_vm11, %v5798_v37, %v1332_v31  ;;  %vm1369_vm1 = vcmp.eq.f32.partialorder %v989_v34, inf  ;;  %vm1371_vm2 = vcmp.eq.f32.partialorder %v989_v34, 0.0  ;;  %v4249_v31 = vld [vmem:[%s7178_s4 + $0x110] sm:$0xff]  }
 0x22e   :  { %v1352_v63 = vmul.f32 %v4517_v18, %v1351_v40  ;;  %v1344_v26 = vmul.f32 %v1343_v50, %v5835_v33  ;;  %v1337_v9 = vsel %vm1335_vm13, %v1336_v47, %v1334_v30  ;;  %v1372_v1 = vand.u32 2147483648, %v989_v34 }
 0x22f   :  { %v1402_v57 = vmul.f32 %v1337_v9, %v5798_v37  ;;  %v4253_v37 = vld [vmem:[%s7178_s4 + $0x130] sm:$0xff]   ;;  %v3708_v50 = vunpack.c.h.bf16 %v4252_v39  ;;  %v3743_v40 = vunpack.c.l.bf16 %v4261_v51  ;;  %v4259_v9 = vld [vmem:[%s7178_s4 + $0x160] sm:$0xff]  }
 0x230   :  { %v1353_v4 = vmul.f32 0.5, %v1352_v63  ;;  %v1346_v21 = vsel %vm1345_vm10, %v5835_v33, %v1344_v26  ;;  %v3712_v49 = vunpack.c.h.bf16 %v4253_v37  ;;  %v3711_v17 = vunpack.c.l.bf16 %v4253_v37  ;;  %v4250_v63 = vld [vmem:[%s7178_s4 + $0x118] sm:$0xff]   ;;  %v4256_v37 = vld [vmem:[%s7178_s4 + $0x148] sm:$0xff]  }
 0x231   :  { %v1349_v14 = vsel %vm1347_vm12, %v1348_v22, %v1346_v21  ;;  %v1434_v13 = vmul.f32 %v1402_v57, %v5231_v54  ;;  %v3695_v21 = vunpack.c.l.bf16 %v4249_v31 }
 0x232   :  { %v1354_v20 = vsub.f32 1.5, %v1353_v4  ;;  %v1403_v3 = vmul.f32 %v1349_v14, %v5835_v33  ;;  %v4262_v33 = vld [vmem:[%s7178_s4 + $0x178] sm:$0xff]   ;;  %v3700_v4 = vunpack.c.h.bf16 %v4250_v63 }
 0x233   :  { %v4519_v6 = vpop.eup %4518  ;;  %v3748_v35 = vunpack.c.h.bf16 %v4262_v33  ;;  %v3747_v45 = vunpack.c.l.bf16 %v4262_v33 }
 0x234   :  { %v1355_v58 = vmul.f32 %v4517_v18, %v1354_v20  ;;  %v1363_v7 = vmul.f32 %v4519_v6, %v989_v34  ;;  %1898 = vmatmul.f32.gmra.mxu3 %v5707_v11  ;;  %v1435_v62 = vmul.f32 %v1403_v3, %v5282_v15  ;;  %v3744_v18 = vunpack.c.h.bf16 %v4261_v51 }
 0x235   :  { %1961 = vmatpush.msra.mxu3 %v3748_v35  ;;  %v3699_v20 = vunpack.c.l.bf16 %v4250_v63 }
 0x236   :  { %v1356_v53 = vmul.f32 %v1355_v58, %v979_v61  ;;  %v1364_v12 = vmul.f32 %v4519_v6, %v1363_v7  ;;  %v1459_v8 = vmax.f32 %v1434_v13, %v1435_v62  ;;  %v4260_v58 = vld [vmem:[%s7178_s4 + $0x168] sm:$0xff]  }
 0x237   :  { %1962 = vmatpush.msra.mxu3 %v3747_v45  ;;  %v4248_v7 = vld [vmem:[%s7178_s4 + $0x108] sm:$0xff]   ;;  %v3740_v30 = vunpack.c.h.bf16 %v4260_v58 }
 0x238   :  { %v1358_v23 = vsel %vm1357_vm14, %v979_v61, %v1356_v53  ;;  %v1365_v10 = vmul.f32 0.5, %v1364_v12  ;;  %v3692_v22 = vunpack.c.h.bf16 %v4248_v7  ;;  %v3691_v47 = vunpack.c.l.bf16 %v4248_v7  ;;  %v4247_v12 = vld [vmem:[%s7178_s4 + $0x100] sm:$0xff]  }
 0x239   :  { %v1361_v11 = vsel %vm1359_vm15, %v1360_v24, %v1358_v23  ;;  %1963 = vmatpush.msra.mxu3 %v3744_v18  ;;  %v3739_v53 = vunpack.c.l.bf16 %v4260_v58  ;;  %v3688_v14 = vunpack.c.h.bf16 %v4247_v12  ;;  %v3687_v24 = vunpack.c.l.bf16 %v4247_v12  ;;  %v2115_v23 = vld [vmem:[%s7180_s6 + $0x78] sm:$0xff]  ;;  %v4267_v18 = vld [vmem:[%s7178_s4 + $0x1a0] sm:$0xff]  }
 0x23a   :  { %v1366_v48 = vsub.f32 1.5, %v1365_v10  ;;  %v1404_v56 = vmul.f32 %v1361_v11, %v979_v61  ;;  %v3715_v61 = vunpack.c.l.bf16 %v4254_v46  ;;  %v3736_v10 = vunpack.c.h.bf16 %v4259_v9  ;;  %2116 = vmatpush.msrb.mxu0 %v2115_v23 }
 0x23b   :  { %1964 = vmatpush.msra.mxu3 %v3743_v40  ;;  %v3735_v11 = vunpack.c.l.bf16 %v4259_v9  ;;  %v3767_v40 = vunpack.c.l.bf16 %v4267_v18 }
 0x23c   :  { %v1367_v55 = vmul.f32 %v4519_v6, %v1366_v48  ;;  %1901 = vmatmul.f32.gmra.mxu3 %v5839_v27  ;;  %v1436_v15 = vmul.f32 %v1404_v56, %v5301_v32  ;;  %1921 = vmatpush.msra.mxu2 %v3715_v61  ;;  %v3696_v6 = vunpack.c.h.bf16 %v4249_v31  ;;  %v4258_v48 = vld [vmem:[%s7178_s4 + $0x158] sm:$0xff]   ;;  %v4257_v56 = vld [vmem:[%s7178_s4 + $0x150] sm:$0xff]  }
 0x23d   :  { %1965 = vmatpush.msra.mxu3 %v3740_v30  ;;  %v3732_v3 = vunpack.c.h.bf16 %v4258_v48  ;;  %v3731_v57 = vunpack.c.l.bf16 %v4258_v48  ;;  %v3728_v62 = vunpack.c.h.bf16 %v4257_v56  ;;  %v4270_v61 = vld [vmem:[%s7178_s4 + $0x1b8] sm:$0xff]   ;;  %v4273_v30 = vld [vmem:[%s7178_s4 + $0x1d0] sm:$0xff]  }
 0x23e   :  { %v1368_v2 = vmul.f32 %v1367_v55, %v989_v34  ;;  %v1460_v25 = vmax.f32 %v1459_v8, %v1436_v15  ;;  %1922 = vmatpush.msra.mxu2 %v3712_v49  ;;  %v5950_v55 = vpop.f32.mrf.mxu2  ;;  %v3723_v15 = vunpack.c.l.bf16 %v4256_v37  ;;  %v3780_v35 = vunpack.c.h.bf16 %v4270_v61  ;;  %v4269_v49 = vld [vmem:[%s7178_s4 + $0x1b0] sm:$0xff]  }
 0x23f   :  { %1966 = vmatpush.msra.mxu3 %v3739_v53  ;;  %v3776_v45 = vunpack.c.h.bf16 %v4269_v49  ;;  %v3775_v51 = vunpack.c.l.bf16 %v4269_v49 }
 0x240   :  { %v1370_v59 = vsel %vm1369_vm1, %v989_v34, %v1368_v2  ;;  %1923 = vmatpush.msra.mxu2 %v3711_v17  ;;  %v2114_v2 = vld [vmem:[%s7180_s6 + $0x70] sm:$0xff] }
 0x241   :  { %v1373_v36 = vsel %vm1371_vm2, %v1372_v1, %v1370_v59  ;;  %1967 = vmatpush.msra.mxu3 %v3736_v10  ;;  %2117 = vmatpush.msrb.mxu0 %v2114_v2  ;;  %v3727_v1 = vunpack.c.l.bf16 %v4257_v56  ;;  %v3724_v59 = vunpack.c.h.bf16 %v4256_v37 }
 0x242   :  { %v1405_v54 = vmul.f32 %v1373_v36, %v989_v34  ;;  %v1485_v44 = vpop.permute.xlu2 %1484  ;;  %1924 = vmatpush.msra.mxu2 %v3708_v50 }
 0x243   :  { %v5913_v32 = vsel %vm115_vm0, %v5525_v38, %v1485_v44  ;;  %v4251_v38 = vld [vmem:[%s7178_s4 + $0x120] sm:$0xff]   ;;  %1968 = vmatpush.msra.mxu3 %v3735_v11  ;;  %2118 = vmatpush.msrb.mxu0 %v2113_v43  ;;  %v4274_v44 = vld [vmem:[%s7178_s4 + $0x1d8] sm:$0xff]   ;;  %v3791_v11 = vunpack.c.l.bf16 %v4273_v30 }
 0x244   :  { %v1437_v29 = vmul.f32 %v1405_v54, %v5319_v16  ;;  %1872 = vmatmul.f32.gmra.mxu2 %v5913_v32  ;;  %1904 = vmatmul.f32.gmra.mxu3 %v5864_v42  ;;  %v3707_v16 = vunpack.c.l.bf16 %v4252_v39  ;;  %v3704_v5 = vunpack.c.h.bf16 %v4251_v38  ;;  %v3703_v26 = vunpack.c.l.bf16 %v4251_v38  ;;  %v4268_v39 = vld [vmem:[%s7178_s4 + $0x1a8] sm:$0xff]  }
 0x245   :  { %1969 = vmatpush.msra.mxu3 %v3732_v3  ;;  %v3771_v17 = vunpack.c.l.bf16 %v4268_v39  ;;  %v3768_v38 = vunpack.c.h.bf16 %v4267_v18 }
 0x246   :  { %v5918_v34 = vmax.f32 %v1460_v25, %v1437_v29  ;;  %1925 = vmatpush.msra.mxu2 %v3707_v16  ;;  %v5967_v33 = vpop.f32.mrf.mxu2  ;;  %v3796_v29 = vunpack.c.h.bf16 %v4274_v44  ;;  %v3772_v25 = vunpack.c.h.bf16 %v4268_v39  ;;  %v3795_v16 = vunpack.c.l.bf16 %v4274_v44 }
 0x247   :  { %1970 = vmatpush.msra.mxu3 %v3731_v57  ;;  %v4272_v57 = vld [vmem:[%s7178_s4 + $0x1c8] sm:$0xff]  }
 0x248   :  { %1494 = vrot.lane.b32.xlu2 %v5918_v34, %s4579_s26  ;;  %1926 = vmatpush.msra.mxu2 %v3704_v5  ;;  %v4266_v5 = vld [vmem:[%s7178_s4 + $0x198] sm:$0xff]  }
 0x249   :  { %1971 = vmatpush.msra.mxu3 %v3728_v62  ;;  %v3764_v63 = vunpack.c.h.bf16 %v4266_v5  ;;  %v2110_v62 = vld [vmem:[%s7180_s6 + $0x50] sm:$0xff] }
 0x24a   :  { %1927 = vmatpush.msra.mxu2 %v3703_v26  ;;  %v3763_v26 = vunpack.c.l.bf16 %v4266_v5  ;;  %v2104_v5 = vld [vmem:[%s7180_s6 + $0x20] sm:$0xff] }
 0x24b   :  { %1972 = vmatpush.msra.mxu3 %v3727_v1  ;;  %v1507_v1 = vsel %vm115_vm0, %v5918_v34, %v5378_v41 }
 0x24c   :  { %1907 = vmatmul.f32.gmra.mxu3 %v5913_v32  ;;  %1928 = vmatpush.msra.mxu2 %v3700_v4  ;;  %v4265_v4 = vld [vmem:[%s7178_s4 + $0x190] sm:$0xff]  }
 0x24d   :  { %1973 = vmatpush.msra.mxu3 %v3724_v59  ;;  %v3760_v31 = vunpack.c.h.bf16 %v4265_v4  ;;  %v3759_v7 = vunpack.c.l.bf16 %v4265_v4  ;;  %v4271_v59 = vld [vmem:[%s7178_s4 + $0x1c0] sm:$0xff]   ;;  %v2103_v4 = vld [vmem:[%s7180_s6 + $0x18] sm:$0xff] }
 0x24e   :  { %1929 = vmatpush.msra.mxu2 %v3699_v20  ;;  %v5979_v54 = vpop.f32.mrf.mxu2 }
 0x24f   :  { %1974 = vmatpush.msra.mxu3 %v3723_v15  ;;  %v2109_v15 = vld [vmem:[%s7180_s6 + $0x48] sm:$0xff] }
 0x250   :  { %1930 = vmatpush.msra.mxu2 %v3696_v6  ;;  %v6006_v6 = vpop.f32.mrf.mxu3 }
 0x252   :  { %1931 = vmatpush.msra.mxu2 %v3695_v21 }
 0x254   :  { %1932 = vmatpush.msra.mxu2 %v3692_v22  ;;  %v4264_v22 = vld [vmem:[%s7178_s4 + $0x188] sm:$0xff]  }
 0x255   :  { %v3756_v53 = vunpack.c.h.bf16 %v4264_v22  ;;  %v3755_v12 = vunpack.c.l.bf16 %v4264_v22 }
 0x256   :  { %1933 = vmatpush.msra.mxu2 %v3691_v47  ;;  %v5997_v50 = vpop.f32.mrf.mxu2  ;;  %v3792_v47 = vunpack.c.h.bf16 %v4273_v30 }
 0x258   :  { %1934 = vmatpush.msra.mxu2 %v3688_v14  ;;  %v2111_v14 = vld [vmem:[%s7180_s6 + $0x58] sm:$0xff]  ;;  %v6027_v48 = vpop.f32.mrf.mxu3 }
 0x25a   :  { %1935 = vmatpush.msra.mxu2 %v3687_v24 }
 0x25c   :  { %2002 = vmatpush.msrb.mxu2 %v3780_v35 }
 0x25e   :  { %v6008_v21 = vpop.f32.mrf.mxu2 }
 0x260   :  { %v6035_v56 = vpop.f32.mrf.mxu3 }
 0x266   :  { %v6029_v3 = vpop.f32.mrf.mxu2 }
 0x268   :  { %v6048_v37 = vpop.f32.mrf.mxu3 }
 0x26e   :  { %v6037_v2 = vpop.f32.mrf.mxu2 }
 0x270   :  { %v6061_v43 = vpop.f32.mrf.mxu3 }
 0x27b   :  { %v1487_v13 = vpop.permute.xlu0 %1486 }
 0x27c   :  { %v5960_v46 = vsel %vm115_vm0, %v5639_v28, %v1487_v13  ;;  %v4255_v28 = vld [vmem:[%s7178_s4 + $0x140] sm:$0xff]  }
 0x27d   :  { %1875 = vmatmul.f32.gmra.mxu2 %v5960_v46  ;;  %1910 = vmatmul.f32.gmra.mxu3 %v5960_v46  ;;  %v3720_v36 = vunpack.c.h.bf16 %v4255_v28  ;;  %v3719_v8 = vunpack.c.l.bf16 %v4255_v28 }
 0x27f   :  { %1975 = vmatpush.msra.mxu3 %v3720_v36  ;;  %v6046_v13 = vpop.f32.mrf.mxu2  ;;  %v6063_v36 = vpop.f32.mrf.mxu3 }
 0x281   :  { %1976 = vmatpush.msra.mxu3 %v3719_v8 }
 0x283   :  { %2051 = vmatpush.msrb.mxu3 %v3796_v29 }
 0x285   :  { %1936 = vmatmul.f32.vlgmr.msra.gmra.mxu2 %v5839_v27  ;;  %v3779_v27 = vunpack.c.l.bf16 %v4270_v61  ;;  %2052 = vmatpush.msrb.mxu3 %v3795_v16  ;;  %v3783_v61 = vunpack.c.l.bf16 %v4271_v59 }
 0x287   :  { %2003 = vmatpush.msrb.mxu2 %v3779_v27  ;;  %2053 = vmatpush.msrb.mxu3 %v3792_v47  ;;  %v6059_v28 = vpop.f32.mrf.mxu2  ;;  %v2108_v27 = vld [vmem:[%s7180_s6 + $0x40] sm:$0xff] }
 0x289   :  { %2004 = vmatpush.msrb.mxu2 %v3776_v45  ;;  %2054 = vmatpush.msrb.mxu3 %v3791_v11  ;;  %v2107_v45 = vld [vmem:[%s7180_s6 + $0x38] sm:$0xff] }
 0x28b   :  { %2005 = vmatpush.msrb.mxu2 %v3775_v51 }
 0x28d   :  { %1939 = vmatmul.f32.gmra.mxu2 %v5864_v42  ;;  %v2112_v42 = vld [vmem:[%s7180_s6 + $0x60] sm:$0xff] }
 0x28e   :  { %2006 = vmatpush.msrb.mxu2 %v3772_v25  ;;  %2119 = vmatpush.msrb.mxu0 %v2112_v42  ;;  %v2106_v25 = vld [vmem:[%s7180_s6 + $0x30] sm:$0xff] }
 0x28f   :  { %v6065_v35 = vpop.f32.mrf.mxu2 }
 0x290   :  { %2007 = vmatpush.msrb.mxu2 %v3771_v17  ;;  %2120 = vmatpush.msrb.mxu0 %v2111_v14 }
 0x292   :  { %2008 = vmatpush.msrb.mxu2 %v3768_v38  ;;  %2121 = vmatpush.msrb.mxu0 %v2110_v62  ;;  %v6184_v62 = vld [vmem:[%s7181_s7 + $0x70] sm:$0xff] }
 0x293   :  { %7217 = vst [vmem:[#allocation6_spill] sm:$0xff] %v6184_v62 }
 0x294   :  { %2009 = vmatpush.msrb.mxu2 %v3767_v40  ;;  %2122 = vmatpush.msrb.mxu0 %v2109_v15 }
 0x295   :  { %1942 = vmatmul.f32.gmra.mxu2 %v5913_v32 }
 0x296   :  { %2010 = vmatpush.msrb.mxu2 %v3764_v63  ;;  %2123 = vmatpush.msrb.mxu0 %v2108_v27 }
 0x297   :  { %v6075_v49 = vpop.f32.mrf.mxu2 }
 0x298   :  { %2011 = vmatpush.msrb.mxu2 %v3763_v26  ;;  %2124 = vmatpush.msrb.mxu0 %v2107_v45 }
 0x29a   :  { %2012 = vmatpush.msrb.mxu2 %v3760_v31  ;;  %2125 = vmatpush.msrb.mxu0 %v2106_v25  ;;  %v6203_v25 = vld [vmem:[%s7181_s7 + $0x68] sm:$0xff] }
 0x29b   :  { %v1493_v20 = vpop.permute.xlu1 %1492  ;;  %7218 = vst [vmem:[#allocation7_spill] sm:$0xff] %v6203_v25 }
 0x29c   :  { %v1505_v58 = vsel %vm115_vm0, %v5750_v19, %v1493_v20  ;;  %2013 = vmatpush.msrb.mxu2 %v3759_v7  ;;  %v4263_v19 = vld [vmem:[%s7178_s4 + $0x180] sm:$0xff]   ;;  %v2102_v7 = vld [vmem:[%s7180_s6 + $0x10] sm:$0xff] }
 0x29d   :  { %1913 = vmatmul.f32.gmra.mxu3 %v1505_v58  ;;  %1945 = vmatmul.f32.gmra.mxu2 %v5960_v46  ;;  %v3752_v9 = vunpack.c.h.bf16 %v4263_v19  ;;  %v3751_v10 = vunpack.c.l.bf16 %v4263_v19 }
 0x29e   :  { %2014 = vmatpush.msrb.mxu2 %v3756_v53 }
 0x29f   :  { %v6070_v8 = vpop.f32.mrf.mxu3  ;;  %v6088_v44 = vpop.f32.mrf.mxu2 }
 0x2a0   :  { %2015 = vmatpush.msrb.mxu2 %v3755_v12  ;;  %v2101_v12 = vld [vmem:[%s7180_s6 + $0x8] sm:$0xff] }
 0x2a2   :  { %v1495_v24 = vpop.permute.xlu2 %1494  ;;  %2016 = vmatpush.msrb.mxu2 %v3752_v9 }
 0x2a3   :  { %v1506_v23 = vsel %vm115_vm0, %v5869_v0, %v1495_v24  ;;  %v3788_v0 = vunpack.c.h.bf16 %v4272_v57  ;;  %v6167_v24 = vld [vmem:[%s7181_s7 + $0x78] sm:$0xff] }
 0x2a4   :  { %2017 = vmatpush.msrb.mxu2 %v3751_v10  ;;  %v2449_v9 = vunpack.c.l.bf16 %v6167_v24  ;;  %v2100_v10 = vld [vmem:[%s7180_s6] sm:$0xff] }
 0x2a5   :  { %1916 = vmatmul.f32.gmra.mxu3 %v1506_v23  ;;  %1948 = vmatmul.f32.gmra.mxu2 %v1505_v58 }
 0x2a6   :  { %2055 = vmatpush.msrb.mxu3 %v3788_v0  ;;  %2521 = vmatpush.msra.mxu1 %v2449_v9 }
 0x2a7   :  { %v6086_v51 = vpop.f32.mrf.mxu3  ;;  %v6098_v29 = vpop.f32.mrf.mxu2 }
 0x2ad   :  { %1951 = vmatmul.f32.gmra.mxu2 %v1506_v23  ;;  %1977 = vmatmul.f32.vlgmr.msra.gmra.mxu3 %v5913_v32  ;;  %v3787_v32 = vunpack.c.l.bf16 %v4272_v57 }
 0x2af   :  { %2056 = vmatpush.msrb.mxu3 %v3787_v32  ;;  %v6096_v39 = vpop.f32.mrf.mxu3  ;;  %v6110_v18 = vpop.f32.mrf.mxu2 }
 0x2b5   :  { %1954 = vmatmul.f32.gmra.mxu2 %v1507_v1  ;;  %1980 = vmatmul.f32.gmra.mxu3 %v5960_v46  ;;  %v3784_v46 = vunpack.c.h.bf16 %v4271_v59  ;;  %v6192_v59 = vld [vmem:[%s7179_s5] ss:$0 sm:$0xff]  ;;  %s4580_s5 = smov [#allocation3]  }
 0x2b6   :  { %v1774_v15 = vadd.f32 %v6192_v59, %v5950_v55  ;;  %v1780_v9 = vadd.f32 %v6192_v59, %v5979_v54  ;;  %v6224_v54 = vld [vmem:[%s7181_s7 + $0x60] sm:$0xff]  ;;  %s3415_s29 = sshll.u32 %s4580_s5, 4  ;;  %s3416_s29 = int_to_ptr.vmem [resolvable:$true] %s3415_s29 }
 0x2b7   :  { %2057 = vmatpush.msrb.mxu3 %v3784_v46  ;;  %v6108_v17 = vpop.f32.mrf.mxu3 }
 0x2b8   :  { %v1815_v27 = vadd.f32 %v6006_v6, %v1774_v15 }
 0x2b9   :  { %2058 = vmatpush.msrb.mxu3 %v3783_v61 }
 0x2ba   :  { %v1856_v45 = vadd.f32 %v6059_v28, %v1815_v27 }
 0x2bc   :  { %v1897_v55 = vadd.f32 %v6096_v39, %v1856_v45 }
 0x2bd   :  { %3523 = vmatmul.msk.f32.gmra.mxu2 %vm5381_vm6, %v5378_v41  ;;  %1983 = vmatmul.f32.gmra.mxu3 %v1505_v58 }
 0x2bf   :  { %v6116_v42 = vpop.f32.mrf.mxu3 }
 0x2c5   :  { %1986 = vmatmul.f32.gmra.mxu3 %v1506_v23  ;;  %2018 = vmatmul.f32.vlgmr.msrb.gmra.mxu2 %v1505_v58 }
 0x2c7   :  { %v6118_v38 = vpop.f32.mrf.mxu2  ;;  %v6130_v16 = vpop.f32.mrf.mxu3 }
 0x2cd   :  { %1989 = vmatmul.f32.gmra.mxu3 %v1507_v1  ;;  %2021 = vmatmul.f32.gmra.mxu2 %v1506_v23 }
 0x2cf   :  { %v6136_v52 = vpop.f32.mrf.mxu3 }
 0x2d5   :  { %3525 = vmatmul.msk.f32.gmra.mxu3 %vm5381_vm6, %v5378_v41  ;;  %2024 = vmatmul.f32.gmra.mxu2 %v1507_v1  ;;  %v2447_v1 = vunpack.c.l.bf16 %v6184_v62 }
 0x2d7   :  { %2522 = vmatpush.msra.mxu1 %v2447_v1 }
 0x2dd   :  { %3527 = vmatmul.msk.f32.gmra.mxu3 %vm5381_vm6, %v5378_v41  ;;  %3531 = vmatmul.msk.f32.gmra.mxu2 %vm5381_vm6, %v5378_v41 }
 0x2e5   :  { %3529 = vmatmul.msk.f32.gmra.mxu3 %vm5381_vm6, %v5378_v41  ;;  %3533 = vmatmul.msk.f32.gmra.mxu2 %vm5381_vm6, %v5378_v41 }
 0x2ed   :  { %3535 = vmatmul.msk.f32.gmra.mxu2 %vm5381_vm6, %v5378_v41  ;;  %3540 = vmatmul.msk.f32.vlgmr.msrb.gmra.mxu3 %vm115_vm0, %v5918_v34  ;;  %v2105_v34 = vld [vmem:[%s7180_s6 + $0x28] sm:$0xff] }
 0x2ee   :  { %2126 = vmatpush.msrb.mxu0 %v2105_v34  ;;  %v2445_v34 = vunpack.c.l.bf16 %v6203_v25  ;;  %v1821_v25 = vadd.f32 %v6035_v56, %v1780_v9 }
 0x2f0   :  { %2127 = vmatpush.msrb.mxu0 %v2104_v5  ;;  %v1777_v5 = vadd.f32 %v6192_v59, %v5967_v33  ;;  %2523 = vmatpush.msra.mxu1 %v2445_v34 }
 0x2f2   :  { %2128 = vmatpush.msrb.mxu0 %v2103_v4  ;;  %v1818_v6 = vadd.f32 %v6027_v48, %v1777_v5 }
 0x2f4   :  { %2129 = vmatpush.msrb.mxu0 %v2102_v7 }
 0x2f5   :  { %3537 = vmatmul.msk.f32.gmra.mxu2 %vm5381_vm6, %v5378_v41  ;;  %2062 = vmatmul.f32.gmra.mxu3 %v7197_v60 }
 0x2f6   :  { %2130 = vmatpush.msrb.mxu0 %v2101_v12 }
 0x2f8   :  { %2131 = vmatpush.msrb.mxu0 %v2100_v10  ;;  %v1859_v10 = vadd.f32 %v6065_v35, %v1818_v6  ;;  %v2443_v35 = vunpack.c.l.bf16 %v6224_v54 }
 0x2fa   :  { %v1900_v27 = vadd.f32 %v6108_v17, %v1859_v10  ;;  %v1783_v17 = vadd.f32 %v6192_v59, %v5997_v50  ;;  %2524 = vmatpush.msra.mxu1 %v2443_v35 }
 0x2fd   :  { %3539 = vmatmul.msk.f32.gmra.mxu2 %vm5381_vm6, %v5378_v41  ;;  %2065 = vmatmul.f32.gmra.mxu3 %v7197_v60 }
 0x300   :  { %v6127_v40 = vpop.f32.mrf.mxu2  ;;  %v6139_v63 = vpop.f32.mrf.mxu3 }
 0x305   :  { %2068 = vmatmul.f32.gmra.mxu3 %v7197_v60 }
 0x308   :  { %v1937_v41 = vpop.f32.mrf.mxu2 }
 0x309   :  { %v1938_v12 = vadd.f32 %v1937_v41, %v1897_v55  ;;  %v1862_v41 = vadd.f32 %v6075_v49, %v1821_v25 }
 0x30d   :  { %2071 = vmatmul.f32.gmra.mxu3 %v7197_v60 }
 0x310   :  { %v1940_v26 = vpop.f32.mrf.mxu2 }
 0x311   :  { %v1941_v34 = vadd.f32 %v1940_v26, %v1900_v27 }
 0x315   :  { %2074 = vmatmul.f32.gmra.mxu3 %v7197_v60 }
 0x318   :  { %v6147_v20 = vpop.f32.mrf.mxu2 }
 0x31d   :  { %2077 = vmatmul.f32.gmra.mxu3 %v7197_v60 }
 0x320   :  { %v6145_v31 = vpop.f32.mrf.mxu3  ;;  %v6155_v30 = vpop.f32.mrf.mxu2 }
 0x325   :  { %2080 = vmatmul.f32.gmra.mxu3 %v7197_v60 }
 0x328   :  { %v6150_v58 = vpop.f32.mrf.mxu3  ;;  %v6157_v47 = vpop.f32.mrf.mxu2 }
 0x330   :  { %v1978_v22 = vpop.f32.mrf.mxu3  ;;  %v6162_v19 = vpop.f32.mrf.mxu2 }
 0x331   :  { %v1979_v28 = vadd.f32 %v1978_v22, %v1938_v12  ;;  %v1903_v22 = vadd.f32 %v6116_v42, %v1862_v41  ;;  %v1786_v42 = vadd.f32 %v6192_v59, %v6008_v21 }
 0x333   :  { %v1944_v45 = vadd.f32 %v6147_v20, %v1903_v22 }
 0x338   :  { %v1981_v53 = vpop.f32.mrf.mxu3  ;;  %v6175_v11 = vpop.f32.mrf.mxu2 }
 0x339   :  { %v1982_v39 = vadd.f32 %v1981_v53, %v1941_v34 }
 0x340   :  { %v1984_v14 = vpop.f32.mrf.mxu3  ;;  %v6179_v0 = vpop.f32.mrf.mxu2 }
 0x341   :  { %v1985_v6 = vadd.f32 %v1984_v14, %v1944_v45  ;;  %v1827_v14 = vadd.f32 %v6061_v43, %v1786_v42  ;;  %v1789_v43 = vadd.f32 %v6192_v59, %v6029_v3  ;;  %v6269_v3 = vld [vmem:[%s7181_s7 + $0x50] sm:$0xff] }
 0x343   :  { %v1868_v10 = vadd.f32 %v6098_v29, %v1827_v14  ;;  %v1830_v34 = vadd.f32 %v6063_v36, %v1789_v43  ;;  %v6279_v36 = vld [vmem:[%s7181_s7 + $0x40] sm:$0xff] }
 0x344   :  { %v2435_v22 = vunpack.c.l.bf16 %v6279_v36 }
 0x348   :  { %v6170_v23 = vpop.f32.mrf.mxu3  ;;  %v2019_v46 = vpop.f32.mrf.mxu2 }
 0x349   :  { %v2020_v1 = vadd.f32 %v2019_v46, %v1979_v28  ;;  %v1824_v46 = vadd.f32 %v6048_v37, %v1783_v17 }
 0x34b   :  { %v1865_v49 = vadd.f32 %v6088_v44, %v1824_v46 }
 0x34d   :  { %v1906_v12 = vadd.f32 %v6130_v16, %v1865_v49 }
 0x34f   :  { %v1947_v20 = vadd.f32 %v6155_v30, %v1906_v12 }
 0x350   :  { %v6177_v57 = vpop.f32.mrf.mxu3  ;;  %v2022_v4 = vpop.f32.mrf.mxu2 }
 0x351   :  { %v2023_v56 = vadd.f32 %v2022_v4, %v1982_v39  ;;  %v1988_v9 = vadd.f32 %v6170_v23, %v1947_v20  ;;  %v1909_v23 = vadd.f32 %v6136_v52, %v1868_v10  ;;  %v6274_v52 = vld [vmem:[%s7181_s7 + $0x48] sm:$0xff] }
 0x352   :  { %v2437_v17 = vunpack.c.l.bf16 %v6274_v52 }
 0x353   :  { %v1950_v27 = vadd.f32 %v6157_v47, %v1909_v23 }
 0x355   :  { %v1991_v39 = vadd.f32 %v6177_v57, %v1950_v27 }
 0x358   :  { %v6187_v32 = vpop.f32.mrf.mxu3  ;;  %v2025_v60 = vpop.f32.mrf.mxu2 }
 0x359   :  { %v2026_v25 = vadd.f32 %v2025_v60, %v1985_v6  ;;  %v6251_v60 = vld [vmem:[%s7181_s7 + $0x58] sm:$0xff] }
 0x35a   :  { %v2441_v16 = vunpack.c.l.bf16 %v6251_v60 }
 0x35c   :  { %2525 = vmatpush.msra.mxu1 %v2441_v16 }
 0x360   :  { %v6196_v61 = vpop.f32.mrf.mxu3  ;;  %v2028_v55 = vpop.f32.mrf.mxu2 }
 0x361   :  { %v2029_v30 = vadd.f32 %v2028_v55, %v1988_v9 }
 0x368   :  { %v6208_v7 = vpop.f32.mrf.mxu3  ;;  %v2031_v21 = vpop.f32.mrf.mxu2 }
 0x369   :  { %v2032_v35 = vadd.f32 %v2031_v21, %v1991_v39 }
 0x370   :  { %v2060_v15 = vpop.f32.mrf.mxu3  ;;  %v2034_v47 = vpop.f32.mrf.mxu2 }
 0x371   :  { %v2061_v33 = vadd.f32 %v2060_v15, %v2020_v1 }
 0x373   :  { %v6217_v62 = vmax.f32 %v2061_v33, 0.0 }
 0x375   :  { %v2092_v48 = vmul.f32 %v6217_v62, %v6217_v62 }
 0x377   :  { %2132 = vmatmul.f32.vlgmr.msrb.gmra.mxu0 %v2092_v48  ;;  %v1871_v48 = vadd.f32 %v6110_v18, %v1830_v34  ;;  %v2439_v18 = vunpack.c.l.bf16 %v6269_v3 }
 0x378   :  { %v2063_v26 = vpop.f32.mrf.mxu3 }
 0x379   :  { %v2064_v53 = vadd.f32 %v2063_v26, %v2023_v56  ;;  %v1912_v41 = vadd.f32 %v6139_v63, %v1871_v48  ;;  %v6287_v26 = vld [vmem:[%s7181_s7 + $0x38] sm:$0xff]  ;;  %2526 = vmatpush.msra.mxu1 %v2439_v18  ;;  %v6298_v63 = vld [vmem:[%s7181_s7 + $0x30] sm:$0xff] }
 0x37a   :  { %v2433_v55 = vunpack.c.l.bf16 %v6287_v26 }
 0x37b   :  { %v6233_v5 = vmax.f32 %v2064_v53, 0.0  ;;  %v1792_v53 = vadd.f32 %v6192_v59, %v6037_v2  ;;  %v1953_v46 = vadd.f32 %v6162_v19, %v1912_v41  ;;  %2527 = vmatpush.msra.mxu1 %v2437_v17  ;;  %v2431_v2 = vunpack.c.l.bf16 %v6298_v63 }
 0x37d   :  { %v2093_v50 = vmul.f32 %v6233_v5, %v6233_v5  ;;  %v1833_v6 = vadd.f32 %v6070_v8, %v1792_v53  ;;  %2528 = vmatpush.msra.mxu1 %v2435_v22  ;;  %v1795_v8 = vadd.f32 %v6192_v59, %v6046_v13 }
 0x37f   :  { %2135 = vmatmul.f32.gmra.mxu0 %v2093_v50  ;;  %v1994_v50 = vadd.f32 %v6187_v32, %v1953_v46  ;;  %v1874_v19 = vadd.f32 %v6118_v38, %v1833_v6  ;;  %2529 = vmatpush.msra.mxu1 %v2433_v55  ;;  %v1836_v14 = vadd.f32 %v6086_v51, %v1795_v8 }
 0x380   :  { %v2066_v4 = vpop.f32.mrf.mxu3 }
 0x381   :  { %v2067_v37 = vadd.f32 %v2066_v4, %v2026_v25  ;;  %v2035_v25 = vadd.f32 %v2034_v47, %v1994_v50  ;;  %v1915_v42 = vadd.f32 %v6145_v31, %v1874_v19  ;;  %2530 = vmatpush.msra.mxu1 %v2431_v2  ;;  %v6343_v50 = vld [vmem:[%s7181_s7 + $0x20] sm:$0xff] }
 0x383   :  { %v6242_v28 = vmax.f32 %v2067_v37, 0.0  ;;  %v2037_v37 = vpop.f32.mrf.mxu2  ;;  %v1956_v32 = vadd.f32 %v6175_v11, %v1915_v42  ;;  %v6350_v42 = vld [vmem:[%s7181_s7 + $0xf8] sm:$0xff] }
 0x384   :  { %v2481_v8 = vunpack.c.l.bf16 %v6350_v42 }
 0x385   :  { %v2094_v44 = vmul.f32 %v6242_v28, %v6242_v28  ;;  %v1997_v38 = vadd.f32 %v6196_v61, %v1956_v32  ;;  %v6358_v32 = vld [vmem:[%s7181_s7 + $0x18] sm:$0xff] }
 0x386   :  { %2544 = vmatpush.msra.mxu2 %v2481_v8  ;;  %v6436_v8 = vld [vmem:[%s7181_s7 + $0xc8] sm:$0xff] }
 0x387   :  { %2138 = vmatmul.f32.gmra.mxu0 %v2094_v44  ;;  %v1877_v44 = vadd.f32 %v6127_v40, %v1836_v14  ;;  %v2038_v31 = vadd.f32 %v2037_v37, %v1997_v38 }
 0x388   :  { %v2069_v1 = vpop.f32.mrf.mxu3 }
 0x389   :  { %v2070_v15 = vadd.f32 %v2069_v1, %v2029_v30  ;;  %v1918_v16 = vadd.f32 %v6150_v58, %v1877_v44  ;;  %v6365_v44 = vld [vmem:[%s7181_s7 + $0xf0] sm:$0xff] }
 0x38b   :  { %v6259_v33 = vmax.f32 %v2070_v15, 0.0  ;;  %v1959_v13 = vadd.f32 %v6179_v0, %v1918_v16  ;;  %v2040_v59 = vpop.f32.mrf.mxu2  ;;  %v6372_v16 = vld [vmem:[%s7181_s7 + $0x10] sm:$0xff] }
 0x38d   :  { %v2095_v29 = vmul.f32 %v6259_v33, %v6259_v33  ;;  %v2000_v51 = vadd.f32 %v6208_v7, %v1959_v13  ;;  %v6332_v7 = vld [vmem:[%s7181_s7 + $0x28] sm:$0xff] }
 0x38e   :  { %v2429_v48 = vunpack.c.l.bf16 %v6332_v7 }
 0x38f   :  { %2141 = vmatmul.f32.gmra.mxu0 %v2095_v29  ;;  %v2041_v30 = vadd.f32 %v2040_v59, %v2000_v51  ;;  %v2423_v51 = vunpack.c.l.bf16 %v6372_v16 }
 0x390   :  { %v2072_v57 = vpop.f32.mrf.mxu3  ;;  %2531 = vmatpush.msra.mxu1 %v2429_v48 }
 0x391   :  { %v2073_v56 = vadd.f32 %v2072_v57, %v2032_v35 }
 0x393   :  { %v6293_v45 = vmax.f32 %v2073_v56, 0.0 }
 0x395   :  { %7219 = vst [vmem:[#allocation8_spill] sm:$0xff] %v6293_v45  ;;  %v2096_v49 = vmul.f32 %v6293_v45, %v6293_v45 }
 0x397   :  { %2144 = vmatmul.f32.gmra.mxu0 %v2096_v49  ;;  %v2427_v49 = vunpack.c.l.bf16 %v6343_v50 }
 0x398   :  { %v2075_v4 = vpop.f32.mrf.mxu3 }
 0x399   :  { %v2076_v12 = vadd.f32 %v2075_v4, %v2035_v25  ;;  %2532 = vmatpush.msra.mxu1 %v2427_v49 }
 0x39b   :  { %v6311_v20 = vmax.f32 %v2076_v12, 0.0 }
 0x39d   :  { %7220 = vst [vmem:[#allocation9_spill] sm:$0xff] %v6311_v20  ;;  %v2097_v9 = vmul.f32 %v6311_v20, %v6311_v20 }
 0x39f   :  { %2147 = vmatmul.f32.gmra.mxu0 %v2097_v9  ;;  %v2425_v9 = vunpack.c.l.bf16 %v6358_v32 }
 0x3a0   :  { %v2078_v21 = vpop.f32.mrf.mxu3 }
 0x3a1   :  { %v2079_v10 = vadd.f32 %v2078_v21, %v2038_v31  ;;  %v2479_v21 = vunpack.c.l.bf16 %v6365_v44  ;;  %2533 = vmatpush.msra.mxu1 %v2425_v9  ;;  %v2469_v9 = vunpack.c.l.bf16 %v6436_v8 }
 0x3a3   :  { %v6320_v11 = vmax.f32 %v2079_v10, 0.0  ;;  %2545 = vmatpush.msra.mxu2 %v2479_v21  ;;  %2534 = vmatpush.msra.mxu1 %v2423_v51  ;;  %v7225_v21 = vld [vmem:[#allocation7_spill] sm:$0xff] }
 0x3a5   :  { %7221 = vst [vmem:[#allocation10_spill] sm:$0xff] %v6320_v11  ;;  %v2098_v61 = vmul.f32 %v6320_v11, %v6320_v11 }
 0x3a7   :  { %2150 = vmatmul.f32.gmra.mxu0 %v2098_v61  ;;  %v6381_v61 = vld [vmem:[%s7181_s7 + $0xe8] sm:$0xff] }
 0x3a8   :  { %v2081_v1 = vpop.f32.mrf.mxu3 }
 0x3a9   :  { %v2082_v40 = vadd.f32 %v2081_v1, %v2041_v30  ;;  %v2477_v30 = vunpack.c.l.bf16 %v6381_v61  ;;  %v6388_v1 = vld [vmem:[%s7181_s7 + $0x8] sm:$0xff] }
 0x3ab   :  { %v6325_v43 = vmax.f32 %v2082_v40, 0.0  ;;  %2546 = vmatpush.msra.mxu2 %v2477_v30  ;;  %v6446_v30 = vld [vmem:[%s7181_s7 + $0xc0] sm:$0xff] }
 0x3ad   :  { %7222 = vst [vmem:[#allocation11_spill] sm:$0xff] %v6325_v43  ;;  %v2099_v58 = vmul.f32 %v6325_v43, %v6325_v43  ;;  %v2428_v43 = vunpack.c.h.bf16 %v6343_v50 }
 0x3af   :  { %2153 = vmatmul.f32.gmra.mxu0 %v2099_v58 }
 0x3f4   :  { %v2133_v23 = vpop.f32.mrf.mxu0 }
 0x3f5   :  { %v2157_v0 = vmul.f32 4e-06, %v2133_v23 }
 0x3f7   :  { %v2165_v15 = vadd.f32 1.0, %v2157_v0  ;;  %v2421_v0 = vunpack.c.l.bf16 %v6388_v1 }
 0x3f9   :  { %4520 = vrsqrt.f32 %v2165_v15  ;;  %vm2179_vm3 = vweird.f32 %v2165_v15  ;;  %2535 = vmatpush.msra.mxu1 %v2421_v0  ;;  %v6456_v0 = vld [vmem:[%s7181_s7 + $0x178] sm:$0xff] }
 0x3fc   :  { %v2136_v27 = vpop.f32.mrf.mxu0 }
 0x3fd   :  { %v2158_v34 = vmul.f32 4e-06, %v2136_v27 }
 0x3ff   :  { %v4521_v39 = vpop.eup %4520  ;;  %v2166_v29 = vadd.f32 1.0, %v2158_v34 }
 0x400   :  { %v2174_v35 = vmul.f32 %v4521_v39, %v2165_v15  ;;  %vm2180_vm6 = vweird.f32 %v4521_v39  ;;  %v6394_v15 = vld [vmem:[%s7181_s7 + $0xe0] sm:$0xff] }
 0x401   :  { %4522 = vrsqrt.f32 %v2166_v29  ;;  %vm2181_vm4 = vmor %vm2179_vm3, %vm2180_vm6  ;;  %vm2189_vm7 = vweird.f32 %v2166_v29  ;;  %v2475_v34 = vunpack.c.l.bf16 %v6394_v15 }
 0x402   :  { %v2175_v47 = vmul.f32 %v4521_v39, %v2174_v35 }
 0x403   :  { %2547 = vmatpush.msra.mxu2 %v2475_v34 }
 0x404   :  { %v2176_v57 = vmul.f32 0.5, %v2175_v47  ;;  %v2139_v18 = vpop.f32.mrf.mxu0  ;;  %v6406_v47 = vld [vmem:[%s7181_s7 + $0xd8] sm:$0xff] }
 0x405   :  { %v2159_v17 = vmul.f32 4e-06, %v2139_v18 }
 0x406   :  { %v2177_v41 = vsub.f32 1.5, %v2176_v57 }
 0x407   :  { %v4523_v56 = vpop.eup %4522  ;;  %v6335_v22 = vadd.f32 1.0, %v2159_v17  ;;  %v2473_v17 = vunpack.c.l.bf16 %v6406_v47 }
 0x408   :  { %v2178_v53 = vmul.f32 %v4521_v39, %v2177_v41  ;;  %v2184_v46 = vmul.f32 %v4523_v56, %v2166_v29  ;;  %vm2190_vm5 = vweird.f32 %v4523_v56  ;;  %v2450_v41 = vunpack.c.h.bf16 %v6167_v24 }
 0x409   :  { %4524 = vrsqrt.f32 %v6335_v22  ;;  %vm2191_vm8 = vmor %vm2189_vm7, %vm2190_vm5  ;;  %vm2199_vm10 = vweird.f32 %v6335_v22  ;;  %2548 = vmatpush.msra.mxu2 %v2473_v17 }
 0x40a   :  { %v6338_v55 = vsel %vm2181_vm4, %v4521_v39, %v2178_v53  ;;  %v2185_v6 = vmul.f32 %v4523_v56, %v2184_v46  ;;  %v6400_v39 = vld [vmem:[%s7181_s7] sm:$0xff]  ;;  %v6420_v46 = vld [vmem:[%s7181_s7 + $0xd0] sm:$0xff] }
 0x40b   :  { %4526 = vrsqrt.f32 %v6338_v55  ;;  %v2419_v35 = vunpack.c.l.bf16 %v6400_v39  ;;  %v2471_v24 = vunpack.c.l.bf16 %v6420_v46  ;;  %vm2260_vm12 = vcmp.eq.f32.partialorder %v6338_v55, inf }
 0x40c   :  { %v2186_v2 = vmul.f32 0.5, %v2185_v6  ;;  %v2142_v19 = vpop.f32.mrf.mxu0  ;;  %vm2262_vm15 = vcmp.eq.f32.partialorder %v6338_v55, 0.0 }
 0x40d   :  { %v2160_v25 = vmul.f32 4e-06, %v2142_v19  ;;  %2536 = vmatpush.msra.mxu1 %v2419_v35  ;;  %2549 = vmatpush.msra.mxu2 %v2471_v24  ;;  %v2513_v35 = vunpack.c.l.bf16 %v6456_v0  ;;  %v2442_v24 = vunpack.c.h.bf16 %v6251_v60  ;;  %v2440_v60 = vunpack.c.h.bf16 %v6269_v3  ;;  %v6517_v3 = vld [vmem:[%s7181_s7 + $0xa8] sm:$0xff] }
 0x40e   :  { %v2187_v4 = vsub.f32 1.5, %v2186_v2 }
 0x40f   :  { %v4525_v12 = vpop.eup %4524  ;;  %v6352_v37 = vadd.f32 1.0, %v2160_v25  ;;  %2590 = vmatpush.msrb.mxu1 %v2450_v41  ;;  %2550 = vmatpush.msra.mxu2 %v2469_v9 }
 0x410   :  { %v2188_v14 = vmul.f32 %v4523_v56, %v2187_v4  ;;  %v2194_v38 = vmul.f32 %v4525_v12, %v6335_v22  ;;  %vm2200_vm9 = vweird.f32 %v4525_v12  ;;  %v7223_v22 = vld [vmem:[#allocation6_spill] sm:$0xff]  ;;  %2567 = vmatpush.msra.mxu3 %v2513_v35 }
 0x411   :  { %v4527_v31 = vpop.eup %4526  ;;  %4528 = vrsqrt.f32 %v6352_v37  ;;  %vm2201_vm11 = vmor %vm2199_vm10, %vm2200_vm9  ;;  %v2448_v2 = vunpack.c.h.bf16 %v7223_v22  ;;  %vm2209_vm13 = vweird.f32 %v6352_v37  ;;  %v6486_v22 = vld [vmem:[%s7181_s7 + $0xb0] sm:$0xff] }
 0x412   :  { %v2254_v10 = vmul.f32 %v4527_v31, %v6338_v55  ;;  %v6375_v13 = vsel %vm2191_vm8, %v4523_v56, %v2188_v14  ;;  %v2195_v59 = vmul.f32 %v4525_v12, %v2194_v38  ;;  %v7224_v14 = vmov 0.0  }
 0x413   :  { %4530 = vrsqrt.f32 %v6375_v13  ;;  %2537 = vmatmul.f32.vlgmr.msra.gmra.mxu1 %v7224_v14  ;;  %vm2272_vm3 = vcmp.eq.f32.partialorder %v6375_v13, inf  ;;  %vm2274_vm4 = vcmp.eq.f32.partialorder %v6375_v13, 0.0 }
 0x414   :  { %v2255_v40 = vmul.f32 %v4527_v31, %v2254_v10  ;;  %v2196_v58 = vmul.f32 0.5, %v2195_v59  ;;  %v2145_v23 = vpop.f32.mrf.mxu0  ;;  %2591 = vmatpush.msrb.mxu1 %v2448_v2  ;;  %v2446_v10 = vunpack.c.h.bf16 %v7225_v21 }
 0x415   :  { %v2161_v27 = vmul.f32 4e-06, %v2145_v23 }
 0x416   :  { %v2256_v29 = vmul.f32 0.5, %v2255_v40  ;;  %v2197_v48 = vsub.f32 1.5, %v2196_v58  ;;  %2592 = vmatpush.msrb.mxu1 %v2446_v10  ;;  %v2444_v58 = vunpack.c.h.bf16 %v6224_v54  ;;  %v6466_v54 = vld [vmem:[%s7181_s7 + $0xb8] sm:$0xff]  ;;  %v6512_v10 = vld [vmem:[%s7181_s7 + $0x160] sm:$0xff] }
 0x417   :  { %v6408_v57 = vpop.eup %4528  ;;  %v6410_v18 = vadd.f32 1.0, %v2161_v27  ;;  %v6461_v27 = vld [vmem:[%s7181_s7 + $0x170] sm:$0xff]  ;;  %v2465_v41 = vunpack.c.l.bf16 %v6466_v54 }
 0x418   :  { %v2198_v56 = vmul.f32 %v4525_v12, %v2197_v48  ;;  %v2204_v53 = vmul.f32 %v6408_v57, %v6352_v37  ;;  %v2257_v6 = vsub.f32 1.5, %v2256_v29  ;;  %vm2210_vm14 = vweird.f32 %v6408_v57  ;;  %2593 = vmatpush.msrb.mxu1 %v2444_v58  ;;  %v6507_v37 = vld [vmem:[%s7181_s7 + $0x168] sm:$0xff] }
 0x419   :  { %v6422_v49 = vpop.eup %4530  ;;  %4532 = vrsqrt.f32 %v6410_v18  ;;  %v2511_v17 = vunpack.c.l.bf16 %v6461_v27  ;;  %vm2211_vm1 = vmor %vm2209_vm13, %vm2210_vm14  ;;  %v2438_v58 = vunpack.c.h.bf16 %v6274_v52  ;;  %vm2219_vm2 = vweird.f32 %v6410_v18 }
 0x41a   :  { %v2266_v19 = vmul.f32 %v6422_v49, %v6375_v13  ;;  %v6430_v25 = vsel %vm2201_vm11, %v4525_v12, %v2198_v56  ;;  %v2205_v4 = vmul.f32 %v6408_v57, %v2204_v53  ;;  %v2258_v38 = vmul.f32 %v4527_v31, %v2257_v6  ;;  %2594 = vmatpush.msrb.mxu1 %v2442_v24 }
 0x41b   :  { %4534 = vrsqrt.f32 %v6430_v25  ;;  %v2467_v31 = vunpack.c.l.bf16 %v6446_v30  ;;  %2568 = vmatpush.msra.mxu3 %v2511_v17  ;;  %vm2284_vm8 = vcmp.eq.f32.partialorder %v6430_v25, inf  ;;  %vm2286_vm9 = vcmp.eq.f32.partialorder %v6430_v25, 0.0 }
 0x41c   :  { %v2267_v12 = vmul.f32 %v6422_v49, %v2266_v19  ;;  %v2206_v59 = vmul.f32 0.5, %v2205_v4  ;;  %v2148_v51 = vpop.f32.mrf.mxu0  ;;  %v2259_v34 = vmul.f32 %v2258_v38, %v6338_v55  ;;  %v2463_v19 = vunpack.c.l.bf16 %v6486_v22  ;;  %2595 = vmatpush.msrb.mxu1 %v2440_v60  ;;  %v6553_v60 = vld [vmem:[%s7181_s7 + $0x158] sm:$0xff] }
 0x41d   :  { %v2162_v40 = vmul.f32 4e-06, %v2148_v51  ;;  %2551 = vmatpush.msra.mxu2 %v2467_v31  ;;  %v2263_v4 = vand.u32 2147483648, %v6338_v55  ;;  %v2461_v51 = vunpack.c.l.bf16 %v6517_v3 }
 0x41e   :  { %v2207_v23 = vsub.f32 1.5, %v2206_v59  ;;  %v6477_v56 = vmul.f32 0.5, %v2267_v12  ;;  %v2509_v12 = vunpack.c.l.bf16 %v6507_v37  ;;  %v2507_v59 = vunpack.c.l.bf16 %v6512_v10  ;;  %2596 = vmatpush.msrb.mxu1 %v2438_v58  ;;  %v6583_v58 = vld [vmem:[%s7181_s7 + $0x150] sm:$0xff] }
 0x41f   :  { %v6470_v29 = vpop.eup %4532  ;;  %v6472_v48 = vadd.f32 1.0, %v2162_v40  ;;  %2552 = vmatpush.msra.mxu2 %v2465_v41  ;;  %v2261_v35 = vsel %vm2260_vm12, %v6338_v55, %v2259_v34  ;;  %v6542_v34 = vld [vmem:[%s7181_s7 + $0x98] sm:$0xff] }
 0x420   :  { %v2208_v53 = vmul.f32 %v6408_v57, %v2207_v23  ;;  %v2214_v6 = vmul.f32 %v6470_v29, %v6410_v18  ;;  %v6528_v23 = vld [vmem:[%s7181_s7 + $0xa0] sm:$0xff]  ;;  %v2269_v17 = vsub.f32 1.5, %v6477_v56  ;;  %2569 = vmatpush.msra.mxu3 %v2509_v12  ;;  %vm2220_vm6 = vweird.f32 %v6470_v29 }
 0x421   :  { %v6488_v2 = vpop.eup %4534  ;;  %4536 = vrsqrt.f32 %v6472_v48  ;;  %2553 = vmatpush.msra.mxu2 %v2463_v19  ;;  %v6559_v12 = vsel %vm2262_vm15, %v2263_v4, %v2261_v35  ;;  %vm2229_vm5 = vweird.f32 %v6472_v48  ;;  %vm2221_vm7 = vmor %vm2219_vm2, %vm2220_vm6 }
 0x422   :  { %v2278_v38 = vmul.f32 %v6488_v2, %v6430_v25  ;;  %v6501_v9 = vsel %vm2211_vm1, %v6408_v57, %v2208_v53  ;;  %v2215_v21 = vmul.f32 %v6470_v29, %v2214_v6  ;;  %v2459_v53 = vunpack.c.l.bf16 %v6528_v23  ;;  %2570 = vmatpush.msra.mxu3 %v2507_v59 }
 0x423   :  { %4538 = vrsqrt.f32 %v6501_v9  ;;  %2554 = vmatpush.msra.mxu2 %v2461_v51  ;;  %v2436_v6 = vunpack.c.h.bf16 %v6279_v36  ;;  %v2270_v4 = vmul.f32 %v6422_v49, %v2269_v17  ;;  %vm2296_vm11 = vcmp.eq.f32.partialorder %v6501_v9, inf }
 0x424   :  { %v2216_v40 = vmul.f32 0.5, %v2215_v21  ;;  %v2151_v31 = vpop.f32.mrf.mxu0  ;;  %v2279_v52 = vmul.f32 %v6488_v2, %v2278_v38  ;;  %v2457_v38 = vunpack.c.l.bf16 %v6542_v34  ;;  %v2434_v21 = vunpack.c.h.bf16 %v6287_v26  ;;  %v6570_v26 = vld [vmem:[%s7181_s7 + $0x90] sm:$0xff] }
 0x425   :  { %v2163_v41 = vmul.f32 4e-06, %v2151_v31  ;;  %2555 = vmatpush.msra.mxu2 %v2459_v53  ;;  %2597 = vmatpush.msrb.mxu1 %v2436_v6  ;;  %7226 = vst [vmem:[#allocation6_spill] sm:$0xff] %v6570_v26  ;;  %v2455_v35 = vunpack.c.l.bf16 %v6570_v26  ;;  %v2503_v6 = vunpack.c.l.bf16 %v6583_v58  ;;  %v2271_v45 = vmul.f32 %v2270_v4, %v6375_v13 }
 0x426   :  { %v2217_v24 = vsub.f32 1.5, %v2216_v40  ;;  %v2505_v40 = vunpack.c.l.bf16 %v6553_v60  ;;  %v2280_v49 = vmul.f32 0.5, %v2279_v52  ;;  %vm2298_vm12 = vcmp.eq.f32.partialorder %v6501_v9, 0.0 }
 0x427   :  { %v6546_v19 = vpop.eup %4536  ;;  %v6548_v36 = vadd.f32 1.0, %v2163_v41  ;;  %2556 = vmatpush.msra.mxu2 %v2457_v38  ;;  %v2432_v41 = vunpack.c.h.bf16 %v6298_v63  ;;  %2598 = vmatpush.msrb.mxu1 %v2434_v21  ;;  %v6602_v63 = vld [vmem:[%s7181_s7 + $0x140] sm:$0xff] }
 0x428   :  { %v2218_v51 = vmul.f32 %v6470_v29, %v2217_v24  ;;  %v2224_v59 = vmul.f32 %v6546_v19, %v6472_v48  ;;  %2571 = vmatpush.msra.mxu3 %v2505_v40  ;;  %v6597_v24 = vld [vmem:[%s7181_s7 + $0x148] sm:$0xff]  ;;  %v2499_v38 = vunpack.c.l.bf16 %v6602_v63  ;;  %vm2230_vm10 = vweird.f32 %v6546_v19  ;;  %v6669_v48 = vld [vmem:[%s7181_s7 + $0x130] sm:$0xff] }
 0x429   :  { %v6573_v31 = vpop.eup %4538  ;;  %4540 = vrsqrt.f32 %v6548_v36  ;;  %v2501_v52 = vunpack.c.l.bf16 %v6597_v24  ;;  %2557 = vmatpush.msra.mxu2 %v2455_v35  ;;  %2599 = vmatpush.msrb.mxu1 %v2432_v41  ;;  %v2430_v35 = vunpack.c.h.bf16 %v6332_v7  ;;  %v2426_v41 = vunpack.c.h.bf16 %v6358_v32  ;;  %vm2231_vm13 = vmor %vm2229_vm5, %vm2230_vm10 }
 0x42a   :  { %v2290_v17 = vmul.f32 %v6573_v31, %v6501_v9  ;;  %v6590_v53 = vsel %vm2221_vm7, %v6470_v29, %v2218_v51  ;;  %v2225_v18 = vmul.f32 %v6546_v19, %v2224_v59  ;;  %v6607_v29 = vld [vmem:[%s7181_s7 + $0x88] sm:$0xff]  ;;  %v6617_v51 = vld [vmem:[%s7181_s7 + $0x80] sm:$0xff]  ;;  %v6623_v59 = vld [vmem:[%s7181_s7 + $0x138] sm:$0xff]  ;;  %2572 = vmatpush.msra.mxu3 %v2503_v6  ;;  %v7228_v32 = vand.u32 2147483648, %v6375_v13 }
 0x42b   :  { %7227 = vst [vmem:[#allocation7_spill] sm:$0xff] %v6607_v29  ;;  %4542 = vrsqrt.f32 %v6590_v53  ;;  %v2453_v21 = vunpack.c.l.bf16 %v6607_v29  ;;  %v2451_v57 = vunpack.c.l.bf16 %v6617_v51  ;;  %v2281_v29 = vsub.f32 1.5, %v2280_v49  ;;  %2600 = vmatpush.msrb.mxu1 %v2430_v35  ;;  %v6687_v35 = vld [vmem:[%s7181_s7 + $0x128] sm:$0xff] }
 0x42c   :  { %v2226_v40 = vmul.f32 0.5, %v2225_v18  ;;  %v2154_v56 = vpop.f32.mrf.mxu0  ;;  %v2291_v20 = vmul.f32 %v6573_v31, %v2290_v17  ;;  %2573 = vmatpush.msra.mxu3 %v2501_v52  ;;  %v2497_v7 = vunpack.c.l.bf16 %v6623_v59  ;;  %vm2239_vm14 = vweird.f32 %v6548_v36 }
 0x42d   :  { %v2164_v11 = vmul.f32 4e-06, %v2154_v56  ;;  %2558 = vmatpush.msra.mxu2 %v2453_v21  ;;  %v2273_v56 = vsel %vm2272_vm3, %v6375_v13, %v2271_v45  ;;  %v2282_v4 = vmul.f32 %v6488_v2, %v2281_v29  ;;  %2601 = vmatpush.msrb.mxu1 %v2428_v43  ;;  %v2299_v43 = vand.u32 2147483648, %v6501_v9 }
 0x42e   :  { %v2227_v26 = vsub.f32 1.5, %v2226_v40  ;;  %v2292_v49 = vmul.f32 0.5, %v2291_v20  ;;  %2574 = vmatpush.msra.mxu3 %v2499_v38  ;;  %v2349_v29 = vmul.f32 %v6559_v12, %v6338_v55  ;;  %v7229_v12 = vand.u32 2147483648, %v6430_v25 }
 0x42f   :  { %v6634_v18 = vpop.eup %4540  ;;  %v6636_v50 = vadd.f32 1.0, %v2164_v11  ;;  %2559 = vmatpush.msra.mxu2 %v2451_v57  ;;  %v2276_v11 = vsel %vm2274_vm4, %v7228_v32, %v2273_v56  ;;  %v2283_v45 = vmul.f32 %v2282_v4, %v6430_v25  ;;  %2602 = vmatpush.msrb.mxu1 %v2426_v41  ;;  %v2424_v41 = vunpack.c.h.bf16 %v6372_v16 }
 0x430   :  { %v2228_v17 = vmul.f32 %v6546_v19, %v2227_v26  ;;  %v2234_v6 = vmul.f32 %v6634_v18, %v6548_v36  ;;  %v2293_v20 = vsub.f32 1.5, %v2292_v49  ;;  %v2350_v52 = vmul.f32 %v2276_v11, %v6375_v13  ;;  %2575 = vmatpush.msra.mxu3 %v2497_v7 }
 0x431   :  { %v6650_v57 = vpop.eup %4542  ;;  %4544 = vrsqrt.f32 %v6636_v50  ;;  %v2495_v56 = vunpack.c.l.bf16 %v6669_v48  ;;  %vm2240_vm15 = vweird.f32 %v6634_v18  ;;  %v2357_v49 = vmul.f32 %v2349_v29, %v6217_v62  ;;  %2603 = vmatpush.msrb.mxu1 %v2424_v41 }
 0x432   :  { %v6660_v2 = vsel %vm2231_vm13, %v6546_v19, %v2228_v17  ;;  %v2235_v26 = vmul.f32 %v6634_v18, %v2234_v6  ;;  %v2285_v19 = vsel %vm2284_vm8, %v6430_v25, %v2283_v45  ;;  %v2294_v38 = vmul.f32 %v6573_v31, %v2293_v20  ;;  %v6699_v17 = vld [vmem:[%s7181_s7 + $0x120] sm:$0xff]  ;;  %vm2241_vm1 = vmor %vm2239_vm14, %vm2240_vm15 }
 0x433   :  { %4546 = vrsqrt.f32 %v6660_v2  ;;  %v2302_v55 = vmul.f32 %v6650_v57, %v6590_v53  ;;  %v2288_v21 = vsel %vm2286_vm9, %v7229_v12, %v2285_v19  ;;  %v2358_v40 = vmul.f32 %v2350_v52, %v6233_v5  ;;  %2576 = vmatpush.msra.mxu3 %v2495_v56 }
 0x434   :  { %v2236_v13 = vmul.f32 0.5, %v2235_v26  ;;  %v2295_v7 = vmul.f32 %v2294_v38, %v6501_v9  ;;  %v2351_v31 = vmul.f32 %v2288_v21, %v6430_v25  ;;  %v2422_v5 = vunpack.c.h.bf16 %v6388_v1  ;;  %v6710_v1 = vld [vmem:[%s7181_s7 + $0x118] sm:$0xff]  ;;  %v6743_v21 = vld [vmem:[%s7181_s7 + $0x108] sm:$0xff] }
 0x435   :  { %v2493_v32 = vunpack.c.l.bf16 %v6687_v35  ;;  %v2420_v62 = vunpack.c.h.bf16 %v6400_v39  ;;  %v2303_v11 = vmul.f32 %v6650_v57, %v2302_v55  ;;  %v2365_v29 = vmax.f32 %v2357_v49, %v2358_v40 }
 0x436   :  { %v2237_v4 = vsub.f32 1.5, %v2236_v13  ;;  %v2297_v25 = vsel %vm2296_vm11, %v6501_v9, %v2295_v7  ;;  %v2359_v16 = vmul.f32 %v2351_v31, %v6242_v28  ;;  %2604 = vmatpush.msrb.mxu1 %v2422_v5  ;;  %v2491_v52 = vunpack.c.l.bf16 %v6699_v17 }
 0x437   :  { %v4545_v6 = vpop.eup %4544  ;;  %v2300_v28 = vsel %vm2298_vm12, %v2299_v43, %v2297_v25  ;;  %2577 = vmatpush.msra.mxu3 %v2493_v32  ;;  %v2482_v19 = vunpack.c.h.bf16 %v6350_v42  ;;  %v6729_v43 = vld [vmem:[%s7181_s7 + $0x110] sm:$0xff]  ;;  %v2480_v42 = vunpack.c.h.bf16 %v6365_v44  ;;  %v2478_v31 = vunpack.c.h.bf16 %v6381_v61 }
 0x438   :  { %v2238_v45 = vmul.f32 %v6634_v18, %v2237_v4  ;;  %v2244_v20 = vmul.f32 %v4545_v6, %v6636_v50  ;;  %v2352_v39 = vmul.f32 %v2300_v28, %v6501_v9  ;;  %v2489_v9 = vunpack.c.l.bf16 %v6710_v1  ;;  %2605 = vmatpush.msrb.mxu1 %v2420_v62 }
 0x439   :  { %v6717_v26 = vpop.eup %4546  ;;  %v2366_v12 = vmax.f32 %v2365_v29, %v2359_v16  ;;  %2578 = vmatpush.msra.mxu3 %v2491_v52  ;;  %2613 = vmatpush.msrb.mxu2 %v2482_v19  ;;  %v2487_v7 = vunpack.c.l.bf16 %v6729_v43  ;;  %vm2250_vm2 = vweird.f32 %v4545_v6  ;;  %v2485_v56 = vunpack.c.l.bf16 %v6743_v21 }
 0x43a   :  { %v2314_v38 = vmul.f32 %v6717_v26, %v6660_v2  ;;  %v6734_v36 = vsel %vm2241_vm1, %v6634_v18, %v2238_v45  ;;  %v2245_v55 = vmul.f32 %v4545_v6, %v2244_v20  ;;  %v2360_v13 = vmul.f32 %v2352_v39, %v6259_v33  ;;  %v6753_v33 = vld [vmem:[%s7181_s7 + $0x100] sm:$0xff] }
 0x43b   :  { %4548 = vrsqrt.f32 %v6734_v36  ;;  %2579 = vmatpush.msra.mxu3 %v2489_v9  ;;  %2614 = vmatpush.msrb.mxu2 %v2480_v42  ;;  %v2476_v4 = vunpack.c.h.bf16 %v6394_v15  ;;  %v2304_v49 = vmul.f32 0.5, %v2303_v11  ;;  %vm2249_vm6 = vweird.f32 %v6636_v50 }
 0x43c   :  { %v2315_v18 = vmul.f32 %v6717_v26, %v2314_v38  ;;  %v2246_v40 = vmul.f32 0.5, %v2245_v55  ;;  %v6748_v41 = vmax.f32 %v2366_v12, %v2360_v13  ;;  %v2483_v25 = vunpack.c.l.bf16 %v6753_v33  ;;  %vm2251_vm3 = vmor %vm2249_vm6, %vm2250_vm2 }
 0x43d   :  { %2580 = vmatpush.msra.mxu3 %v2487_v7  ;;  %2615 = vmatpush.msrb.mxu2 %v2478_v31  ;;  %v2474_v16 = vunpack.c.h.bf16 %v6406_v47  ;;  %v2514_v15 = vunpack.c.h.bf16 %v6456_v0  ;;  %v2472_v11 = vunpack.c.h.bf16 %v6420_v46  ;;  %v2512_v45 = vunpack.c.h.bf16 %v6461_v27 }
 0x43e   :  { %v2247_v44 = vsub.f32 1.5, %v2246_v40  ;;  %2540 = vmatmul.f32.gmra.mxu1 %v6748_v41  ;;  %2560 = vmatmul.f32.vlgmr.msra.gmra.mxu2 %v6748_v41  ;;  %v2316_v61 = vmul.f32 0.5, %v2315_v18  ;;  %v2305_v20 = vsub.f32 1.5, %v2304_v49  ;;  %v2470_v47 = vunpack.c.h.bf16 %v6436_v8 }
 0x43f   :  { %2581 = vmatpush.msra.mxu3 %v2485_v56  ;;  %2616 = vmatpush.msrb.mxu2 %v2476_v4  ;;  %v2510_v0 = vunpack.c.h.bf16 %v6507_v37  ;;  %v2468_v29 = vunpack.c.h.bf16 %v6446_v30  ;;  %v2508_v27 = vunpack.c.h.bf16 %v6512_v10  ;;  %v2466_v8 = vunpack.c.h.bf16 %v6466_v54 }
 0x440   :  { %v2248_v5 = vmul.f32 %v4545_v6, %v2247_v44  ;;  %v2317_v28 = vsub.f32 1.5, %v2316_v61  ;;  %v2506_v38 = vunpack.c.h.bf16 %v6553_v60  ;;  %vm2320_vm4 = vcmp.eq.f32.partialorder %v6660_v2, inf }
 0x441   :  { %v4549_v32 = vpop.eup %4548  ;;  %2582 = vmatpush.msra.mxu3 %v2483_v25  ;;  %2617 = vmatpush.msrb.mxu2 %v2474_v16  ;;  %v2464_v10 = vunpack.c.h.bf16 %v6486_v22  ;;  %v2504_v55 = vunpack.c.h.bf16 %v6583_v58  ;;  %v2462_v9 = vunpack.c.h.bf16 %v6517_v3  ;;  %vm2308_vm5 = vcmp.eq.f32.partialorder %v6590_v53, inf }
 0x442   :  { %v2326_v62 = vmul.f32 %v4549_v32, %v6734_v36  ;;  %v6765_v50 = vsel %vm2251_vm3, %v4545_v6, %v2248_v5  ;;  %v2306_v6 = vmul.f32 %v6650_v57, %v2305_v20  ;;  %v2318_v46 = vmul.f32 %v6717_v26, %v2317_v28  ;;  %v7234_v28 = vld [vmem:[#allocation10_spill] sm:$0xff] }
 0x443   :  { %4550 = vrsqrt.f32 %v6765_v50  ;;  %2636 = vmatpush.msrb.mxu3 %v2514_v15  ;;  %2618 = vmatpush.msrb.mxu2 %v2472_v11  ;;  %v2323_v13 = vand.u32 2147483648, %v6660_v2  ;;  %v2502_v12 = vunpack.c.h.bf16 %v6597_v24  ;;  %vm2322_vm7 = vcmp.eq.f32.partialorder %v6660_v2, 0.0 }
 0x444   :  { %v2327_v39 = vmul.f32 %v4549_v32, %v2326_v62  ;;  %v2307_v19 = vmul.f32 %v2306_v6, %v6590_v53  ;;  %v2319_v37 = vmul.f32 %v2318_v46, %v6660_v2  ;;  %v2460_v58 = vunpack.c.h.bf16 %v6528_v23 }
 0x445   :  { %2637 = vmatpush.msrb.mxu3 %v2512_v45  ;;  %2619 = vmatpush.msrb.mxu2 %v2470_v47  ;;  %v2311_v18 = vand.u32 2147483648, %v6590_v53  ;;  %vm2310_vm8 = vcmp.eq.f32.partialorder %v6590_v53, 0.0  ;;  %vm2332_vm9 = vcmp.eq.f32.partialorder %v6734_v36, inf  ;;  %v2335_v24 = vand.u32 2147483648, %v6734_v36  ;;  %v7231_v45 = vld [vmem:[#allocation9_spill] sm:$0xff]  ;;  %v7233_v47 = vld [vmem:[#allocation8_spill] sm:$0xff] }
 0x446   :  { %2606 = vmatmul.f32.vlgmr.msrb.gmra.mxu1 %v7224_v14  ;;  %v2328_v52 = vmul.f32 0.5, %v2327_v39  ;;  %v2321_v54 = vsel %vm2320_vm4, %v6660_v2, %v2319_v37  ;;  %v2309_v42 = vsel %vm2308_vm5, %v6590_v53, %v2307_v19  ;;  %v2500_v31 = vunpack.c.h.bf16 %v6602_v63  ;;  %v4281_v39 = vld [vmem:[%s7183_s9 + $0x38] sm:$0xff]  }
 0x447   :  { %2638 = vmatpush.msrb.mxu3 %v2510_v0  ;;  %2620 = vmatpush.msrb.mxu2 %v2468_v29  ;;  %v2324_v40 = vsel %vm2322_vm7, %v2323_v13, %v2321_v54  ;;  %v2312_v44 = vsel %vm2310_vm8, %v2311_v18, %v2309_v42  ;;  %vm2334_vm10 = vcmp.eq.f32.partialorder %v6734_v36, 0.0  ;;  %v2458_v61 = vunpack.c.h.bf16 %v6542_v34  ;;  %v7232_v34 = vld [vmem:[#allocation7_spill] sm:$0xff] }
 0x448   :  { %v2329_v30 = vsub.f32 1.5, %v2328_v52  ;;  %v2354_v49 = vmul.f32 %v2324_v40, %v6660_v2  ;;  %v2498_v5 = vunpack.c.h.bf16 %v6623_v59  ;;  %v2353_v16 = vmul.f32 %v2312_v44, %v6590_v53  ;;  %v7235_v37 = vld [vmem:[#allocation11_spill] sm:$0xff]  ;;  %v4275_v44 = vld [vmem:[%s7183_s9 + $0x8] sm:$0xff]  }
 0x449   :  { %v4551_v57 = vpop.eup %4550  ;;  %2639 = vmatpush.msrb.mxu3 %v2508_v27  ;;  %2621 = vmatpush.msrb.mxu2 %v2466_v8  ;;  %v2496_v62 = vunpack.c.h.bf16 %v6669_v48  ;;  %v2454_v20 = vunpack.c.h.bf16 %v7232_v34  ;;  %vm2344_vm11 = vcmp.eq.f32.partialorder %v6765_v50, inf  ;;  %vm2346_vm12 = vcmp.eq.f32.partialorder %v6765_v50, 0.0  ;;  %v4289_v54 = vld [vmem:[%s7183_s9 + $0x78] sm:$0xff]   ;;  %v4288_v18 = vld [vmem:[%s7183_s9 + $0x70] sm:$0xff]  }
 0x44a   :  { %v2338_v26 = vmul.f32 %v4551_v57, %v6765_v50  ;;  %v2330_v60 = vmul.f32 %v4549_v32, %v2329_v30  ;;  %v7230_v32 = vld [vmem:[#allocation6_spill] sm:$0xff]  ;;  %v2362_v2 = vmul.f32 %v2354_v49, %v7231_v45  ;;  %v2347_v53 = vand.u32 2147483648, %v6765_v50  ;;  %v4297_v40 = vld [vmem:[%s7183_s9 + $0xb8] sm:$0xff]  }
 0x44b   :  { %2640 = vmatpush.msrb.mxu3 %v2506_v38  ;;  %2622 = vmatpush.msrb.mxu2 %v2464_v10  ;;  %v2456_v15 = vunpack.c.h.bf16 %v7230_v32  ;;  %v2494_v59 = vunpack.c.h.bf16 %v6687_v35  ;;  %v2361_v48 = vmul.f32 %v2353_v16, %v7233_v47  ;;  %v2452_v6 = vunpack.c.h.bf16 %v6617_v51  ;;  %v4296_v16 = vld [vmem:[%s7183_s9 + $0xb0] sm:$0xff]   ;;  %v4286_v32 = vld [vmem:[%s7183_s9 + $0x60] sm:$0xff]   ;;  %v4313_v34 = vld [vmem:[%s7183_s9 + $0x138] sm:$0xff]  }
 0x44c   :  { %v2339_v22 = vmul.f32 %v4551_v57, %v2338_v26  ;;  %v2331_v3 = vmul.f32 %v2330_v60, %v6734_v36  ;;  %v2492_v46 = vunpack.c.h.bf16 %v6699_v17  ;;  %v3828_v27 = vunpack.c.h.bf16 %v4281_v39 }
 0x44d   :  { %2641 = vmatpush.msrb.mxu3 %v2504_v55  ;;  %2623 = vmatpush.msrb.mxu2 %v2462_v9  ;;  %v3827_v52 = vunpack.c.l.bf16 %v4281_v39  ;;  %v2368_v8 = vmax.f32 %v2361_v48, %v2362_v2  ;;  %v2490_v19 = vunpack.c.h.bf16 %v6710_v1  ;;  %v2488_v38 = vunpack.c.h.bf16 %v6729_v43  ;;  %v4280_v1 = vld [vmem:[%s7183_s9 + $0x30] sm:$0xff]   ;;  %v4279_v43 = vld [vmem:[%s7183_s9 + $0x28] sm:$0xff]   ;;  %v4277_v55 = vld [vmem:[%s7183_s9 + $0x18] sm:$0xff]  }
 0x44e   :  { %v2340_v7 = vmul.f32 0.5, %v2339_v22  ;;  %2609 = vmatmul.f32.gmra.mxu1 %v6748_v41  ;;  %v2333_v23 = vsel %vm2332_vm9, %v6734_v36, %v2331_v3  ;;  %2859 = vmatpush.msra.mxu0 %v3828_v27  ;;  %v2486_v17 = vunpack.c.h.bf16 %v6743_v21  ;;  %v3824_v21 = vunpack.c.h.bf16 %v4280_v1  ;;  %v4295_v2 = vld [vmem:[%s7183_s9 + $0xa8] sm:$0xff]   ;;  %v4312_v48 = vld [vmem:[%s7183_s9 + $0x130] sm:$0xff]   ;;  %v4294_v39 = vld [vmem:[%s7183_s9 + $0xa0] sm:$0xff]  }
 0x44f   :  { %v2336_v56 = vsel %vm2334_vm10, %v2335_v24, %v2333_v23  ;;  %2642 = vmatpush.msrb.mxu3 %v2502_v12  ;;  %2624 = vmatpush.msrb.mxu2 %v2460_v58  ;;  %v3820_v26 = vunpack.c.h.bf16 %v4279_v43  ;;  %v3819_v10 = vunpack.c.l.bf16 %v4279_v43  ;;  %v3860_v60 = vunpack.c.h.bf16 %v4289_v54  ;;  %v4276_v58 = vld [vmem:[%s7183_s9 + $0x10] sm:$0xff]   ;;  %v4287_v23 = vld [vmem:[%s7183_s9 + $0x68] sm:$0xff]  }
 0x450   :  { %v2341_v4 = vsub.f32 1.5, %v2340_v7  ;;  %v2355_v63 = vmul.f32 %v2336_v56, %v6734_v36  ;;  %2860 = vmatpush.msra.mxu0 %v3827_v52  ;;  %v3812_v12 = vunpack.c.h.bf16 %v4277_v55  ;;  %v3811_v42 = vunpack.c.l.bf16 %v4277_v55  ;;  %v4284_v27 = vld [vmem:[%s7183_s9 + $0x50] sm:$0xff]  }
 0x451   :  { %2643 = vmatpush.msrb.mxu3 %v2500_v31  ;;  %2625 = vmatpush.msrb.mxu2 %v2458_v61  ;;  %v3859_v22 = vunpack.c.l.bf16 %v4289_v54  ;;  %v3808_v3 = vunpack.c.h.bf16 %v4276_v58  ;;  %v3856_v24 = vunpack.c.h.bf16 %v4288_v18  ;;  %v3807_v7 = vunpack.c.l.bf16 %v4276_v58 }
 0x452   :  { %v2342_v25 = vmul.f32 %v4551_v57, %v2341_v4  ;;  %v2363_v0 = vmul.f32 %v2355_v63, %v7234_v28  ;;  %2861 = vmatpush.msra.mxu0 %v3824_v21  ;;  %2882 = vmatpush.msra.mxu1 %v3860_v60  ;;  %v3855_v31 = vunpack.c.l.bf16 %v4288_v18  ;;  %v3892_v56 = vunpack.c.h.bf16 %v4297_v40  ;;  %v3798_v63 = vld [vmem:[%s7183_s9] sm:$0xff]   ;;  %v4305_v28 = vld [vmem:[%s7183_s9 + $0xf8] sm:$0xff]  }
 0x453   :  { %2644 = vmatpush.msrb.mxu3 %v2498_v5  ;;  %2626 = vmatpush.msrb.mxu2 %v2456_v15  ;;  %v3891_v4 = vunpack.c.l.bf16 %v4297_v40  ;;  %v3804_v49 = vunpack.c.h.bf16 %v4275_v44  ;;  %v3852_v61 = vunpack.c.h.bf16 %v4287_v23  ;;  %v3803_v5 = vunpack.c.l.bf16 %v4275_v44  ;;  %v4282_v60 = vld [vmem:[%s7183_s9 + $0x40] sm:$0xff]   ;;  %v4309_v18 = vld [vmem:[%s7183_s9 + $0x118] sm:$0xff]  }
 0x454   :  { %v2343_v11 = vmul.f32 %v2342_v25, %v6765_v50  ;;  %v2369_v57 = vmax.f32 %v2368_v8, %v2363_v0  ;;  %2883 = vmatpush.msra.mxu1 %v3859_v22  ;;  %v3851_v25 = vunpack.c.l.bf16 %v4287_v23  ;;  %v3888_v15 = vunpack.c.h.bf16 %v4296_v16 }
 0x455   :  { %2645 = vmatpush.msrb.mxu3 %v2496_v62  ;;  %2627 = vmatpush.msrb.mxu2 %v2454_v20  ;;  %v3800_v62 = vunpack.c.h.bf16 %v3798_v63  ;;  %v3887_v45 = vunpack.c.l.bf16 %v4296_v16  ;;  %v4285_v20 = vld [vmem:[%s7183_s9 + $0x58] sm:$0xff]   ;;  %v3884_v47 = vunpack.c.h.bf16 %v4295_v2  ;;  %v3924_v52 = vunpack.c.h.bf16 %v4305_v28  ;;  %v4290_v16 = vld [vmem:[%s7183_s9 + $0x80] sm:$0xff]  }
 0x456   :  { %v2345_v36 = vsel %vm2344_vm11, %v6765_v50, %v2343_v11  ;;  %2884 = vmatpush.msra.mxu1 %v3856_v24  ;;  %v3848_v11 = vunpack.c.h.bf16 %v4286_v32  ;;  %v3844_v0 = vunpack.c.h.bf16 %v4285_v20  ;;  %v3952_v8 = vunpack.c.h.bf16 %v4312_v48  ;;  %v4291_v24 = vld [vmem:[%s7183_s9 + $0x88] sm:$0xff]  }
 0x457   :  { %v2348_v29 = vsel %vm2346_vm12, %v2347_v53, %v2345_v36  ;;  %2646 = vmatpush.msrb.mxu3 %v2494_v59  ;;  %2628 = vmatpush.msrb.mxu2 %v2452_v6  ;;  %v3799_v53 = vunpack.c.l.bf16 %v3798_v63  ;;  %v3847_v59 = vunpack.c.l.bf16 %v4286_v32  ;;  %v3956_v36 = vunpack.c.h.bf16 %v4313_v34  ;;  %v4302_v63 = vld [vmem:[%s7183_s9 + $0xe0] sm:$0xff]   ;;  %v4308_v32 = vld [vmem:[%s7183_s9 + $0x110] sm:$0xff]  }
 0x458   :  { %v2356_v35 = vmul.f32 %v2348_v29, %v6765_v50  ;;  %v2484_v50 = vunpack.c.h.bf16 %v6753_v33  ;;  %v3823_v33 = vunpack.c.l.bf16 %v4280_v1  ;;  %2885 = vmatpush.msra.mxu1 %v3855_v31  ;;  %v3955_v6 = vunpack.c.l.bf16 %v4313_v34  ;;  %v4304_v29 = vld [vmem:[%s7183_s9 + $0xf0] sm:$0xff]   ;;  %v4283_v1 = vld [vmem:[%s7183_s9 + $0x48] sm:$0xff]  }
 0x459   :  { %2647 = vmatpush.msrb.mxu3 %v2492_v46  ;;  %2905 = vmatpush.msra.mxu2 %v3892_v56  ;;  %v3883_v46 = vunpack.c.l.bf16 %v4295_v2  ;;  %v3919_v43 = vunpack.c.l.bf16 %v4304_v29  ;;  %v3839_v21 = vunpack.c.l.bf16 %v4284_v27  ;;  %v3836_v55 = vunpack.c.h.bf16 %v4283_v1 }
 0x45a   :  { %v2364_v51 = vmul.f32 %v2356_v35, %v7235_v37  ;;  %2862 = vmatpush.msra.mxu0 %v3823_v33  ;;  %2886 = vmatpush.msra.mxu1 %v3852_v61  ;;  %v3843_v35 = vunpack.c.l.bf16 %v4285_v20  ;;  %v3880_v37 = vunpack.c.h.bf16 %v4294_v39  ;;  %v3832_v40 = vunpack.c.h.bf16 %v4282_v60 }
 0x45b   :  { %2648 = vmatpush.msrb.mxu3 %v2490_v19  ;;  %2906 = vmatpush.msra.mxu2 %v3891_v4  ;;  %v3923_v19 = vunpack.c.l.bf16 %v4305_v28  ;;  %v3831_v44 = vunpack.c.l.bf16 %v4282_v60  ;;  %v3940_v23 = vunpack.c.h.bf16 %v4309_v18  ;;  %v3868_v56 = vunpack.c.h.bf16 %v4291_v24 }
 0x45c   :  { %v2370_v30 = vmax.f32 %v2369_v57, %v2364_v51  ;;  %2863 = vmatpush.msra.mxu0 %v3820_v26  ;;  %2887 = vmatpush.msra.mxu1 %v3851_v25  ;;  %v4311_v51 = vld [vmem:[%s7183_s9 + $0x128] sm:$0xff]   ;;  %v3920_v57 = vunpack.c.h.bf16 %v4304_v29  ;;  %v3863_v34 = vunpack.c.l.bf16 %v4290_v16  ;;  %v3911_v20 = vunpack.c.l.bf16 %v4302_v63 }
 0x45d   :  { %2649 = vmatpush.msrb.mxu3 %v2488_v38  ;;  %2907 = vmatpush.msra.mxu2 %v3888_v15  ;;  %v3840_v38 = vunpack.c.h.bf16 %v4284_v27  ;;  %v3948_v33 = vunpack.c.h.bf16 %v4311_v51  ;;  %v4303_v26 = vld [vmem:[%s7183_s9 + $0xe8] sm:$0xff]   ;;  %v3947_v54 = vunpack.c.l.bf16 %v4311_v51  ;;  %v3864_v15 = vunpack.c.h.bf16 %v4290_v16  ;;  %v4300_v27 = vld [vmem:[%s7183_s9 + $0xd0] sm:$0xff]  }
 0x45e   :  { %2563 = vmatmul.f32.gmra.mxu2 %v2370_v30  ;;  %2583 = vmatmul.f32.vlgmr.msra.gmra.mxu3 %v2370_v30  ;;  %v3915_v61 = vunpack.c.l.bf16 %v4303_v26  ;;  %v3903_v51 = vunpack.c.l.bf16 %v4300_v27 }
 0x45f   :  { %2650 = vmatpush.msrb.mxu3 %v2486_v17  ;;  %2864 = vmatpush.msra.mxu0 %v3819_v10  ;;  %v4293_v17 = vld [vmem:[%s7183_s9 + $0x98] sm:$0xff]  }
 0x460   :  { %2888 = vmatpush.msra.mxu1 %v3848_v11  ;;  %2908 = vmatpush.msra.mxu2 %v3887_v45  ;;  %v3876_v10 = vunpack.c.h.bf16 %v4293_v17  ;;  %v3936_v11 = vunpack.c.h.bf16 %v4308_v32  ;;  %v4320_v45 = vld [vmem:[%s7183_s9 + $0x170] sm:$0xff]  }
 0x461   :  { %2651 = vmatpush.msrb.mxu3 %v2484_v50  ;;  %v3879_v50 = vunpack.c.l.bf16 %v4294_v39  ;;  %v3984_v2 = vunpack.c.h.bf16 %v4320_v45 }
 0x462   :  { %2889 = vmatpush.msra.mxu1 %v3847_v59  ;;  %2909 = vmatpush.msra.mxu2 %v3884_v47  ;;  %v4307_v59 = vld [vmem:[%s7183_s9 + $0x108] sm:$0xff]   ;;  %v3935_v47 = vunpack.c.l.bf16 %v4308_v32 }
 0x463   :  { %2928 = vmatpush.msra.mxu3 %v3924_v52  ;;  %v3931_v29 = vunpack.c.l.bf16 %v4307_v59  ;;  %v4306_v52 = vld [vmem:[%s7183_s9 + $0x100] sm:$0xff]  }
 0x464   :  { %2890 = vmatpush.msra.mxu1 %v3844_v0  ;;  %2910 = vmatpush.msra.mxu2 %v3883_v46  ;;  %v3932_v0 = vunpack.c.h.bf16 %v4307_v59 }
 0x465   :  { %2929 = vmatpush.msra.mxu3 %v3923_v19  ;;  %v3928_v19 = vunpack.c.h.bf16 %v4306_v52 }
 0x466   :  { %2586 = vmatmul.f32.gmra.mxu3 %v7224_v14  ;;  %2629 = vmatmul.f32.vlgmr.msrb.gmra.mxu2 %v6748_v41  ;;  %v4278_v41 = vld [vmem:[%s7183_s9 + $0x20] sm:$0xff]  }
 0x467   :  { %v3816_v9 = vunpack.c.h.bf16 %v4278_v41  ;;  %v3815_v13 = vunpack.c.l.bf16 %v4278_v41  ;;  %2891 = vmatpush.msra.mxu1 %v3843_v35  ;;  %2911 = vmatpush.msra.mxu2 %v3880_v37  ;;  %v4310_v41 = vld [vmem:[%s7183_s9 + $0x120] sm:$0xff]  }
 0x468   :  { %2930 = vmatpush.msra.mxu3 %v3920_v57  ;;  %v3944_v22 = vunpack.c.h.bf16 %v4310_v41  ;;  %v4318_v35 = vld [vmem:[%s7183_s9 + $0x160] sm:$0xff]   ;;  %v4299_v57 = vld [vmem:[%s7183_s9 + $0xc8] sm:$0xff]  }
 0x469   :  { %2865 = vmatpush.msra.mxu0 %v3816_v9  ;;  %2892 = vmatpush.msra.mxu1 %v3840_v38  ;;  %v4292_v9 = vld [vmem:[%s7183_s9 + $0x90] sm:$0xff]   ;;  %v3976_v37 = vunpack.c.h.bf16 %v4318_v35  ;;  %v4317_v38 = vld [vmem:[%s7183_s9 + $0x158] sm:$0xff]  }
 0x46a   :  { %2912 = vmatpush.msra.mxu2 %v3879_v50  ;;  %2931 = vmatpush.msra.mxu3 %v3919_v43  ;;  %v3872_v58 = vunpack.c.h.bf16 %v4292_v9  ;;  %v3871_v31 = vunpack.c.l.bf16 %v4292_v9  ;;  %v3900_v50 = vunpack.c.h.bf16 %v4299_v57  ;;  %v3899_v43 = vunpack.c.l.bf16 %v4299_v57  ;;  %v4315_v9 = vld [vmem:[%s7183_s9 + $0x148] sm:$0xff]  }
 0x46b   :  { %2866 = vmatpush.msra.mxu0 %v3815_v13  ;;  %v3875_v13 = vunpack.c.l.bf16 %v4293_v17  ;;  %2893 = vmatpush.msra.mxu1 %v3839_v21  ;;  %v3975_v17 = vunpack.c.l.bf16 %v4318_v35  ;;  %v3971_v21 = vunpack.c.l.bf16 %v4317_v38  ;;  %v4336_v35 = vld [vmem:[%s7185_s11 + $0x78] sm:$0xff]  }
 0x46c   :  { %2913 = vmatpush.msra.mxu2 %v3876_v10  ;;  %v4051_v57 = vunpack.c.l.bf16 %v4336_v35 }
 0x46d   :  { %2867 = vmatpush.msra.mxu0 %v3812_v12  ;;  %v3916_v12 = vunpack.c.h.bf16 %v4303_v26  ;;  %2894 = vmatpush.msra.mxu1 %v3836_v55  ;;  %v4316_v26 = vld [vmem:[%s7183_s9 + $0x150] sm:$0xff]  }
 0x46e   :  { %2632 = vmatmul.f32.gmra.mxu2 %v2370_v30  ;;  %2652 = vmatmul.f32.vlgmr.msrb.gmra.mxu3 %v2370_v30  ;;  %v3951_v30 = vunpack.c.l.bf16 %v4312_v48  ;;  %v3983_v48 = vunpack.c.l.bf16 %v4320_v45  ;;  %v3968_v55 = vunpack.c.h.bf16 %v4316_v26  ;;  %v3967_v60 = vunpack.c.l.bf16 %v4316_v26 }
 0x46f   :  { %2868 = vmatpush.msra.mxu0 %v3811_v42  ;;  %v3835_v42 = vunpack.c.l.bf16 %v4283_v1  ;;  %2914 = vmatpush.msra.mxu2 %v3875_v13  ;;  %v3972_v1 = vunpack.c.h.bf16 %v4317_v38  ;;  %v2515_v13 = vld [vmem:[%s7182_s8] sm:$0x3]  ;;  %v4335_v38 = vld [vmem:[%s7185_s11 + $0x70] sm:$0xff]  }
 0x470   :  { %2932 = vmatpush.msra.mxu3 %v3916_v12  ;;  %v2518_v16 = vperm.slane %v2515_v13, 1 }
 0x471   :  { %2869 = vmatpush.msra.mxu0 %v3808_v3  ;;  %v3943_v3 = vunpack.c.l.bf16 %v4310_v41  ;;  %2895 = vmatpush.msra.mxu1 %v3835_v42  ;;  %v3964_v42 = vunpack.c.h.bf16 %v4315_v9 }
 0x472   :  { %2915 = vmatpush.msra.mxu2 %v3872_v58  ;;  %2933 = vmatpush.msra.mxu3 %v3915_v61 }
 0x473   :  { %2870 = vmatpush.msra.mxu0 %v3807_v7  ;;  %v4321_v7 = vld [vmem:[%s7183_s9 + $0x178] sm:$0xff]   ;;  %2896 = vmatpush.msra.mxu1 %v3832_v40  ;;  %v4314_v40 = vld [vmem:[%s7183_s9 + $0x140] sm:$0xff]  }
 0x474   :  { %v3988_v4 = vunpack.c.h.bf16 %v4321_v7  ;;  %2916 = vmatpush.msra.mxu2 %v3871_v31  ;;  %v3987_v25 = vunpack.c.l.bf16 %v4321_v7  ;;  %v3959_v7 = vunpack.c.l.bf16 %v4314_v40 }
 0x475   :  { %2871 = vmatpush.msra.mxu0 %v3804_v49  ;;  %2897 = vmatpush.msra.mxu1 %v3831_v44  ;;  %v3867_v49 = vunpack.c.l.bf16 %v4291_v24 }
 0x476   :  { %2655 = vmatmul.f32.gmra.mxu3 %v7224_v14  ;;  %2917 = vmatpush.msra.mxu2 %v3868_v56 }
 0x477   :  { %2872 = vmatpush.msra.mxu0 %v3803_v5  ;;  %2974 = vmatpush.msrb.mxu1 %v3988_v4  ;;  %v3939_v5 = vunpack.c.l.bf16 %v4309_v18  ;;  %v3963_v18 = vunpack.c.l.bf16 %v4315_v9  ;;  %v4343_v9 = vld [vmem:[%s7185_s11 + $0xb0] sm:$0xff]  }
 0x478   :  { %2898 = vmatmul.f32.vlgmr.msra.gmra.mxu1 %v7224_v14  ;;  %2918 = vmatpush.msra.mxu2 %v3867_v49 }
 0x479   :  { %2873 = vmatpush.msra.mxu0 %v3800_v62  ;;  %v3912_v62 = vunpack.c.h.bf16 %v4302_v63  ;;  %2975 = vmatpush.msrb.mxu1 %v3987_v25 }
 0x47a   :  { %2919 = vmatpush.msra.mxu2 %v3864_v15 }
 0x47b   :  { %2874 = vmatpush.msra.mxu0 %v3799_v53  ;;  %v4301_v53 = vld [vmem:[%s7183_s9 + $0xd8] sm:$0xff]   ;;  %2934 = vmatpush.msra.mxu3 %v3912_v62 }
 0x47c   :  { %2875 = vmatmul.f32.vlgmr.msra.gmra.mxu0 %v7224_v14  ;;  %v3908_v28 = vunpack.c.h.bf16 %v4301_v53  ;;  %2976 = vmatpush.msrb.mxu1 %v3984_v2  ;;  %v3907_v39 = vunpack.c.l.bf16 %v4301_v53 }
 0x47d   :  { %2951 = vmatpush.msrb.mxu0 %v3956_v36  ;;  %v4319_v36 = vld [vmem:[%s7183_s9 + $0x168] sm:$0xff]   ;;  %2920 = vmatpush.msra.mxu2 %v3863_v34 }
 0x47e   :  { %2935 = vmatpush.msra.mxu3 %v3911_v20  ;;  %2977 = vmatpush.msrb.mxu1 %v3983_v48  ;;  %v3979_v46 = vunpack.c.l.bf16 %v4319_v36 }
 0x47f   :  { %2952 = vmatpush.msrb.mxu0 %v3955_v6  ;;  %v3980_v6 = vunpack.c.h.bf16 %v4319_v36 }
 0x480   :  { %2936 = vmatpush.msra.mxu3 %v3908_v28 }
 0x481   :  { %2953 = vmatpush.msrb.mxu0 %v3952_v8  ;;  %2978 = vmatpush.msrb.mxu1 %v3980_v6  ;;  %v3904_v8 = vunpack.c.h.bf16 %v4300_v27  ;;  %v4327_v6 = vld [vmem:[%s7185_s11 + $0x30] sm:$0xff]  }
 0x482   :  { %2937 = vmatpush.msra.mxu3 %v3907_v39  ;;  %v4015_v27 = vunpack.c.l.bf16 %v4327_v6 }
 0x483   :  { %2954 = vmatpush.msrb.mxu0 %v3951_v30  ;;  %2979 = vmatpush.msrb.mxu1 %v3979_v46  ;;  %v3927_v30 = vunpack.c.l.bf16 %v4306_v52  ;;  %v4016_v46 = vunpack.c.h.bf16 %v4327_v6  ;;  %v4326_v52 = vld [vmem:[%s7185_s11 + $0x28] sm:$0xff]  }
 0x484   :  { %2938 = vmatpush.msra.mxu3 %v3904_v8  ;;  %v4325_v8 = vld [vmem:[%s7185_s11 + $0x20] sm:$0xff]   ;;  %v4338_v6 = vld [vmem:[%s7185_s11 + $0x88] sm:$0xff]  }
 0x485   :  { %2955 = vmatpush.msrb.mxu0 %v3948_v33  ;;  %2980 = vmatpush.msrb.mxu1 %v3976_v37  ;;  %v4298_v33 = vld [vmem:[%s7183_s9 + $0xc0] sm:$0xff]   ;;  %v4052_v37 = vunpack.c.h.bf16 %v4336_v35  ;;  %v4059_v35 = vunpack.c.l.bf16 %v4338_v6 }
 0x486   :  { %2939 = vmatpush.msra.mxu3 %v3903_v51  ;;  %v3896_v41 = vunpack.c.h.bf16 %v4298_v33  ;;  %v4011_v51 = vunpack.c.l.bf16 %v4326_v52 }
 0x487   :  { %2956 = vmatpush.msrb.mxu0 %v3947_v54  ;;  %2981 = vmatpush.msrb.mxu1 %v3975_v17  ;;  %v3895_v54 = vunpack.c.l.bf16 %v4298_v33  ;;  %v4048_v17 = vunpack.c.h.bf16 %v4335_v38  ;;  %v4344_v33 = vld [vmem:[%s7185_s11 + $0xb8] sm:$0xff]  }
 0x488   :  { %2940 = vmatpush.msra.mxu3 %v3900_v50  ;;  %v4007_v50 = vunpack.c.l.bf16 %v4325_v8 }
 0x489   :  { %2957 = vmatpush.msrb.mxu0 %v3944_v22  ;;  %2982 = vmatpush.msrb.mxu1 %v3972_v1  ;;  %v2517_v22 = vperm.slane %v2515_v13, 0  ;;  %v4047_v1 = vunpack.c.l.bf16 %v4335_v38 }
 0x48a   :  { %2941 = vmatpush.msra.mxu3 %v3899_v43  ;;  %v4324_v43 = vld [vmem:[%s7185_s11 + $0x18] sm:$0xff]  }
 0x48b   :  { %2958 = vmatpush.msrb.mxu0 %v3943_v3  ;;  %2983 = vmatpush.msrb.mxu1 %v3971_v21  ;;  %v3960_v3 = vunpack.c.h.bf16 %v4314_v40  ;;  %v4334_v21 = vld [vmem:[%s7185_s11 + $0x68] sm:$0xff]   ;;  %v4004_v26 = vunpack.c.h.bf16 %v4324_v43  ;;  %v4003_v13 = vunpack.c.l.bf16 %v4324_v43 }
 0x48c   :  { %2942 = vmatpush.msra.mxu3 %v3896_v41  ;;  %v4084_v41 = vunpack.c.h.bf16 %v4344_v33 }
 0x48d   :  { %2959 = vmatpush.msrb.mxu0 %v3940_v23  ;;  %2984 = vmatpush.msrb.mxu1 %v3968_v55  ;;  %v4323_v55 = vld [vmem:[%s7185_s11 + $0x10] sm:$0xff]  }
 0x48e   :  { %2943 = vmatpush.msra.mxu3 %v3895_v54  ;;  %v4333_v54 = vld [vmem:[%s7185_s11 + $0x60] sm:$0xff]  }
 0x48f   :  { %2960 = vmatpush.msrb.mxu0 %v3939_v5  ;;  %2985 = vmatpush.msrb.mxu1 %v3967_v60  ;;  %v4043_v60 = vunpack.c.l.bf16 %v4334_v21  ;;  %v4039_v40 = vunpack.c.l.bf16 %v4333_v54 }
 0x490   :  { %v2538_v10 = vpop.f32.mrf.mxu1  ;;  %3122 = vmatpush.msrb.mxu3 %v4052_v37 }
 0x491   :  { %2961 = vmatpush.msrb.mxu0 %v3936_v11  ;;  %v2539_v58 = vadd.f32 %v2538_v10, %v2517_v22  ;;  %2986 = vmatpush.msrb.mxu1 %v3964_v42  ;;  %v4044_v10 = vunpack.c.h.bf16 %v4334_v21  ;;  %v4080_v42 = vunpack.c.h.bf16 %v4343_v9 }
 0x492   :  { %3123 = vmatpush.msrb.mxu3 %v4051_v57 }
 0x493   :  { %2962 = vmatpush.msrb.mxu0 %v3935_v47  ;;  %2987 = vmatpush.msrb.mxu1 %v3963_v18  ;;  %v3999_v18 = vunpack.c.l.bf16 %v4323_v55 }
 0x494   :  { %3124 = vmatpush.msrb.mxu3 %v4048_v17 }
 0x495   :  { %2963 = vmatpush.msrb.mxu0 %v3932_v0  ;;  %2988 = vmatpush.msrb.mxu1 %v3960_v3  ;;  %v4328_v0 = vld [vmem:[%s7185_s11 + $0x38] sm:$0xff]   ;;  %v4079_v3 = vunpack.c.l.bf16 %v4343_v9 }
 0x496   :  { %v4020_v39 = vunpack.c.h.bf16 %v4328_v0  ;;  %3125 = vmatpush.msrb.mxu3 %v4047_v1 }
 0x497   :  { %2964 = vmatpush.msrb.mxu0 %v3931_v29  ;;  %2989 = vmatpush.msrb.mxu1 %v3959_v7  ;;  %v4019_v29 = vunpack.c.l.bf16 %v4328_v0  ;;  %v4332_v7 = vld [vmem:[%s7185_s11 + $0x58] sm:$0xff]  }
 0x498   :  { %3099 = vmatpush.msrb.mxu2 %v4020_v39  ;;  %3126 = vmatpush.msrb.mxu3 %v4044_v10 }
 0x499   :  { %2965 = vmatpush.msrb.mxu0 %v3928_v19  ;;  %v4012_v19 = vunpack.c.h.bf16 %v4326_v52  ;;  %v4337_v52 = vld [vmem:[%s7185_s11 + $0x80] sm:$0xff]  }
 0x49a   :  { %3100 = vmatpush.msrb.mxu2 %v4019_v29  ;;  %3127 = vmatpush.msrb.mxu3 %v4043_v60  ;;  %v4055_v37 = vunpack.c.l.bf16 %v4337_v52 }
 0x49b   :  { %2966 = vmatpush.msrb.mxu0 %v3927_v30  ;;  %v4008_v30 = vunpack.c.h.bf16 %v4325_v8 }
 0x49c   :  { %3101 = vmatpush.msrb.mxu2 %v4016_v46 }
 0x49d   :  { %3145 = vmatpush.msra.mxu0 %v4084_v41 }
 0x49e   :  { %3102 = vmatpush.msrb.mxu2 %v4015_v27  ;;  %v4060_v27 = vunpack.c.h.bf16 %v4338_v6  ;;  %v4347_v6 = vld [vmem:[%s7187_s13 + $0x18] sm:$0xff]  }
 0x4a0   :  { %3103 = vmatpush.msrb.mxu2 %v4012_v19  ;;  %v4056_v19 = vunpack.c.h.bf16 %v4337_v52 }
 0x4a2   :  { %3104 = vmatpush.msrb.mxu2 %v4011_v51  ;;  %v4387_v51 = vld [vmem:[%s7184_s10] ss:$0 sm:$0xff]  ;;  %s3417_s10 = sshll.u32 %s7193_s19, 4  ;;  %s3418_s10 = int_to_ptr.hbm [resolvable:$true] %s3417_s10 }
 0x4a4   :  { %3105 = vmatpush.msrb.mxu2 %v4008_v30 }
 0x4a6   :  { %3106 = vmatpush.msrb.mxu2 %v4007_v50 }
 0x4a8   :  { %3107 = vmatpush.msrb.mxu2 %v4004_v26 }
 0x4aa   :  { %3108 = vmatpush.msrb.mxu2 %v4003_v13 }
 0x4bb   :  { %v2541_v24 = vpop.f32.mrf.mxu1 }
 0x4bc   :  { %v2542_v49 = vadd.f32 %v2541_v24, %v2517_v22  ;;  %v4000_v22 = vunpack.c.h.bf16 %v4323_v55  ;;  %v4322_v24 = vld [vmem:[%s7185_s11 + $0x8] sm:$0xff]  }
 0x4be   :  { %3109 = vmatpush.msrb.mxu2 %v4000_v22 }
 0x4c0   :  { %3110 = vmatpush.msrb.mxu2 %v3999_v18 }
 0x4c1   :  { %v2561_v12 = vpop.f32.mrf.mxu2 }
 0x4c2   :  { %v2562_v31 = vadd.f32 %v2561_v12, %v2539_v58  ;;  %v4083_v12 = vunpack.c.l.bf16 %v4344_v33  ;;  %v4040_v58 = vunpack.c.h.bf16 %v4333_v54 }
 0x4c3   :  { %v2607_v5 = vpop.f32.mrf.mxu1 }
 0x4c4   :  { %v2608_v15 = vadd.f32 %v2607_v5, %v2518_v16  ;;  %3146 = vmatpush.msra.mxu0 %v4083_v12  ;;  %3128 = vmatpush.msrb.mxu3 %v4040_v58  ;;  %v4341_v5 = vld [vmem:[%s7185_s11 + $0xa0] sm:$0xff]  }
 0x4c6   :  { %3147 = vmatpush.msra.mxu0 %v4080_v42  ;;  %3129 = vmatpush.msrb.mxu3 %v4039_v40 }
 0x4c8   :  { %3148 = vmatpush.msra.mxu0 %v4079_v3 }
 0x4cb   :  { %v2610_v34 = vpop.f32.mrf.mxu1 }
 0x4cc   :  { %v2611_v59 = vadd.f32 %v2610_v34, %v2518_v16  ;;  %v4340_v34 = vld [vmem:[%s7185_s11 + $0x98] sm:$0xff]  }
 0x4e1   :  { %v2564_v44 = vpop.f32.mrf.mxu2  ;;  %v2584_v23 = vpop.f32.mrf.mxu3 }
 0x4e2   :  { %v2585_v56 = vadd.f32 %v2584_v23, %v2562_v31  ;;  %v2565_v61 = vadd.f32 %v2564_v44, %v2542_v49  ;;  %v4342_v31 = vld [vmem:[%s7185_s11 + $0xa8] sm:$0xff]   ;;  %v3996_v44 = vunpack.c.h.bf16 %v4322_v24  ;;  %v4036_v23 = vunpack.c.h.bf16 %v4332_v7  ;;  %v3990_v49 = vld [vmem:[%s7185_s11] sm:$0xff]  }
 0x4e3   :  { %v4075_v16 = vunpack.c.l.bf16 %v4342_v31 }
 0x4e4   :  { %v2659_v4 = vmax.f32 %v2585_v56, 0.0  ;;  %v4076_v56 = vunpack.c.h.bf16 %v4342_v31  ;;  %3111 = vmatpush.msrb.mxu2 %v3996_v44  ;;  %3130 = vmatpush.msrb.mxu3 %v4036_v23  ;;  %v4350_v31 = vld [vmem:[%s7187_s13 + $0x30] sm:$0xff]  }
 0x4e6   :  { %2878 = vmatmul.f32.gmra.mxu0 %v2659_v4  ;;  %2921 = vmatmul.f32.vlgmr.msra.gmra.mxu2 %v2659_v4  ;;  %v3995_v4 = vunpack.c.l.bf16 %v4322_v24  ;;  %v4351_v24 = vld [vmem:[%s7187_s13 + $0x38] sm:$0xff]  }
 0x4e7   :  { %3149 = vmatpush.msra.mxu0 %v4076_v56  ;;  %v4116_v23 = vunpack.c.h.bf16 %v4351_v24 }
 0x4e8   :  { %3112 = vmatpush.msrb.mxu2 %v3995_v4  ;;  %v4115_v4 = vunpack.c.l.bf16 %v4351_v24 }
 0x4e9   :  { %v2587_v25 = vpop.f32.mrf.mxu3  ;;  %v2630_v32 = vpop.f32.mrf.mxu2  ;;  %3150 = vmatpush.msra.mxu0 %v4075_v16  ;;  %3254 = vmatpush.msra.mxu1 %v4116_v23  ;;  %v4349_v16 = vld [vmem:[%s7187_s13 + $0x28] sm:$0xff]  }
 0x4ea   :  { %v2588_v63 = vadd.f32 %v2587_v25, %v2565_v61  ;;  %v2631_v11 = vadd.f32 %v2630_v32, %v2608_v15  ;;  %v4331_v61 = vld [vmem:[%s7185_s11 + $0x50] sm:$0xff]   ;;  %v4035_v25 = vunpack.c.l.bf16 %v4332_v7  ;;  %v4072_v15 = vunpack.c.h.bf16 %v4341_v5  ;;  %v4359_v7 = vld [vmem:[%s7187_s13 + $0x78] sm:$0xff]  }
 0x4eb   :  { %v4032_v32 = vunpack.c.h.bf16 %v4331_v61  ;;  %v4148_v56 = vunpack.c.h.bf16 %v4359_v7  ;;  %3255 = vmatpush.msra.mxu1 %v4115_v4 }
 0x4ec   :  { %v2661_v62 = vmax.f32 %v2588_v63, 0.0  ;;  %v3992_v63 = vunpack.c.h.bf16 %v3990_v49  ;;  %3131 = vmatpush.msrb.mxu3 %v4035_v25  ;;  %3151 = vmatpush.msra.mxu0 %v4072_v15  ;;  %v4388_v25 = vld [vmem:[%s7186_s12] ss:$0 sm:$0xff] }
 0x4ee   :  { %2924 = vmatmul.f32.gmra.mxu2 %v2661_v62  ;;  %2967 = vmatmul.f32.vlgmr.msrb.gmra.mxu0 %v2661_v62  ;;  %v3991_v62 = vunpack.c.l.bf16 %v3990_v49  ;;  %v4147_v49 = vunpack.c.l.bf16 %v4359_v7 }
 0x4ef   :  { %3113 = vmatpush.msrb.mxu2 %v3992_v63  ;;  %3132 = vmatpush.msrb.mxu3 %v4032_v32  ;;  %v4357_v63 = vld [vmem:[%s7187_s13 + $0x68] sm:$0xff]   ;;  %v4111_v32 = vunpack.c.l.bf16 %v4350_v31 }
 0x4f1   :  { %v2653_v45 = vpop.f32.mrf.mxu3  ;;  %v2633_v53 = vpop.f32.mrf.mxu2  ;;  %3114 = vmatpush.msrb.mxu2 %v3991_v62 }
 0x4f2   :  { %v2654_v2 = vadd.f32 %v2653_v45, %v2631_v11  ;;  %v2634_v36 = vadd.f32 %v2633_v53, %v2611_v59  ;;  %v4031_v11 = vunpack.c.l.bf16 %v4331_v61  ;;  %v4071_v45 = vunpack.c.l.bf16 %v4341_v5 }
 0x4f3   :  { %v4068_v59 = vunpack.c.h.bf16 %v4340_v34  ;;  %3274 = vmatpush.msra.mxu2 %v4148_v56  ;;  %v4112_v61 = vunpack.c.h.bf16 %v4350_v31  ;;  %v4366_v31 = vld [vmem:[%s7189_s15 + $0x38] sm:$0xff]  }
 0x4f4   :  { %v2660_v20 = vmax.f32 %v2654_v2, 0.0  ;;  %3133 = vmatpush.msrb.mxu3 %v4031_v11  ;;  %3152 = vmatpush.msra.mxu0 %v4071_v45  ;;  %v4330_v2 = vld [vmem:[%s7185_s11 + $0x48] sm:$0xff]   ;;  %v4108_v11 = vunpack.c.h.bf16 %v4349_v16  ;;  %v4140_v45 = vunpack.c.h.bf16 %v4357_v63  ;;  %v4180_v23 = vunpack.c.h.bf16 %v4366_v31 }
 0x4f5   :  { %v4028_v53 = vunpack.c.h.bf16 %v4330_v2  ;;  %v2899_v8 = vpop.f32.mrf.mxu1  ;;  %3275 = vmatpush.msra.mxu2 %v4147_v49  ;;  %3256 = vmatpush.msra.mxu1 %v4112_v61  ;;  %v4179_v56 = vunpack.c.l.bf16 %v4366_v31  ;;  %v4364_v49 = vld [vmem:[%s7189_s15 + $0x28] sm:$0xff]   ;;  %v4391_v31 = vld [vmem:[%s7192_s18] ss:$0 sm:$0xff] }
 0x4f6   :  { %2901 = vmatmul.f32.gmra.mxu1 %v2660_v20  ;;  %2944 = vmatmul.f32.vlgmr.msra.gmra.mxu3 %v2660_v20  ;;  %v4329_v20 = vld [vmem:[%s7185_s11 + $0x40] sm:$0xff]   ;;  %v4172_v61 = vunpack.c.h.bf16 %v4364_v49 }
 0x4f7   :  { %2970 = vmatmul.f32.gmra.mxu0 %v7224_v14  ;;  %3115 = vmatmul.f32.vlgmr.msrb.gmra.mxu2 %v7224_v14  ;;  %v4023_v29 = vunpack.c.l.bf16 %v4329_v20 }
 0x4f8   :  { %3134 = vmatpush.msrb.mxu3 %v4028_v53  ;;  %3153 = vmatpush.msra.mxu0 %v4068_v59  ;;  %v4107_v59 = vunpack.c.l.bf16 %v4349_v16 }
 0x4f9   :  { %v2656_v47 = vpop.f32.mrf.mxu3  ;;  %v2876_v39 = vpop.f32.mrf.mxu0  ;;  %3257 = vmatpush.msra.mxu1 %v4111_v32 }
 0x4fa   :  { %v2657_v48 = vadd.f32 %v2656_v47, %v2634_v36  ;;  %v4027_v36 = vunpack.c.l.bf16 %v4330_v2  ;;  %v4067_v47 = vunpack.c.l.bf16 %v4340_v34  ;;  %v2877_v38 = vadd.f32 %v4387_v51, %v2876_v39  ;;  %v4348_v34 = vld [vmem:[%s7187_s13 + $0x20] sm:$0xff]   ;;  %v4355_v39 = vld [vmem:[%s7187_s13 + $0x58] sm:$0xff]  }
 0x4fb   :  { %3258 = vmatpush.msra.mxu1 %v4108_v11 }
 0x4fc   :  { %v2662_v28 = vmax.f32 %v2657_v48, 0.0  ;;  %v4339_v48 = vld [vmem:[%s7185_s11 + $0x90] sm:$0xff]   ;;  %3135 = vmatpush.msrb.mxu3 %v4027_v36  ;;  %3154 = vmatpush.msra.mxu0 %v4067_v47  ;;  %v2900_v17 = vadd.f32 %v2899_v8, %v2877_v38  ;;  %v4139_v36 = vunpack.c.l.bf16 %v4357_v63  ;;  %v4132_v8 = vunpack.c.h.bf16 %v4355_v39  ;;  %v4362_v63 = vld [vmem:[%s7189_s15 + $0x18] sm:$0xff]  }
 0x4fd   :  { %v4064_v0 = vunpack.c.h.bf16 %v4339_v48  ;;  %v4063_v46 = vunpack.c.l.bf16 %v4339_v48  ;;  %v4104_v48 = vunpack.c.h.bf16 %v4348_v34  ;;  %3259 = vmatpush.msra.mxu1 %v4107_v59  ;;  %v4361_v59 = vld [vmem:[%s7189_s15 + $0x10] sm:$0xff]  }
 0x4fe   :  { %2947 = vmatmul.f32.gmra.mxu3 %v2662_v28  ;;  %2990 = vmatmul.f32.vlgmr.msrb.gmra.mxu1 %v2662_v28  ;;  %v4024_v28 = vunpack.c.h.bf16 %v4329_v20  ;;  %v4356_v20 = vld [vmem:[%s7187_s13 + $0x60] sm:$0xff]  }
 0x4ff   :  { %3155 = vmatpush.msra.mxu0 %v4064_v0  ;;  %3260 = vmatpush.msra.mxu1 %v4104_v48  ;;  %v4159_v48 = vunpack.c.l.bf16 %v4361_v59 }
 0x500   :  { %3136 = vmatpush.msrb.mxu3 %v4024_v28  ;;  %v4136_v28 = vunpack.c.h.bf16 %v4356_v20 }
 0x501   :  { %3156 = vmatpush.msra.mxu0 %v4063_v46  ;;  %v4135_v46 = vunpack.c.l.bf16 %v4356_v20 }
 0x502   :  { %3137 = vmatpush.msrb.mxu3 %v4023_v29  ;;  %v4103_v29 = vunpack.c.l.bf16 %v4348_v34 }
 0x503   :  { %3157 = vmatpush.msra.mxu0 %v4060_v27 }
 0x504   :  { %3261 = vmatpush.msra.mxu1 %v4103_v29  ;;  %3331 = vmatpush.msra.mxu3 %v4180_v23 }
 0x505   :  { %3158 = vmatpush.msra.mxu0 %v4059_v35  ;;  %v4100_v35 = vunpack.c.h.bf16 %v4347_v6 }
 0x506   :  { %2993 = vmatmul.f32.gmra.mxu1 %v7224_v14  ;;  %3332 = vmatpush.msra.mxu3 %v4179_v56 }
 0x507   :  { %3159 = vmatpush.msra.mxu0 %v4056_v19  ;;  %3262 = vmatpush.msra.mxu1 %v4100_v35 }
 0x509   :  { %3160 = vmatpush.msra.mxu0 %v4055_v37 }
 0x563   :  { %v2879_v57 = vpop.f32.mrf.mxu0 }
 0x564   :  { %v2880_v33 = vadd.f32 %v4387_v51, %v2879_v57  ;;  %v4346_v51 = vld [vmem:[%s7187_s13 + $0x10] sm:$0xff]  }
 0x565   :  { %v4354_v57 = vld [vmem:[%s7187_s13 + $0x50] sm:$0xff]  }
 0x569   :  { %v2922_v50 = vpop.f32.mrf.mxu2 }
 0x56a   :  { %v2923_v1 = vadd.f32 %v2922_v50, %v2900_v17  ;;  %v4131_v17 = vunpack.c.l.bf16 %v4355_v39 }
 0x56b   :  { %v2968_v43 = vpop.f32.mrf.mxu0 }
 0x571   :  { %v2925_v9 = vpop.f32.mrf.mxu2 }
 0x573   :  { %v2902_v30 = vpop.f32.mrf.mxu1 }
 0x574   :  { %v2903_v41 = vadd.f32 %v2902_v30, %v2880_v33  ;;  %v2971_v42 = vpop.f32.mrf.mxu0  ;;  %v4099_v30 = vunpack.c.l.bf16 %v4347_v6  ;;  %v4150_v6 = vld [vmem:[%s7189_s15] sm:$0xff]  }
 0x575   :  { %v4152_v39 = vunpack.c.h.bf16 %v4150_v6  ;;  %v4151_v29 = vunpack.c.l.bf16 %v4150_v6 }
 0x576   :  { %v2926_v60 = vadd.f32 %v2925_v9, %v2903_v41  ;;  %3263 = vmatpush.msra.mxu1 %v4099_v30  ;;  %v4095_v41 = vunpack.c.l.bf16 %v4346_v51 }
 0x579   :  { %v2945_v21 = vpop.f32.mrf.mxu3 }
 0x57a   :  { %v2946_v26 = vadd.f32 %v2945_v21, %v2923_v1  ;;  %v3116_v44 = vpop.f32.mrf.mxu2  ;;  %v4096_v1 = vunpack.c.h.bf16 %v4346_v51 }
 0x57b   :  { %v2991_v10 = vpop.f32.mrf.mxu1  ;;  %v3117_v2 = vadd.f32 %v4388_v25, %v3116_v44  ;;  %v4365_v44 = vld [vmem:[%s7189_s15 + $0x30] sm:$0xff]  }
 0x57c   :  { %v2969_v55 = vadd.f32 %v2968_v43, %v2946_v26  ;;  %v4128_v43 = vunpack.c.h.bf16 %v4354_v57  ;;  %v4345_v26 = vld [vmem:[%s7187_s13 + $0x8] sm:$0xff]   ;;  %3264 = vmatpush.msra.mxu1 %v4096_v1  ;;  %v4176_v4 = vunpack.c.h.bf16 %v4365_v44 }
 0x57d   :  { %v4092_v9 = vunpack.c.h.bf16 %v4345_v26 }
 0x57e   :  { %v2992_v54 = vadd.f32 %v2991_v10, %v2969_v55  ;;  %v4353_v10 = vld [vmem:[%s7187_s13 + $0x48] sm:$0xff]   ;;  %v4127_v55 = vunpack.c.l.bf16 %v4354_v57  ;;  %3265 = vmatpush.msra.mxu1 %v4095_v41  ;;  %3333 = vmatpush.msra.mxu3 %v4176_v4  ;;  %v4370_v57 = vld [vmem:[%s7191_s17 + $0x20] sm:$0xff]  }
 0x57f   :  { %v4200_v30 = vunpack.c.h.bf16 %v4370_v57  ;;  %v4389_v41 = vld [vmem:[%s7188_s14] ss:$0 sm:$0xff] }
 0x580   :  { %v2997_v13 = vmax.f32 %v2992_v54, 0.0  ;;  %3266 = vmatpush.msra.mxu1 %v4092_v9 }
 0x581   :  { %v2948_v12 = vpop.f32.mrf.mxu3 }
 0x582   :  { %v2949_v22 = vadd.f32 %v2948_v12, %v2926_v60  ;;  %3118 = vmatmul.f32.gmra.mxu2 %v2997_v13  ;;  %3138 = vmatmul.f32.vlgmr.msrb.gmra.mxu3 %v2997_v13  ;;  %v4124_v13 = vunpack.c.h.bf16 %v4353_v10  ;;  %v4086_v60 = vld [vmem:[%s7187_s13] sm:$0xff]  }
 0x583   :  { %v2994_v58 = vpop.f32.mrf.mxu1  ;;  %v4352_v12 = vld [vmem:[%s7187_s13 + $0x40] sm:$0xff]   ;;  %v4087_v24 = vunpack.c.l.bf16 %v4086_v60 }
 0x584   :  { %v2972_v18 = vadd.f32 %v2971_v42, %v2949_v22  ;;  %v4091_v42 = vunpack.c.l.bf16 %v4345_v26  ;;  %v4123_v22 = vunpack.c.l.bf16 %v4353_v10  ;;  %v4119_v7 = vunpack.c.l.bf16 %v4352_v12  ;;  %v4367_v26 = vld [vmem:[%s7191_s17 + $0x8] sm:$0xff]  }
 0x586   :  { %v2995_v40 = vadd.f32 %v2994_v58, %v2972_v18  ;;  %v4088_v58 = vunpack.c.h.bf16 %v4086_v60  ;;  %v4120_v18 = vunpack.c.h.bf16 %v4352_v12  ;;  %3267 = vmatpush.msra.mxu1 %v4091_v42  ;;  %v4187_v42 = vunpack.c.l.bf16 %v4367_v26 }
 0x588   :  { %v2998_v3 = vmax.f32 %v2995_v40, 0.0  ;;  %3268 = vmatpush.msra.mxu1 %v4088_v58 }
 0x58a   :  { %3141 = vmatmul.f32.gmra.mxu3 %v2998_v3  ;;  %3161 = vmatmul.f32.vlgmr.msra.gmra.mxu0 %v2998_v3 }
 0x58b   :  { %3269 = vmatpush.msra.mxu1 %v4087_v24 }
 0x592   :  { %3164 = vmatmul.f32.gmra.mxu0 %v7224_v14  ;;  %v4358_v14 = vld [vmem:[%s7187_s13 + $0x70] sm:$0xff]  }
 0x593   :  { %v4144_v5 = vunpack.c.h.bf16 %v4358_v14  ;;  %v4143_v15 = vunpack.c.l.bf16 %v4358_v14  ;;  %v4175_v14 = vunpack.c.l.bf16 %v4365_v44 }
 0x595   :  { %3276 = vmatpush.msra.mxu2 %v4144_v5  ;;  %v4363_v5 = vld [vmem:[%s7189_s15 + $0x20] sm:$0xff]   ;;  %3334 = vmatpush.msra.mxu3 %v4175_v14 }
 0x596   :  { %v4168_v16 = vunpack.c.h.bf16 %v4363_v5  ;;  %v4167_v32 = vunpack.c.l.bf16 %v4363_v5 }
 0x597   :  { %3277 = vmatpush.msra.mxu2 %v4143_v15  ;;  %3335 = vmatpush.msra.mxu3 %v4172_v61  ;;  %v4164_v15 = vunpack.c.h.bf16 %v4362_v63 }
 0x599   :  { %3278 = vmatpush.msra.mxu2 %v4140_v45 }
 0x59b   :  { %3279 = vmatpush.msra.mxu2 %v4139_v36  ;;  %v4360_v36 = vld [vmem:[%s7189_s15 + $0x8] sm:$0xff]  }
 0x59d   :  { %3280 = vmatpush.msra.mxu2 %v4136_v28  ;;  %v4156_v28 = vunpack.c.h.bf16 %v4360_v36 }
 0x59f   :  { %3281 = vmatpush.msra.mxu2 %v4135_v46  ;;  %v4373_v46 = vld [vmem:[%s7191_s17 + $0x38] sm:$0xff]  }
 0x5a0   :  { %v4211_v35 = vunpack.c.l.bf16 %v4373_v46 }
 0x5a1   :  { %3282 = vmatpush.msra.mxu2 %v4132_v8 }
 0x5a3   :  { %3283 = vmatpush.msra.mxu2 %v4131_v17  ;;  %v4369_v17 = vld [vmem:[%s7191_s17 + $0x18] sm:$0xff]  }
 0x5a4   :  { %v4196_v1 = vunpack.c.h.bf16 %v4369_v17 }
 0x5a5   :  { %3284 = vmatpush.msra.mxu2 %v4128_v43  ;;  %v4368_v43 = vld [vmem:[%s7191_s17 + $0x10] sm:$0xff]  }
 0x5a6   :  { %v4191_v10 = vunpack.c.l.bf16 %v4368_v43 }
 0x5a7   :  { %3285 = vmatpush.msra.mxu2 %v4127_v55 }
 0x5a9   :  { %3286 = vmatpush.msra.mxu2 %v4124_v13 }
 0x5ab   :  { %3287 = vmatpush.msra.mxu2 %v4123_v22  ;;  %v4182_v22 = vld [vmem:[%s7191_s17] sm:$0xff]  }
 0x5ac   :  { %v4184_v58 = vunpack.c.h.bf16 %v4182_v22 }
 0x5ad   :  { %3288 = vmatpush.msra.mxu2 %v4120_v18  ;;  %v4183_v18 = vunpack.c.l.bf16 %v4182_v22 }
 0x5af   :  { %3289 = vmatpush.msra.mxu2 %v4119_v7 }
 0x605   :  { %v3139_v62 = vpop.f32.mrf.mxu3  ;;  %v3119_v47 = vpop.f32.mrf.mxu2 }
 0x606   :  { %v3140_v0 = vadd.f32 %v3139_v62, %v3117_v2  ;;  %v3120_v27 = vadd.f32 %v4388_v25, %v3119_v47  ;;  %v4171_v25 = vunpack.c.l.bf16 %v4364_v49  ;;  %v4163_v62 = vunpack.c.l.bf16 %v4362_v63 }
 0x607   :  { %v3162_v53 = vpop.f32.mrf.mxu0  ;;  %v4160_v47 = vunpack.c.h.bf16 %v4361_v59 }
 0x608   :  { %v3163_v19 = vadd.f32 %v3162_v53, %v3140_v0  ;;  %3336 = vmatpush.msra.mxu3 %v4171_v25  ;;  %v4155_v0 = vunpack.c.l.bf16 %v4360_v36 }
 0x60a   :  { %v3168_v21 = vmax.f32 %v3163_v19, 0.0  ;;  %3337 = vmatpush.msra.mxu3 %v4168_v16  ;;  %v4371_v19 = vld [vmem:[%s7191_s17 + $0x28] sm:$0xff]  }
 0x60b   :  { %v4204_v51 = vunpack.c.h.bf16 %v4371_v19 }
 0x60c   :  { %3338 = vmatpush.msra.mxu3 %v4167_v32 }
 0x60d   :  { %v3142_v52 = vpop.f32.mrf.mxu3 }
 0x60e   :  { %v3143_v37 = vadd.f32 %v3142_v52, %v3120_v27  ;;  %3339 = vmatpush.msra.mxu3 %v4164_v15  ;;  %v4372_v27 = vld [vmem:[%s7191_s17 + $0x30] sm:$0xff]   ;;  %v4212_v52 = vunpack.c.h.bf16 %v4373_v46 }
 0x60f   :  { %v3165_v38 = vpop.f32.mrf.mxu0  ;;  %v4208_v8 = vunpack.c.h.bf16 %v4372_v27 }
 0x610   :  { %v3166_v50 = vadd.f32 %v3165_v38, %v3143_v37  ;;  %3340 = vmatpush.msra.mxu3 %v4163_v62  ;;  %3388 = vmatpush.msrb.mxu0 %v4212_v52  ;;  %v4207_v37 = vunpack.c.l.bf16 %v4372_v27  ;;  %v4203_v38 = vunpack.c.l.bf16 %v4371_v19 }
 0x612   :  { %v3169_v33 = vmax.f32 %v3166_v50, 0.0  ;;  %3341 = vmatpush.msra.mxu3 %v4160_v47  ;;  %3389 = vmatpush.msrb.mxu0 %v4211_v35  ;;  %v4199_v50 = vunpack.c.l.bf16 %v4370_v57 }
 0x614   :  { %v3170_v54 = vmax.f32 %v3168_v21, %v3169_v33  ;;  %3342 = vmatpush.msra.mxu3 %v4159_v48  ;;  %3390 = vmatpush.msrb.mxu0 %v4208_v8  ;;  %v4195_v21 = vunpack.c.l.bf16 %v4369_v17  ;;  %v4192_v33 = vunpack.c.h.bf16 %v4368_v43 }
 0x616   :  { %3171 = vst.msk [vmem:[#allocation2] sm:$0xff] %vm115_vm0, %v3170_v54  ;;  %3343 = vmatpush.msra.mxu3 %v4156_v28  ;;  %3391 = vmatpush.msrb.mxu0 %v4207_v37  ;;  %v4188_v54 = vunpack.c.h.bf16 %v4367_v26 }
 0x618   :  { %3344 = vmatpush.msra.mxu3 %v4155_v0  ;;  %3392 = vmatpush.msrb.mxu0 %v4204_v51 }
 0x61a   :  { %3345 = vmatpush.msra.mxu3 %v4152_v39  ;;  %3393 = vmatpush.msrb.mxu0 %v4203_v38 }
 0x61c   :  { %3346 = vmatpush.msra.mxu3 %v4151_v29  ;;  %3394 = vmatpush.msrb.mxu0 %v4200_v30 }
 0x61d   :  { %v3175_v40 = vld [vmem:[#allocation2 + $0x6] sm:$0x3]  ;;  %v3173_v3 = vld [vmem:[#allocation2 + $0x2] sm:$0x3]  ;;  %v3174_v45 = vld [vmem:[#allocation2 + $0x4] sm:$0x3] }
 0x61e   :  { %3181 = vrot.lane.b32.xlu0 %v3175_v40, %s4579_s26  ;;  %3177 = vrot.lane.b32.xlu1 %v3173_v3, %s4579_s26  ;;  %v3172_v34 = vld [vmem:[#allocation2] sm:$0x3] }
 0x61f   :  { %3395 = vmatpush.msrb.mxu0 %v4199_v50  ;;  %v4390_v40 = vld [vmem:[%s7190_s16] ss:$0 sm:$0xff] }
 0x621   :  { %3396 = vmatpush.msrb.mxu0 %v4196_v1 }
 0x623   :  { %3397 = vmatpush.msrb.mxu0 %v4195_v21 }
 0x625   :  { %3398 = vmatpush.msrb.mxu0 %v4192_v33 }
 0x627   :  { %3399 = vmatpush.msrb.mxu0 %v4191_v10 }
 0x629   :  { %3400 = vmatpush.msrb.mxu0 %v4188_v54 }
 0x62b   :  { %3401 = vmatpush.msrb.mxu0 %v4187_v42 }
 0x62d   :  { %3402 = vmatpush.msrb.mxu0 %v4184_v58 }
 0x62f   :  { %3403 = vmatpush.msrb.mxu0 %v4183_v18 }
 0x690   :  { %v3182_v11 = vpop.permute.xlu0 %3181  ;;  %v3178_v2 = vpop.permute.xlu1 %3177 }
 0x691   :  { %v3185_v20 = vsel %vm115_vm0, %v3174_v45, %v3182_v11  ;;  %v3184_v53 = vsel %vm115_vm0, %v3172_v34, %v3178_v2  ;;  %vm3408_vm0 = vcmask 17408  }
 0x692   :  { %3270 = vmatmul.f32.vlgmr.msra.gmra.mxu1 %v3184_v53  ;;  %3290 = vmatmul.f32.vlgmr.msra.gmra.mxu2 %v3185_v20 }
 0x70f   :  { %v3271_v55 = vpop.f32.mrf.mxu1 }
 0x710   :  { %v3272_v9 = vadd.f32 %v4389_v41, %v3271_v55 }
 0x715   :  { %v3291_v13 = vpop.f32.mrf.mxu2 }
 0x716   :  { %v3292_v60 = vadd.f32 %v3291_v13, %v3272_v9 }
 0x718   :  { %v3294_v12 = vmax.f32 %v3292_v60, 0.0 }
 0x71a   :  { %3347 = vmatmul.f32.vlgmr.msra.gmra.mxu3 %v3294_v12 }
 0x79d   :  { %v3348_v3 = vpop.f32.mrf.mxu3 }
 0x79e   :  { %v3349_v24 = vadd.f32 %v4390_v40, %v3348_v3 }
 0x7a0   :  { %v3351_v7 = vmax.f32 %v3349_v24, 0.0 }
 0x7a2   :  { %3404 = vmatmul.f32.vlgmr.msrb.gmra.mxu0 %v3351_v7 }
 0x81f   :  { %v3405_v44 = vpop.f32.mrf.mxu0 }
 0x820   :  { %v3406_v23 = vadd.f32 %v4391_v31, %v3405_v44 }
 0x822   :  { %3409 = vst.msk [vmem:[#allocation3] sm:$0x3] %vm3408_vm0, %v3406_v23 }
 0x823   :  { %3420 = dma.vmem_to_hbm [thread:$0]  %s3416_s29, 32, %s3418_s10, [#allocation4]  }
 0x824   :  { %4576 = dma.done.wait [#allocation4], 32  }
 0x825   :  { %4577 = vsyncadd [#allocation4], 4294967264 }
 0x826   :  { %3425 = vsyncpa [#allocation4], 1 }

</bundles_post_ra>
